<compile_context>
chip_gen: v5e
topology: v5e:2x2
jax: 0.10.0
libtpu: 0.0.40
codegen_flags: <defaults>
</compile_context>

<pallas_src>
import functools
import math

import jax
import jax.numpy as jnp
from jax.experimental import pallas as pl
from jax.experimental.pallas import tpu as pltpu


# ------------------------------- fused kernel --------------------------------

def decoder_stack_kernel(
    # constant-index operands (never re-fetched across the layer grid)
    x_ref, mem_ref, smask_ref, cmask_ref,
    # per-layer stacked params (leading dim = layer, indexed by the grid)
    wqkv1_ref, bqkv1_ref, wo1_ref, bo1_ref,
    wq2_ref, bq2_ref, wkv2_ref, bkv2_ref, wo2_ref, bo2_ref,
    w1_ref, b1_ref, w2_ref, b2_ref, ln_g_ref, ln_b_ref,
    # final norm params
    gf_ref, bf_ref,
    # output block; constant index across layers -> VMEM-resident activation carry
    out_ref,
    *, nhead, batch, seq_t, seq_m, has_final_norm):
  layer = pl.program_id(0)
  n_layers = pl.num_programs(0)

  D = out_ref.shape[-1]
  hd = D // nhead
  scale = 1.0 / math.sqrt(hd)
  m_t = batch * seq_t
  m_m = batch * seq_m

  # Layer 0: seed the resident output block with the input activation.  Writeback to
  # HBM only happens once, after the last grid step (output index map is constant).
  @pl.when(layer == 0)
  def _():
    out_ref[...] = x_ref[...].astype(out_ref.dtype)

  x = out_ref[...].reshape(m_t, D).astype(jnp.float32)        # (B*S_t, D) f32 carry
  mem2d = mem_ref[...].reshape(m_m, D)                        # (B*S_m, D)

  def mm(a, w):
    # bf16 MXU inputs (weights already stored bf16), f32 accumulation.
    return jnp.dot(a.astype(jnp.bfloat16), w, preferred_element_type=jnp.float32)

  def split_heads(t2d, seq):
    # (B*seq, D) -> (nhead*B, seq, hd).  head_dim = 128 in the demo config, so the
    # slices are whole-lane-tile moves; the concat is along a leading (major) axis.
    t3 = t2d.astype(jnp.bfloat16).reshape(batch, seq, D)
    return jnp.concatenate([t3[:, :, h * hd:(h + 1) * hd] for h in range(nhead)],
                           axis=0)

  def attention(q, k, v, add_mask, s_q, s_kv, wo, bo):
    # q: (B*s_q, D); k/v: (B*s_kv, D); add_mask: (s_q, s_kv) additive (finite), shared
    # across batch and heads.  Batch is a true batch dim — no cross-batch wasted work.
    qh = split_heads(q, s_q)                                  # (H*B, s_q, hd) bf16
    kh = split_heads(k, s_kv)
    vh = split_heads(v, s_kv)
    s = jnp.einsum("gqd,gkd->gqk", qh, kh,
                   preferred_element_type=jnp.float32) * scale
    s = s + add_mask[None, :, :]
    s = s - jnp.max(s, axis=-1, keepdims=True)                # f32 softmax stats
    p = jnp.exp(s)
    p = p * pl.reciprocal(jnp.sum(p, axis=-1, keepdims=True), approx=True)
    o = jnp.einsum("gqk,gkd->gqd", p.astype(jnp.bfloat16), vh,
                   preferred_element_type=jnp.float32)        # (H*B, s_q, hd) f32
    # merge_heads fused into the output projection: out = sum_h o_h @ Wo[h*hd:(h+1)*hd].
    acc = None
    for h in range(nhead):
      oh = o[h * batch:(h + 1) * batch].reshape(batch * s_q, hd).astype(jnp.bfloat16)
      part = jnp.dot(oh, wo[h * hd:(h + 1) * hd, :],
                     preferred_element_type=jnp.float32)
      acc = part if acc is None else acc + part
    return acc + bo

  def layer_norm(t, g, b, eps=1e-5):
    mu = jnp.mean(t, axis=-1, keepdims=True)
    var = jnp.mean(jnp.square(t - mu), axis=-1, keepdims=True)
    return (t - mu) * jax.lax.rsqrt(var + eps) * g + b

  ln_g = ln_g_ref[0]                                          # (3, D)
  ln_b = ln_b_ref[0]

  # ---- self-attention block (post-norm, packed QKV) ----
  qkv = mm(x, wqkv1_ref[0]) + bqkv1_ref[0]                    # (M_t, 3D)
  sa = attention(qkv[:, :D], qkv[:, D:2 * D], qkv[:, 2 * D:],
                 smask_ref[...], seq_t, seq_t, wo1_ref[0], bo1_ref[0])
  x = layer_norm(x + sa, ln_g[0:1, :], ln_b[0:1, :])

  # ---- cross-attention block (packed KV from memory) ----
  q2 = mm(x, wq2_ref[0]) + bq2_ref[0]                         # (M_t, D)
  kv2 = mm(mem2d, wkv2_ref[0]) + bkv2_ref[0]                  # (M_m, 2D)
  ca = attention(q2, kv2[:, :D], kv2[:, D:],
                 cmask_ref[...], seq_t, seq_m, wo2_ref[0], bo2_ref[0])
  x = layer_norm(x + ca, ln_g[1:2, :], ln_b[1:2, :])

  # ---- feed-forward block (ReLU) ----
  h = jnp.maximum(mm(x, w1_ref[0]) + b1_ref[0], 0.0)
  ff = mm(h, w2_ref[0]) + b2_ref[0]
  x = layer_norm(x + ff, ln_g[2:3, :], ln_b[2:3, :])

  @pl.when(layer < n_layers - 1)
  def _():
    out_ref[...] = x.reshape(batch, seq_t, D).astype(out_ref.dtype)

  @pl.when(layer == n_layers - 1)
  def _():
    y = layer_norm(x, gf_ref[...], bf_ref[...]) if has_final_norm else x
    out_ref[...] = y.reshape(batch, seq_t, D).astype(out_ref.dtype)


# --------------------------------- wrapper ------------------------------------

_STACKED_ORDER = [
    "wqkv1", "bqkv1", "wo1", "bo1",
    "wq2", "bq2", "wkv2", "bkv2", "wo2", "bo2",
    "w1", "b1", "w2", "b2", "ln_g", "ln_b",
]
_MATMUL_WEIGHTS = {"wqkv1", "wo1", "wq2", "wkv2", "wo2", "w1", "w2"}


def prepare_kernel_params(stacked_f32):
  """One-time (parameter-build-time) bf16 cast of the streamed matmul weights.

  Avoids a per-forward astype that would re-read the whole f32 weight stack from HBM
  and write a bf16 copy on every call (the kernel is weight-DMA bound at small M).
  """
  return {k: (v.astype(jnp.bfloat16) if k in _MATMUL_WEIGHTS else v)
          for k, v in stacked_f32.items()}


def _additive_mask(mask, s_q, s_kv, causal):
  # Only finite additive float masks are supported (use -1e9, not -inf).
  if mask is not None:
    return mask.astype(jnp.float32)
  if causal:
    r = jnp.arange(s_q)[:, None]
    c = jnp.arange(s_kv)[None, :]
    return jnp.where(c > r, -1e9, 0.0).astype(jnp.float32)
  return jnp.zeros((s_q, s_kv), jnp.float32)


def transformer_decoder_forward(tgt, memory, stacked, final_norm_params,
                                tgt_mask=None, memory_mask=None,
                                tgt_is_causal=False, memory_is_causal=False,
                                nhead=2):
  B, S_t, D = tgt.shape
  S_m = memory.shape[1]
  L = stacked["wqkv1"].shape[0]

  smask = _additive_mask(tgt_mask, S_t, S_t, tgt_is_causal)       # (S_t, S_t)
  cmask = _additive_mask(memory_mask, S_t, S_m, memory_is_causal)  # (S_t, S_m)

  has_final = final_norm_params is not None
  if has_final:
    gf, bf_ = final_norm_params
  else:
    gf = jnp.ones((1, D), jnp.float32)
    bf_ = jnp.zeros((1, D), jnp.float32)

  weight_args, weight_specs = [], []
  for name in _STACKED_ORDER:
    arr = stacked[name]                       # already bf16 for matmul weights
    weight_args.append(arr)
    nd = arr.ndim - 1
    weight_specs.append(
        pl.BlockSpec((1,) + arr.shape[1:], lambda l, nd=nd: (l,) + (0,) * nd))

  # VMEM budget from actual buffer sizes: double-buffered streamed per-layer weights +
  # constant-index operands (+ resident output carry) + compiler-scratch headroom,
  # clamped below v7x's 64 MiB core and above v5e's 16 MiB default scoped limit.
  nbytes = lambda a: int(a.size) * a.dtype.itemsize
  per_layer_w = sum(nbytes(stacked[n]) // L for n in _STACKED_ORDER)
  const_b = (sum(nbytes(a) for a in (tgt, memory, smask, cmask, gf, bf_))
             + nbytes(tgt))                   # + output carry block
  vmem_limit = int(max(16 << 20,
                       min(56 << 20, 2 * per_layer_w + 2 * const_b + (8 << 20))))

  kernel = functools.partial(
      decoder_stack_kernel, nhead=nhead, batch=B, seq_t=S_t, seq_m=S_m,
      has_final_norm=has_final)

  return pl.pallas_call(
      kernel,
      out_shape=jax.ShapeDtypeStruct((B, S_t, D), tgt.dtype),
      grid=(L,),
      in_specs=[
          pl.BlockSpec((B, S_t, D), lambda l: (0, 0, 0)),
          pl.BlockSpec((B, S_m, D), lambda l: (0, 0, 0)),
          pl.BlockSpec((S_t, S_t), lambda l: (0, 0)),
          pl.BlockSpec((S_t, S_m), lambda l: (0, 0)),
          *weight_specs,
          pl.BlockSpec((1, D), lambda l: (0, 0)),
          pl.BlockSpec((1, D), lambda l: (0, 0)),
      ],
      out_specs=pl.BlockSpec((B, S_t, D), lambda l: (0, 0, 0)),
      compiler_params=pltpu.CompilerParams(
          dimension_semantics=("arbitrary",),       # sequential layer dependency
          vmem_limit_bytes=vmem_limit),
  )(tgt, memory, smask, cmask, *weight_args, gf, bf_)


# --------------------------- pure-JAX reference (f32) --------------------------

def reference_decoder(tgt, memory, stacked, final_norm_params,
                      tgt_mask, memory_mask, nhead):
  B, S_t, D = tgt.shape
  hd = D // nhead
  scale = 1.0 / math.sqrt(hd)

  def ln(t, g, b, eps=1e-5):
    mu = t.mean(-1, keepdims=True)
    var = ((t - mu) ** 2).mean(-1, keepdims=True)
    return (t - mu) / jnp.sqrt(var + eps) * g + b

  def mha(q_in, kv_in, wq, bq, wk, bk, wv, bv, wo, bo, mask):
    q = q_in @ wq + bq
    k = kv_in @ wk + bk
    v = kv_in @ wv + bv
    split = lambda t: t.reshape(t.shape[0], t.shape[1], nhead, hd).transpose(0, 2, 1, 3)
    qh, kh, vh = split(q), split(k), split(v)
    s = jnp.einsum("bhqd,bhkd->bhqk", qh, kh) * scale
    if mask is not None:
      s = s + mask[None, None]
    p = jax.nn.softmax(s, axis=-1)
    o = jnp.einsum("bhqk,bhkd->bhqd", p, vh).transpose(0, 2, 1, 3)
    o = o.reshape(q_in.shape[0], q_in.shape[1], D)
    return o @ wo + bo

  x = tgt
  L = stacked["wqkv1"].shape[0]
  for l in range(L):
    wqkv, bqkv = stacked["wqkv1"][l], stacked["bqkv1"][l]
    sa = mha(x, x, wqkv[:, :D], bqkv[:, :D], wqkv[:, D:2 * D], bqkv[:, D:2 * D],
             wqkv[:, 2 * D:], bqkv[:, 2 * D:], stacked["wo1"][l], stacked["bo1"][l],
             tgt_mask)
    x = ln(x + sa, stacked["ln_g"][l][0], stacked["ln_b"][l][0])
    wkv, bkv = stacked["wkv2"][l], stacked["bkv2"][l]
    ca = mha(x, memory, stacked["wq2"][l], stacked["bq2"][l],
             wkv[:, :D], bkv[:, :D], wkv[:, D:], bkv[:, D:],
             stacked["wo2"][l], stacked["bo2"][l], memory_mask)
    x = ln(x + ca, stacked["ln_g"][l][1], stacked["ln_b"][l][1])
    h = jnp.maximum(x @ stacked["w1"][l] + stacked["b1"][l], 0.0)
    ff = h @ stacked["w2"][l] + stacked["b2"][l]
    x = ln(x + ff, stacked["ln_g"][l][2], stacked["ln_b"][l][2])
  if final_norm_params is not None:
    g, b = final_norm_params
    x = ln(x, g, b)
  return x


# ------------------------------ parameter setup --------------------------------

def init_layer_params(key, d_model, dim_ff):
  ks = jax.random.split(key, 14)
  w = lambda k, shape: 0.02 * jax.random.normal(k, shape, jnp.float32)
  return {
      "wqkv1": w(ks[0], (d_model, 3 * d_model)), "bqkv1": w(ks[1], (1, 3 * d_model)),
      "wo1":   w(ks[2], (d_model, d_model)),     "bo1":   w(ks[3], (1, d_model)),
      "wq2":   w(ks[4], (d_model, d_model)),     "bq2":   w(ks[5], (1, d_model)),
      "wkv2":  w(ks[6], (d_model, 2 * d_model)), "bkv2":  w(ks[7], (1, 2 * d_model)),
      "wo2":   w(ks[8], (d_model, d_model)),     "bo2":   w(ks[9], (1, d_model)),
      "w1":    w(ks[10], (d_model, dim_ff)),     "b1":    w(ks[11], (1, dim_ff)),
      "w2":    w(ks[12], (dim_ff, d_model)),     "b2":    w(ks[13], (1, d_model)),
      "ln_g":  jnp.ones((3, d_model), jnp.float32),
      "ln_b":  jnp.zeros((3, d_model), jnp.float32),
  }


# ----------------------------------- main ---------------------------------------

if __name__ == "__main__":
  B, S_T, S_M = 2, 8, 16
  D_MODEL, N_HEAD, DIM_FF, NUM_LAYERS = 256, 2, 512, 2   # head_dim = 128 (lane-tile)

  root = jax.random.PRNGKey(0)
  k_tgt, k_mem, *k_layers = jax.random.split(root, 2 + NUM_LAYERS)

  tgt = jax.random.normal(k_tgt, (B, S_T, D_MODEL), jnp.float32)
  memory = jax.random.normal(k_mem, (B, S_M, D_MODEL), jnp.float32)

  layer_ps = [init_layer_params(k, D_MODEL, DIM_FF) for k in k_layers]
  stacked_f32 = {name: jnp.stack([p[name] for p in layer_ps]) for name in layer_ps[0]}
  # bf16 weight cast happens exactly once here (parameter-build time), not per forward.
  kernel_params = prepare_kernel_params(stacked_f32)
  final_norm_params = (jnp.ones((1, D_MODEL), jnp.float32),
                       jnp.zeros((1, D_MODEL), jnp.float32))

  # causal additive mask for self-attention (finite values, no -inf); no memory mask.
  row = jnp.arange(S_T)[:, None]
  col = jnp.arange(S_T)[None, :]
  tgt_mask = jnp.where(col > row, -1e9, 0.0).astype(jnp.float32)

  out = transformer_decoder_forward(tgt, memory, kernel_params, final_norm_params,
                                    tgt_mask=tgt_mask, memory_mask=None,
                                    nhead=N_HEAD)
  out = jax.block_until_ready(out)
  assert out.shape == (B, S_T, D_MODEL)
  assert bool(jnp.all(jnp.isfinite(out)))

  ref = reference_decoder(tgt, memory, stacked_f32, final_norm_params,
                          tgt_mask, None, N_HEAD)
  err = float(jnp.max(jnp.abs(out - ref)))
  assert err < 5e-2, f"kernel/reference mismatch: max abs err = {err}"
  print("KERNEL_OK")
</pallas_src>

<mosaic_0001>
module attributes {stable_mosaic.version = 11 : i64} {
  func.func @decoder_stack_kernel(%arg0: i32, %arg1: memref<2x8x256xf32, #tpu.memory_space<vmem>>, %arg2: memref<2x16x256xf32, #tpu.memory_space<vmem>>, %arg3: memref<8x8xf32, #tpu.memory_space<vmem>>, %arg4: memref<8x16xf32, #tpu.memory_space<vmem>>, %arg5: memref<1x256x768xbf16, #tpu.memory_space<vmem>>, %arg6: memref<1x1x768xf32, #tpu.memory_space<vmem>>, %arg7: memref<1x256x256xbf16, #tpu.memory_space<vmem>>, %arg8: memref<1x1x256xf32, #tpu.memory_space<vmem>>, %arg9: memref<1x256x256xbf16, #tpu.memory_space<vmem>>, %arg10: memref<1x1x256xf32, #tpu.memory_space<vmem>>, %arg11: memref<1x256x512xbf16, #tpu.memory_space<vmem>>, %arg12: memref<1x1x512xf32, #tpu.memory_space<vmem>>, %arg13: memref<1x256x256xbf16, #tpu.memory_space<vmem>>, %arg14: memref<1x1x256xf32, #tpu.memory_space<vmem>>, %arg15: memref<1x256x512xbf16, #tpu.memory_space<vmem>>, %arg16: memref<1x1x512xf32, #tpu.memory_space<vmem>>, %arg17: memref<1x512x256xbf16, #tpu.memory_space<vmem>>, %arg18: memref<1x1x256xf32, #tpu.memory_space<vmem>>, %arg19: memref<1x3x256xf32, #tpu.memory_space<vmem>>, %arg20: memref<1x3x256xf32, #tpu.memory_space<vmem>>, %arg21: memref<1x256xf32, #tpu.memory_space<vmem>>, %arg22: memref<1x256xf32, #tpu.memory_space<vmem>>, %arg23: memref<2x8x256xf32, #tpu.memory_space<vmem>>) attributes {dimension_semantics = [#tpu.dimension_semantics<arbitrary>], iteration_bounds = array<i64: 2>, scalar_prefetch = 0 : i64, scratch_operands = 0 : i64, tpu.core_type = #tpu.core_type<tc>, window_params = [{pipeline_mode = #tpu.pipeline_mode<synchronous>, transform_indices = @transform_0, window_bounds = array<i64: 2, 8, 256>}, {pipeline_mode = #tpu.pipeline_mode<synchronous>, transform_indices = @transform_1, window_bounds = array<i64: 2, 16, 256>}, {pipeline_mode = #tpu.pipeline_mode<synchronous>, transform_indices = @transform_2, window_bounds = array<i64: 8, 8>}, {pipeline_mode = #tpu.pipeline_mode<synchronous>, transform_indices = @transform_3, window_bounds = array<i64: 8, 16>}, {transform_indices = @transform_4, window_bounds = array<i64: 1, 256, 768>}, {transform_indices = @transform_5, window_bounds = array<i64: 1, 1, 768>}, {transform_indices = @transform_6, window_bounds = array<i64: 1, 256, 256>}, {transform_indices = @transform_7, window_bounds = array<i64: 1, 1, 256>}, {transform_indices = @transform_8, window_bounds = array<i64: 1, 256, 256>}, {transform_indices = @transform_9, window_bounds = array<i64: 1, 1, 256>}, {transform_indices = @transform_10, window_bounds = array<i64: 1, 256, 512>}, {transform_indices = @transform_11, window_bounds = array<i64: 1, 1, 512>}, {transform_indices = @transform_12, window_bounds = array<i64: 1, 256, 256>}, {transform_indices = @transform_13, window_bounds = array<i64: 1, 1, 256>}, {transform_indices = @transform_14, window_bounds = array<i64: 1, 256, 512>}, {transform_indices = @transform_15, window_bounds = array<i64: 1, 1, 512>}, {transform_indices = @transform_16, window_bounds = array<i64: 1, 512, 256>}, {transform_indices = @transform_17, window_bounds = array<i64: 1, 1, 256>}, {transform_indices = @transform_18, window_bounds = array<i64: 1, 3, 256>}, {transform_indices = @transform_19, window_bounds = array<i64: 1, 3, 256>}, {pipeline_mode = #tpu.pipeline_mode<synchronous>, transform_indices = @transform_20, window_bounds = array<i64: 1, 256>}, {pipeline_mode = #tpu.pipeline_mode<synchronous>, transform_indices = @transform_21, window_bounds = array<i64: 1, 256>}, {pipeline_mode = #tpu.pipeline_mode<synchronous>, transform_indices = @transform_22, window_bounds = array<i64: 2, 8, 256>}]} {
    %c0_i32 = arith.constant 0 : i32
    %0 = arith.cmpi eq, %arg0, %c0_i32 : i32
    %1 = arith.extui %0 : i1 to i32
    %c0_i32_0 = arith.constant 0 : i32
    %2 = arith.cmpi ne, %1, %c0_i32_0 : i32
    scf.if %2 {
      %c0_95 = arith.constant 0 : index
      %c0_96 = arith.constant 0 : index
      %c0_97 = arith.constant 0 : index
      %241 = vector.load %arg1[%c0_95, %c0_96, %c0_97] : memref<2x8x256xf32, #tpu.memory_space<vmem>>, vector<2x8x256xf32>
      %c0_98 = arith.constant 0 : index
      %c0_99 = arith.constant 0 : index
      %c0_100 = arith.constant 0 : index
      %242 = vector.load %arg23[%c0_98, %c0_99, %c0_100] : memref<2x8x256xf32, #tpu.memory_space<vmem>>, vector<2x8x256xf32>
      tpu.vector_store %arg23[%c0_98, %c0_99, %c0_100], %241 {strides = array<i32>} : memref<2x8x256xf32, #tpu.memory_space<vmem>>, vector<2x8x256xf32>,
    } else {
    }
    %c0 = arith.constant 0 : index
    %c0_1 = arith.constant 0 : index
    %c0_2 = arith.constant 0 : index
    %3 = vector.load %arg23[%c0, %c0_1, %c0_2] : memref<2x8x256xf32, #tpu.memory_space<vmem>>, vector<2x8x256xf32>
    %4 = vector.shape_cast %3 : vector<2x8x256xf32> to vector<16x256xf32>
    %c0_3 = arith.constant 0 : index
    %c0_4 = arith.constant 0 : index
    %c0_5 = arith.constant 0 : index
    %5 = vector.load %arg2[%c0_3, %c0_4, %c0_5] : memref<2x16x256xf32, #tpu.memory_space<vmem>>, vector<2x16x256xf32>
    %6 = vector.shape_cast %5 : vector<2x16x256xf32> to vector<32x256xf32>
    %c0_6 = arith.constant 0 : index
    %c0_7 = arith.constant 0 : index
    %c0_8 = arith.constant 0 : index
    %7 = vector.load %arg19[%c0_6, %c0_7, %c0_8] : memref<1x3x256xf32, #tpu.memory_space<vmem>>, vector<1x3x256xf32>
    %8 = vector.shape_cast %7 : vector<1x3x256xf32> to vector<3x256xf32>
    %c0_9 = arith.constant 0 : index
    %c0_10 = arith.constant 0 : index
    %c0_11 = arith.constant 0 : index
    %9 = vector.load %arg20[%c0_9, %c0_10, %c0_11] : memref<1x3x256xf32, #tpu.memory_space<vmem>>, vector<1x3x256xf32>
    %10 = vector.shape_cast %9 : vector<1x3x256xf32> to vector<3x256xf32>
    %c0_12 = arith.constant 0 : index
    %c0_13 = arith.constant 0 : index
    %c0_14 = arith.constant 0 : index
    %11 = vector.load %arg5[%c0_12, %c0_13, %c0_14] : memref<1x256x768xbf16, #tpu.memory_space<vmem>>, vector<1x256x768xbf16>
    %12 = vector.shape_cast %11 : vector<1x256x768xbf16> to vector<256x768xbf16>
    %13 = arith.truncf %4 : vector<16x256xf32> to vector<16x256xbf16>
    %cst = arith.constant dense<0.000000e+00> : vector<16x768xf32>
    %14 = tpu.matmul %13, %12, %cst {dimension_numbers = #tpu.dot_dimension_numbers<[1], [0], [0], [1], [0, 0, 1, 1], [], []>} : vector<16x256xbf16>, vector<256x768xbf16>, vector<16x768xf32> -> vector<16x768xf32>
    %c0_15 = arith.constant 0 : index
    %c0_16 = arith.constant 0 : index
    %c0_17 = arith.constant 0 : index
    %15 = vector.load %arg6[%c0_15, %c0_16, %c0_17] : memref<1x1x768xf32, #tpu.memory_space<vmem>>, vector<1x1x768xf32>
    %16 = vector.shape_cast %15 : vector<1x1x768xf32> to vector<1x768xf32>
    %17 = vector.broadcast %16 : vector<1x768xf32> to vector<16x768xf32>
    %18 = arith.addf %14, %17 : vector<16x768xf32>
    %19 = vector.extract_strided_slice %18 {offsets = [0, 0], sizes = [16, 256], strides = [1, 1]} : vector<16x768xf32> to vector<16x256xf32>
    %20 = vector.extract_strided_slice %18 {offsets = [0, 256], sizes = [16, 256], strides = [1, 1]} : vector<16x768xf32> to vector<16x256xf32>
    %21 = vector.extract_strided_slice %18 {offsets = [0, 512], sizes = [16, 256], strides = [1, 1]} : vector<16x768xf32> to vector<16x256xf32>
    %c0_18 = arith.constant 0 : index
    %c0_19 = arith.constant 0 : index
    %22 = vector.load %arg3[%c0_18, %c0_19] : memref<8x8xf32, #tpu.memory_space<vmem>>, vector<8x8xf32>
    %c0_20 = arith.constant 0 : index
    %c0_21 = arith.constant 0 : index
    %c0_22 = arith.constant 0 : index
    %23 = vector.load %arg7[%c0_20, %c0_21, %c0_22] : memref<1x256x256xbf16, #tpu.memory_space<vmem>>, vector<1x256x256xbf16>
    %24 = vector.shape_cast %23 : vector<1x256x256xbf16> to vector<256x256xbf16>
    %c0_23 = arith.constant 0 : index
    %c0_24 = arith.constant 0 : index
    %c0_25 = arith.constant 0 : index
    %25 = vector.load %arg8[%c0_23, %c0_24, %c0_25] : memref<1x1x256xf32, #tpu.memory_space<vmem>>, vector<1x1x256xf32>
    %26 = vector.shape_cast %25 : vector<1x1x256xf32> to vector<1x256xf32>
    %27 = arith.truncf %19 : vector<16x256xf32> to vector<16x256xbf16>
    %28 = vector.shape_cast %27 : vector<16x256xbf16> to vector<2x8x256xbf16>
    %29 = vector.extract_strided_slice %28 {offsets = [0, 0, 0], sizes = [2, 8, 128], strides = [1, 1, 1]} : vector<2x8x256xbf16> to vector<2x8x128xbf16>
    %30 = vector.extract_strided_slice %28 {offsets = [0, 0, 128], sizes = [2, 8, 128], strides = [1, 1, 1]} : vector<2x8x256xbf16> to vector<2x8x128xbf16>
    %31 = tpu.concatenate %29, %30 in 0 : vector<2x8x128xbf16>, vector<2x8x128xbf16> -> vector<4x8x128xbf16>
    %32 = arith.truncf %20 : vector<16x256xf32> to vector<16x256xbf16>
    %33 = vector.shape_cast %32 : vector<16x256xbf16> to vector<2x8x256xbf16>
    %34 = vector.extract_strided_slice %33 {offsets = [0, 0, 0], sizes = [2, 8, 128], strides = [1, 1, 1]} : vector<2x8x256xbf16> to vector<2x8x128xbf16>
    %35 = vector.extract_strided_slice %33 {offsets = [0, 0, 128], sizes = [2, 8, 128], strides = [1, 1, 1]} : vector<2x8x256xbf16> to vector<2x8x128xbf16>
    %36 = tpu.concatenate %34, %35 in 0 : vector<2x8x128xbf16>, vector<2x8x128xbf16> -> vector<4x8x128xbf16>
    %37 = arith.truncf %21 : vector<16x256xf32> to vector<16x256xbf16>
    %38 = vector.shape_cast %37 : vector<16x256xbf16> to vector<2x8x256xbf16>
    %39 = vector.extract_strided_slice %38 {offsets = [0, 0, 0], sizes = [2, 8, 128], strides = [1, 1, 1]} : vector<2x8x256xbf16> to vector<2x8x128xbf16>
    %40 = vector.extract_strided_slice %38 {offsets = [0, 0, 128], sizes = [2, 8, 128], strides = [1, 1, 1]} : vector<2x8x256xbf16> to vector<2x8x128xbf16>
    %41 = tpu.concatenate %39, %40 in 0 : vector<2x8x128xbf16>, vector<2x8x128xbf16> -> vector<4x8x128xbf16>
    "tpu.trace_start"() <{level = 10 : i32, message = "gqd,gkd->gqk"}> : () -> ()
    %cst_26 = arith.constant dense<0.000000e+00> : vector<4x8x8xf32>
    %42 = tpu.matmul %31, %36, %cst_26 {dimension_numbers = #tpu.dot_dimension_numbers<[2], [2], [1], [1], [0, 0, 0, 1, 1, 1], [0], [0]>} : vector<4x8x128xbf16>, vector<4x8x128xbf16>, vector<4x8x8xf32> -> vector<4x8x8xf32>
    "tpu.trace_stop"() : () -> ()
    %cst_27 = arith.constant 0.0883883461 : f32
    %43 = vector.broadcast %cst_27 : f32 to vector<4x8x8xf32>
    %44 = arith.mulf %42, %43 : vector<4x8x8xf32>
    %45 = vector.shape_cast %22 : vector<8x8xf32> to vector<1x8x8xf32>
    %46 = vector.broadcast %45 : vector<1x8x8xf32> to vector<4x8x8xf32>
    %47 = arith.addf %44, %46 : vector<4x8x8xf32>
    %cst_28 = arith.constant dense<0xFF800000> : vector<4x8xf32>
    %48 = vector.multi_reduction <maximumf>, %47, %cst_28 [2] : vector<4x8x8xf32> to vector<4x8xf32>
    %49 = vector.shape_cast %48 : vector<4x8xf32> to vector<4x8x1xf32>
    %50 = vector.broadcast %49 : vector<4x8x1xf32> to vector<4x8x8xf32>
    %51 = arith.subf %47, %50 : vector<4x8x8xf32>
    %52 = math.exp %51 : vector<4x8x8xf32>
    %cst_29 = arith.constant dense<0.000000e+00> : vector<4x8xf32>
    %53 = vector.multi_reduction <add>, %52, %cst_29 [2] : vector<4x8x8xf32> to vector<4x8xf32>
    %54 = vector.shape_cast %53 : vector<4x8xf32> to vector<4x8x1xf32>
    %55 = tpu.reciprocal %54 {approx = true} : vector<4x8x1xf32> -> vector<4x8x1xf32>
    %56 = vector.broadcast %55 : vector<4x8x1xf32> to vector<4x8x8xf32>
    %57 = arith.mulf %52, %56 : vector<4x8x8xf32>
    %58 = arith.truncf %57 : vector<4x8x8xf32> to vector<4x8x8xbf16>
    "tpu.trace_start"() <{level = 10 : i32, message = "gqk,gkd->gqd"}> : () -> ()
    %cst_30 = arith.constant dense<0.000000e+00> : vector<4x8x128xf32>
    %59 = tpu.matmul %58, %41, %cst_30 {dimension_numbers = #tpu.dot_dimension_numbers<[2], [1], [1], [2], [0, 0, 0, 1, 1, 2], [0], [0]>} : vector<4x8x8xbf16>, vector<4x8x128xbf16>, vector<4x8x128xf32> -> vector<4x8x128xf32>
    "tpu.trace_stop"() : () -> ()
    %60 = vector.extract_strided_slice %59 {offsets = [0, 0, 0], sizes = [2, 8, 128], strides = [1, 1, 1]} : vector<4x8x128xf32> to vector<2x8x128xf32>
    %61 = vector.shape_cast %60 : vector<2x8x128xf32> to vector<16x128xf32>
    %62 = arith.truncf %61 : vector<16x128xf32> to vector<16x128xbf16>
    %63 = vector.extract_strided_slice %24 {offsets = [0, 0], sizes = [128, 256], strides = [1, 1]} : vector<256x256xbf16> to vector<128x256xbf16>
    %cst_31 = arith.constant dense<0.000000e+00> : vector<16x256xf32>
    %64 = tpu.matmul %62, %63, %cst_31 {dimension_numbers = #tpu.dot_dimension_numbers<[1], [0], [0], [1], [0, 0, 1, 1], [], []>} : vector<16x128xbf16>, vector<128x256xbf16>, vector<16x256xf32> -> vector<16x256xf32>
    %65 = vector.extract_strided_slice %59 {offsets = [2, 0, 0], sizes = [2, 8, 128], strides = [1, 1, 1]} : vector<4x8x128xf32> to vector<2x8x128xf32>
    %66 = vector.shape_cast %65 : vector<2x8x128xf32> to vector<16x128xf32>
    %67 = arith.truncf %66 : vector<16x128xf32> to vector<16x128xbf16>
    %68 = vector.extract_strided_slice %24 {offsets = [128, 0], sizes = [128, 256], strides = [1, 1]} : vector<256x256xbf16> to vector<128x256xbf16>
    %cst_32 = arith.constant dense<0.000000e+00> : vector<16x256xf32>
    %69 = tpu.matmul %67, %68, %cst_32 {dimension_numbers = #tpu.dot_dimension_numbers<[1], [0], [0], [1], [0, 0, 1, 1], [], []>} : vector<16x128xbf16>, vector<128x256xbf16>, vector<16x256xf32> -> vector<16x256xf32>
    %70 = arith.addf %64, %69 : vector<16x256xf32>
    %71 = vector.broadcast %26 : vector<1x256xf32> to vector<16x256xf32>
    %72 = arith.addf %70, %71 : vector<16x256xf32>
    %73 = arith.addf %4, %72 : vector<16x256xf32>
    %74 = vector.extract_strided_slice %8 {offsets = [0, 0], sizes = [1, 256], strides = [1, 1]} : vector<3x256xf32> to vector<1x256xf32>
    %75 = vector.extract_strided_slice %10 {offsets = [0, 0], sizes = [1, 256], strides = [1, 1]} : vector<3x256xf32> to vector<1x256xf32>
    %cst_33 = arith.constant dense<0.000000e+00> : vector<16xf32>
    %76 = vector.multi_reduction <add>, %73, %cst_33 [1] : vector<16x256xf32> to vector<16xf32>
    %77 = vector.shape_cast %76 : vector<16xf32> to vector<16x1xf32>
    %cst_34 = arith.constant 2.560000e+02 : f32
    %78 = vector.broadcast %cst_34 : f32 to vector<16x1xf32>
    %79 = arith.divf %77, %78 : vector<16x1xf32>
    %80 = vector.broadcast %79 : vector<16x1xf32> to vector<16x256xf32>
    %81 = arith.subf %73, %80 : vector<16x256xf32>
    %82 = arith.mulf %81, %81 : vector<16x256xf32>
    %cst_35 = arith.constant dense<0.000000e+00> : vector<16xf32>
    %83 = vector.multi_reduction <add>, %82, %cst_35 [1] : vector<16x256xf32> to vector<16xf32>
    %84 = vector.shape_cast %83 : vector<16xf32> to vector<16x1xf32>
    %cst_36 = arith.constant 2.560000e+02 : f32
    %85 = vector.broadcast %cst_36 : f32 to vector<16x1xf32>
    %86 = arith.divf %84, %85 : vector<16x1xf32>
    %87 = vector.broadcast %79 : vector<16x1xf32> to vector<16x256xf32>
    %88 = arith.subf %73, %87 : vector<16x256xf32>
    %cst_37 = arith.constant 9.99999974E-6 : f32
    %89 = vector.broadcast %cst_37 : f32 to vector<16x1xf32>
    %90 = arith.addf %86, %89 : vector<16x1xf32>
    %91 = math.rsqrt %90 : vector<16x1xf32>
    %92 = vector.broadcast %91 : vector<16x1xf32> to vector<16x256xf32>
    %93 = arith.mulf %88, %92 : vector<16x256xf32>
    %94 = vector.broadcast %74 : vector<1x256xf32> to vector<16x256xf32>
    %95 = arith.mulf %93, %94 : vector<16x256xf32>
    %96 = vector.broadcast %75 : vector<1x256xf32> to vector<16x256xf32>
    %97 = arith.addf %95, %96 : vector<16x256xf32>
    %c0_38 = arith.constant 0 : index
    %c0_39 = arith.constant 0 : index
    %c0_40 = arith.constant 0 : index
    %98 = vector.load %arg9[%c0_38, %c0_39, %c0_40] : memref<1x256x256xbf16, #tpu.memory_space<vmem>>, vector<1x256x256xbf16>
    %99 = vector.shape_cast %98 : vector<1x256x256xbf16> to vector<256x256xbf16>
    %100 = arith.truncf %97 : vector<16x256xf32> to vector<16x256xbf16>
    %cst_41 = arith.constant dense<0.000000e+00> : vector<16x256xf32>
    %101 = tpu.matmul %100, %99, %cst_41 {dimension_numbers = #tpu.dot_dimension_numbers<[1], [0], [0], [1], [0, 0, 1, 1], [], []>} : vector<16x256xbf16>, vector<256x256xbf16>, vector<16x256xf32> -> vector<16x256xf32>
    %c0_42 = arith.constant 0 : index
    %c0_43 = arith.constant 0 : index
    %c0_44 = arith.constant 0 : index
    %102 = vector.load %arg10[%c0_42, %c0_43, %c0_44] : memref<1x1x256xf32, #tpu.memory_space<vmem>>, vector<1x1x256xf32>
    %103 = vector.shape_cast %102 : vector<1x1x256xf32> to vector<1x256xf32>
    %104 = vector.broadcast %103 : vector<1x256xf32> to vector<16x256xf32>
    %105 = arith.addf %101, %104 : vector<16x256xf32>
    %c0_45 = arith.constant 0 : index
    %c0_46 = arith.constant 0 : index
    %c0_47 = arith.constant 0 : index
    %106 = vector.load %arg11[%c0_45, %c0_46, %c0_47] : memref<1x256x512xbf16, #tpu.memory_space<vmem>>, vector<1x256x512xbf16>
    %107 = vector.shape_cast %106 : vector<1x256x512xbf16> to vector<256x512xbf16>
    %108 = arith.truncf %6 : vector<32x256xf32> to vector<32x256xbf16>
    %cst_48 = arith.constant dense<0.000000e+00> : vector<32x512xf32>
    %109 = tpu.matmul %108, %107, %cst_48 {dimension_numbers = #tpu.dot_dimension_numbers<[1], [0], [0], [1], [0, 0, 1, 1], [], []>} : vector<32x256xbf16>, vector<256x512xbf16>, vector<32x512xf32> -> vector<32x512xf32>
    %c0_49 = arith.constant 0 : index
    %c0_50 = arith.constant 0 : index
    %c0_51 = arith.constant 0 : index
    %110 = vector.load %arg12[%c0_49, %c0_50, %c0_51] : memref<1x1x512xf32, #tpu.memory_space<vmem>>, vector<1x1x512xf32>
    %111 = vector.shape_cast %110 : vector<1x1x512xf32> to vector<1x512xf32>
    %112 = vector.broadcast %111 : vector<1x512xf32> to vector<32x512xf32>
    %113 = arith.addf %109, %112 : vector<32x512xf32>
    %114 = vector.extract_strided_slice %113 {offsets = [0, 0], sizes = [32, 256], strides = [1, 1]} : vector<32x512xf32> to vector<32x256xf32>
    %115 = vector.extract_strided_slice %113 {offsets = [0, 256], sizes = [32, 256], strides = [1, 1]} : vector<32x512xf32> to vector<32x256xf32>
    %c0_52 = arith.constant 0 : index
    %c0_53 = arith.constant 0 : index
    %116 = vector.load %arg4[%c0_52, %c0_53] : memref<8x16xf32, #tpu.memory_space<vmem>>, vector<8x16xf32>
    %c0_54 = arith.constant 0 : index
    %c0_55 = arith.constant 0 : index
    %c0_56 = arith.constant 0 : index
    %117 = vector.load %arg13[%c0_54, %c0_55, %c0_56] : memref<1x256x256xbf16, #tpu.memory_space<vmem>>, vector<1x256x256xbf16>
    %118 = vector.shape_cast %117 : vector<1x256x256xbf16> to vector<256x256xbf16>
    %c0_57 = arith.constant 0 : index
    %c0_58 = arith.constant 0 : index
    %c0_59 = arith.constant 0 : index
    %119 = vector.load %arg14[%c0_57, %c0_58, %c0_59] : memref<1x1x256xf32, #tpu.memory_space<vmem>>, vector<1x1x256xf32>
    %120 = vector.shape_cast %119 : vector<1x1x256xf32> to vector<1x256xf32>
    %121 = arith.truncf %105 : vector<16x256xf32> to vector<16x256xbf16>
    %122 = vector.shape_cast %121 : vector<16x256xbf16> to vector<2x8x256xbf16>
    %123 = vector.extract_strided_slice %122 {offsets = [0, 0, 0], sizes = [2, 8, 128], strides = [1, 1, 1]} : vector<2x8x256xbf16> to vector<2x8x128xbf16>
    %124 = vector.extract_strided_slice %122 {offsets = [0, 0, 128], sizes = [2, 8, 128], strides = [1, 1, 1]} : vector<2x8x256xbf16> to vector<2x8x128xbf16>
    %125 = tpu.concatenate %123, %124 in 0 : vector<2x8x128xbf16>, vector<2x8x128xbf16> -> vector<4x8x128xbf16>
    %126 = arith.truncf %114 : vector<32x256xf32> to vector<32x256xbf16>
    %127 = vector.shape_cast %126 : vector<32x256xbf16> to vector<2x16x256xbf16>
    %128 = vector.extract_strided_slice %127 {offsets = [0, 0, 0], sizes = [2, 16, 128], strides = [1, 1, 1]} : vector<2x16x256xbf16> to vector<2x16x128xbf16>
    %129 = vector.extract_strided_slice %127 {offsets = [0, 0, 128], sizes = [2, 16, 128], strides = [1, 1, 1]} : vector<2x16x256xbf16> to vector<2x16x128xbf16>
    %130 = tpu.concatenate %128, %129 in 0 : vector<2x16x128xbf16>, vector<2x16x128xbf16> -> vector<4x16x128xbf16>
    %131 = arith.truncf %115 : vector<32x256xf32> to vector<32x256xbf16>
    %132 = vector.shape_cast %131 : vector<32x256xbf16> to vector<2x16x256xbf16>
    %133 = vector.extract_strided_slice %132 {offsets = [0, 0, 0], sizes = [2, 16, 128], strides = [1, 1, 1]} : vector<2x16x256xbf16> to vector<2x16x128xbf16>
    %134 = vector.extract_strided_slice %132 {offsets = [0, 0, 128], sizes = [2, 16, 128], strides = [1, 1, 1]} : vector<2x16x256xbf16> to vector<2x16x128xbf16>
    %135 = tpu.concatenate %133, %134 in 0 : vector<2x16x128xbf16>, vector<2x16x128xbf16> -> vector<4x16x128xbf16>
    "tpu.trace_start"() <{level = 10 : i32, message = "gqd,gkd->gqk"}> : () -> ()
    %cst_60 = arith.constant dense<0.000000e+00> : vector<4x8x16xf32>
    %136 = tpu.matmul %125, %130, %cst_60 {dimension_numbers = #tpu.dot_dimension_numbers<[2], [2], [1], [1], [0, 0, 0, 1, 1, 1], [0], [0]>} : vector<4x8x128xbf16>, vector<4x16x128xbf16>, vector<4x8x16xf32> -> vector<4x8x16xf32>
    "tpu.trace_stop"() : () -> ()
    %cst_61 = arith.constant 0.0883883461 : f32
    %137 = vector.broadcast %cst_61 : f32 to vector<4x8x16xf32>
    %138 = arith.mulf %136, %137 : vector<4x8x16xf32>
    %139 = vector.shape_cast %116 : vector<8x16xf32> to vector<1x8x16xf32>
    %140 = vector.broadcast %139 : vector<1x8x16xf32> to vector<4x8x16xf32>
    %141 = arith.addf %138, %140 : vector<4x8x16xf32>
    %cst_62 = arith.constant dense<0xFF800000> : vector<4x8xf32>
    %142 = vector.multi_reduction <maximumf>, %141, %cst_62 [2] : vector<4x8x16xf32> to vector<4x8xf32>
    %143 = vector.shape_cast %142 : vector<4x8xf32> to vector<4x8x1xf32>
    %144 = vector.broadcast %143 : vector<4x8x1xf32> to vector<4x8x16xf32>
    %145 = arith.subf %141, %144 : vector<4x8x16xf32>
    %146 = math.exp %145 : vector<4x8x16xf32>
    %cst_63 = arith.constant dense<0.000000e+00> : vector<4x8xf32>
    %147 = vector.multi_reduction <add>, %146, %cst_63 [2] : vector<4x8x16xf32> to vector<4x8xf32>
    %148 = vector.shape_cast %147 : vector<4x8xf32> to vector<4x8x1xf32>
    %149 = tpu.reciprocal %148 {approx = true} : vector<4x8x1xf32> -> vector<4x8x1xf32>
    %150 = vector.broadcast %149 : vector<4x8x1xf32> to vector<4x8x16xf32>
    %151 = arith.mulf %146, %150 : vector<4x8x16xf32>
    %152 = arith.truncf %151 : vector<4x8x16xf32> to vector<4x8x16xbf16>
    "tpu.trace_start"() <{level = 10 : i32, message = "gqk,gkd->gqd"}> : () -> ()
    %cst_64 = arith.constant dense<0.000000e+00> : vector<4x8x128xf32>
    %153 = tpu.matmul %152, %135, %cst_64 {dimension_numbers = #tpu.dot_dimension_numbers<[2], [1], [1], [2], [0, 0, 0, 1, 1, 2], [0], [0]>} : vector<4x8x16xbf16>, vector<4x16x128xbf16>, vector<4x8x128xf32> -> vector<4x8x128xf32>
    "tpu.trace_stop"() : () -> ()
    %154 = vector.extract_strided_slice %153 {offsets = [0, 0, 0], sizes = [2, 8, 128], strides = [1, 1, 1]} : vector<4x8x128xf32> to vector<2x8x128xf32>
    %155 = vector.shape_cast %154 : vector<2x8x128xf32> to vector<16x128xf32>
    %156 = arith.truncf %155 : vector<16x128xf32> to vector<16x128xbf16>
    %157 = vector.extract_strided_slice %118 {offsets = [0, 0], sizes = [128, 256], strides = [1, 1]} : vector<256x256xbf16> to vector<128x256xbf16>
    %cst_65 = arith.constant dense<0.000000e+00> : vector<16x256xf32>
    %158 = tpu.matmul %156, %157, %cst_65 {dimension_numbers = #tpu.dot_dimension_numbers<[1], [0], [0], [1], [0, 0, 1, 1], [], []>} : vector<16x128xbf16>, vector<128x256xbf16>, vector<16x256xf32> -> vector<16x256xf32>
    %159 = vector.extract_strided_slice %153 {offsets = [2, 0, 0], sizes = [2, 8, 128], strides = [1, 1, 1]} : vector<4x8x128xf32> to vector<2x8x128xf32>
    %160 = vector.shape_cast %159 : vector<2x8x128xf32> to vector<16x128xf32>
    %161 = arith.truncf %160 : vector<16x128xf32> to vector<16x128xbf16>
    %162 = vector.extract_strided_slice %118 {offsets = [128, 0], sizes = [128, 256], strides = [1, 1]} : vector<256x256xbf16> to vector<128x256xbf16>
    %cst_66 = arith.constant dense<0.000000e+00> : vector<16x256xf32>
    %163 = tpu.matmul %161, %162, %cst_66 {dimension_numbers = #tpu.dot_dimension_numbers<[1], [0], [0], [1], [0, 0, 1, 1], [], []>} : vector<16x128xbf16>, vector<128x256xbf16>, vector<16x256xf32> -> vector<16x256xf32>
    %164 = arith.addf %158, %163 : vector<16x256xf32>
    %165 = vector.broadcast %120 : vector<1x256xf32> to vector<16x256xf32>
    %166 = arith.addf %164, %165 : vector<16x256xf32>
    %167 = arith.addf %97, %166 : vector<16x256xf32>
    %168 = vector.extract_strided_slice %8 {offsets = [1, 0], sizes = [1, 256], strides = [1, 1]} : vector<3x256xf32> to vector<1x256xf32>
    %169 = vector.extract_strided_slice %10 {offsets = [1, 0], sizes = [1, 256], strides = [1, 1]} : vector<3x256xf32> to vector<1x256xf32>
    %cst_67 = arith.constant dense<0.000000e+00> : vector<16xf32>
    %170 = vector.multi_reduction <add>, %167, %cst_67 [1] : vector<16x256xf32> to vector<16xf32>
    %171 = vector.shape_cast %170 : vector<16xf32> to vector<16x1xf32>
    %cst_68 = arith.constant 2.560000e+02 : f32
    %172 = vector.broadcast %cst_68 : f32 to vector<16x1xf32>
    %173 = arith.divf %171, %172 : vector<16x1xf32>
    %174 = vector.broadcast %173 : vector<16x1xf32> to vector<16x256xf32>
    %175 = arith.subf %167, %174 : vector<16x256xf32>
    %176 = arith.mulf %175, %175 : vector<16x256xf32>
    %cst_69 = arith.constant dense<0.000000e+00> : vector<16xf32>
    %177 = vector.multi_reduction <add>, %176, %cst_69 [1] : vector<16x256xf32> to vector<16xf32>
    %178 = vector.shape_cast %177 : vector<16xf32> to vector<16x1xf32>
    %cst_70 = arith.constant 2.560000e+02 : f32
    %179 = vector.broadcast %cst_70 : f32 to vector<16x1xf32>
    %180 = arith.divf %178, %179 : vector<16x1xf32>
    %181 = vector.broadcast %173 : vector<16x1xf32> to vector<16x256xf32>
    %182 = arith.subf %167, %181 : vector<16x256xf32>
    %cst_71 = arith.constant 9.99999974E-6 : f32
    %183 = vector.broadcast %cst_71 : f32 to vector<16x1xf32>
    %184 = arith.addf %180, %183 : vector<16x1xf32>
    %185 = math.rsqrt %184 : vector<16x1xf32>
    %186 = vector.broadcast %185 : vector<16x1xf32> to vector<16x256xf32>
    %187 = arith.mulf %182, %186 : vector<16x256xf32>
    %188 = vector.broadcast %168 : vector<1x256xf32> to vector<16x256xf32>
    %189 = arith.mulf %187, %188 : vector<16x256xf32>
    %190 = vector.broadcast %169 : vector<1x256xf32> to vector<16x256xf32>
    %191 = arith.addf %189, %190 : vector<16x256xf32>
    %c0_72 = arith.constant 0 : index
    %c0_73 = arith.constant 0 : index
    %c0_74 = arith.constant 0 : index
    %192 = vector.load %arg15[%c0_72, %c0_73, %c0_74] : memref<1x256x512xbf16, #tpu.memory_space<vmem>>, vector<1x256x512xbf16>
    %193 = vector.shape_cast %192 : vector<1x256x512xbf16> to vector<256x512xbf16>
    %194 = arith.truncf %191 : vector<16x256xf32> to vector<16x256xbf16>
    %cst_75 = arith.constant dense<0.000000e+00> : vector<16x512xf32>
    %195 = tpu.matmul %194, %193, %cst_75 {dimension_numbers = #tpu.dot_dimension_numbers<[1], [0], [0], [1], [0, 0, 1, 1], [], []>} : vector<16x256xbf16>, vector<256x512xbf16>, vector<16x512xf32> -> vector<16x512xf32>
    %c0_76 = arith.constant 0 : index
    %c0_77 = arith.constant 0 : index
    %c0_78 = arith.constant 0 : index
    %196 = vector.load %arg16[%c0_76, %c0_77, %c0_78] : memref<1x1x512xf32, #tpu.memory_space<vmem>>, vector<1x1x512xf32>
    %197 = vector.shape_cast %196 : vector<1x1x512xf32> to vector<1x512xf32>
    %198 = vector.broadcast %197 : vector<1x512xf32> to vector<16x512xf32>
    %199 = arith.addf %195, %198 : vector<16x512xf32>
    %cst_79 = arith.constant 0.000000e+00 : f32
    %200 = vector.broadcast %cst_79 : f32 to vector<16x512xf32>
    %201 = arith.maximumf %199, %200 : vector<16x512xf32>
    %c0_80 = arith.constant 0 : index
    %c0_81 = arith.constant 0 : index
    %c0_82 = arith.constant 0 : index
    %202 = vector.load %arg17[%c0_80, %c0_81, %c0_82] : memref<1x512x256xbf16, #tpu.memory_space<vmem>>, vector<1x512x256xbf16>
    %203 = vector.shape_cast %202 : vector<1x512x256xbf16> to vector<512x256xbf16>
    %204 = arith.truncf %201 : vector<16x512xf32> to vector<16x512xbf16>
    %cst_83 = arith.constant dense<0.000000e+00> : vector<16x256xf32>
    %205 = tpu.matmul %204, %203, %cst_83 {dimension_numbers = #tpu.dot_dimension_numbers<[1], [0], [0], [1], [0, 0, 1, 1], [], []>} : vector<16x512xbf16>, vector<512x256xbf16>, vector<16x256xf32> -> vector<16x256xf32>
    %c0_84 = arith.constant 0 : index
    %c0_85 = arith.constant 0 : index
    %c0_86 = arith.constant 0 : index
    %206 = vector.load %arg18[%c0_84, %c0_85, %c0_86] : memref<1x1x256xf32, #tpu.memory_space<vmem>>, vector<1x1x256xf32>
    %207 = vector.shape_cast %206 : vector<1x1x256xf32> to vector<1x256xf32>
    %208 = vector.broadcast %207 : vector<1x256xf32> to vector<16x256xf32>
    %209 = arith.addf %205, %208 : vector<16x256xf32>
    %210 = arith.addf %191, %209 : vector<16x256xf32>
    %211 = vector.extract_strided_slice %8 {offsets = [2, 0], sizes = [1, 256], strides = [1, 1]} : vector<3x256xf32> to vector<1x256xf32>
    %212 = vector.extract_strided_slice %10 {offsets = [2, 0], sizes = [1, 256], strides = [1, 1]} : vector<3x256xf32> to vector<1x256xf32>
    %cst_87 = arith.constant dense<0.000000e+00> : vector<16xf32>
    %213 = vector.multi_reduction <add>, %210, %cst_87 [1] : vector<16x256xf32> to vector<16xf32>
    %214 = vector.shape_cast %213 : vector<16xf32> to vector<16x1xf32>
    %cst_88 = arith.constant 2.560000e+02 : f32
    %215 = vector.broadcast %cst_88 : f32 to vector<16x1xf32>
    %216 = arith.divf %214, %215 : vector<16x1xf32>
    %217 = vector.broadcast %216 : vector<16x1xf32> to vector<16x256xf32>
    %218 = arith.subf %210, %217 : vector<16x256xf32>
    %219 = arith.mulf %218, %218 : vector<16x256xf32>
    %cst_89 = arith.constant dense<0.000000e+00> : vector<16xf32>
    %220 = vector.multi_reduction <add>, %219, %cst_89 [1] : vector<16x256xf32> to vector<16xf32>
    %221 = vector.shape_cast %220 : vector<16xf32> to vector<16x1xf32>
    %cst_90 = arith.constant 2.560000e+02 : f32
    %222 = vector.broadcast %cst_90 : f32 to vector<16x1xf32>
    %223 = arith.divf %221, %222 : vector<16x1xf32>
    %224 = vector.broadcast %216 : vector<16x1xf32> to vector<16x256xf32>
    %225 = arith.subf %210, %224 : vector<16x256xf32>
    %cst_91 = arith.constant 9.99999974E-6 : f32
    %226 = vector.broadcast %cst_91 : f32 to vector<16x1xf32>
    %227 = arith.addf %223, %226 : vector<16x1xf32>
    %228 = math.rsqrt %227 : vector<16x1xf32>
    %229 = vector.broadcast %228 : vector<16x1xf32> to vector<16x256xf32>
    %230 = arith.mulf %225, %229 : vector<16x256xf32>
    %231 = vector.broadcast %211 : vector<1x256xf32> to vector<16x256xf32>
    %232 = arith.mulf %230, %231 : vector<16x256xf32>
    %233 = vector.broadcast %212 : vector<1x256xf32> to vector<16x256xf32>
    %234 = arith.addf %232, %233 : vector<16x256xf32>
    %c1_i32 = arith.constant 1 : i32
    %235 = arith.cmpi slt, %arg0, %c1_i32 : i32
    %236 = arith.extui %235 : i1 to i32
    %c0_i32_92 = arith.constant 0 : i32
    %237 = arith.cmpi ne, %236, %c0_i32_92 : i32
    scf.if %237 {
      %241 = vector.shape_cast %234 : vector<16x256xf32> to vector<2x8x256xf32>
      %c0_95 = arith.constant 0 : index
      %c0_96 = arith.constant 0 : index
      %c0_97 = arith.constant 0 : index
      %242 = vector.load %arg23[%c0_95, %c0_96, %c0_97] : memref<2x8x256xf32, #tpu.memory_space<vmem>>, vector<2x8x256xf32>
      tpu.vector_store %arg23[%c0_95, %c0_96, %c0_97], %241 {strides = array<i32>} : memref<2x8x256xf32, #tpu.memory_space<vmem>>, vector<2x8x256xf32>,
    } else {
    }
    %c1_i32_93 = arith.constant 1 : i32
    %238 = arith.cmpi eq, %arg0, %c1_i32_93 : i32
    %239 = arith.extui %238 : i1 to i32
    %c0_i32_94 = arith.constant 0 : i32
    %240 = arith.cmpi ne, %239, %c0_i32_94 : i32
    scf.if %240 {
      %c0_95 = arith.constant 0 : index
      %c0_96 = arith.constant 0 : index
      %241 = vector.load %arg21[%c0_95, %c0_96] : memref<1x256xf32, #tpu.memory_space<vmem>>, vector<1x256xf32>
      %c0_97 = arith.constant 0 : index
      %c0_98 = arith.constant 0 : index
      %242 = vector.load %arg22[%c0_97, %c0_98] : memref<1x256xf32, #tpu.memory_space<vmem>>, vector<1x256xf32>
      %cst_99 = arith.constant dense<0.000000e+00> : vector<16xf32>
      %243 = vector.multi_reduction <add>, %234, %cst_99 [1] : vector<16x256xf32> to vector<16xf32>
      %244 = vector.shape_cast %243 : vector<16xf32> to vector<16x1xf32>
      %cst_100 = arith.constant 2.560000e+02 : f32
      %245 = vector.broadcast %cst_100 : f32 to vector<16x1xf32>
      %246 = arith.divf %244, %245 : vector<16x1xf32>
      %247 = vector.broadcast %246 : vector<16x1xf32> to vector<16x256xf32>
      %248 = arith.subf %234, %247 : vector<16x256xf32>
      %249 = arith.mulf %248, %248 : vector<16x256xf32>
      %cst_101 = arith.constant dense<0.000000e+00> : vector<16xf32>
      %250 = vector.multi_reduction <add>, %249, %cst_101 [1] : vector<16x256xf32> to vector<16xf32>
      %251 = vector.shape_cast %250 : vector<16xf32> to vector<16x1xf32>
      %cst_102 = arith.constant 2.560000e+02 : f32
      %252 = vector.broadcast %cst_102 : f32 to vector<16x1xf32>
      %253 = arith.divf %251, %252 : vector<16x1xf32>
      %254 = vector.broadcast %246 : vector<16x1xf32> to vector<16x256xf32>
      %255 = arith.subf %234, %254 : vector<16x256xf32>
      %cst_103 = arith.constant 9.99999974E-6 : f32
      %256 = vector.broadcast %cst_103 : f32 to vector<16x1xf32>
      %257 = arith.addf %253, %256 : vector<16x1xf32>
      %258 = math.rsqrt %257 : vector<16x1xf32>
      %259 = vector.broadcast %258 : vector<16x1xf32> to vector<16x256xf32>
      %260 = arith.mulf %255, %259 : vector<16x256xf32>
      %261 = vector.broadcast %241 : vector<1x256xf32> to vector<16x256xf32>
      %262 = arith.mulf %260, %261 : vector<16x256xf32>
      %263 = vector.broadcast %242 : vector<1x256xf32> to vector<16x256xf32>
      %264 = arith.addf %262, %263 : vector<16x256xf32>
      %265 = vector.shape_cast %264 : vector<16x256xf32> to vector<2x8x256xf32>
      %c0_104 = arith.constant 0 : index
      %c0_105 = arith.constant 0 : index
      %c0_106 = arith.constant 0 : index
      %266 = vector.load %arg23[%c0_104, %c0_105, %c0_106] : memref<2x8x256xf32, #tpu.memory_space<vmem>>, vector<2x8x256xf32>
      tpu.vector_store %arg23[%c0_104, %c0_105, %c0_106], %265 {strides = array<i32>} : memref<2x8x256xf32, #tpu.memory_space<vmem>>, vector<2x8x256xf32>,
    } else {
    }
    return
  }
  func.func @transform_0(%arg0: i32) -> (i32, i32, i32) {
    %c0_i32 = arith.constant 0 : i32
    %c0_i32_0 = arith.constant 0 : i32
    %c0_i32_1 = arith.constant 0 : i32
    %c0_i32_2 = arith.constant 0 : i32
    return %c0_i32, %c0_i32_0, %c0_i32_1 : i32, i32, i32
  }
  func.func @transform_1(%arg0: i32) -> (i32, i32, i32) {
    %c0_i32 = arith.constant 0 : i32
    %c0_i32_0 = arith.constant 0 : i32
    %c0_i32_1 = arith.constant 0 : i32
    %c0_i32_2 = arith.constant 0 : i32
    return %c0_i32, %c0_i32_0, %c0_i32_1 : i32, i32, i32
  }
  func.func @transform_2(%arg0: i32) -> (i32, i32) {
    %c0_i32 = arith.constant 0 : i32
    %c0_i32_0 = arith.constant 0 : i32
    %c0_i32_1 = arith.constant 0 : i32
    return %c0_i32, %c0_i32_0 : i32, i32
  }
  func.func @transform_3(%arg0: i32) -> (i32, i32) {
    %c0_i32 = arith.constant 0 : i32
    %c0_i32_0 = arith.constant 0 : i32
    %c0_i32_1 = arith.constant 0 : i32
    return %c0_i32, %c0_i32_0 : i32, i32
  }
  func.func @transform_4(%arg0: i32) -> (i32, i32, i32) {
    %c0_i32 = arith.constant 0 : i32
    %c0_i32_0 = arith.constant 0 : i32
    %c0_i32_1 = arith.constant 0 : i32
    return %arg0, %c0_i32, %c0_i32_0 : i32, i32, i32
  }
  func.func @transform_5(%arg0: i32) -> (i32, i32, i32) {
    %c0_i32 = arith.constant 0 : i32
    %c0_i32_0 = arith.constant 0 : i32
    %c0_i32_1 = arith.constant 0 : i32
    return %arg0, %c0_i32, %c0_i32_0 : i32, i32, i32
  }
  func.func @transform_6(%arg0: i32) -> (i32, i32, i32) {
    %c0_i32 = arith.constant 0 : i32
    %c0_i32_0 = arith.constant 0 : i32
    %c0_i32_1 = arith.constant 0 : i32
    return %arg0, %c0_i32, %c0_i32_0 : i32, i32, i32
  }
  func.func @transform_7(%arg0: i32) -> (i32, i32, i32) {
    %c0_i32 = arith.constant 0 : i32
    %c0_i32_0 = arith.constant 0 : i32
    %c0_i32_1 = arith.constant 0 : i32
    return %arg0, %c0_i32, %c0_i32_0 : i32, i32, i32
  }
  func.func @transform_8(%arg0: i32) -> (i32, i32, i32) {
    %c0_i32 = arith.constant 0 : i32
    %c0_i32_0 = arith.constant 0 : i32
    %c0_i32_1 = arith.constant 0 : i32
    return %arg0, %c0_i32, %c0_i32_0 : i32, i32, i32
  }
  func.func @transform_9(%arg0: i32) -> (i32, i32, i32) {
    %c0_i32 = arith.constant 0 : i32
    %c0_i32_0 = arith.constant 0 : i32
    %c0_i32_1 = arith.constant 0 : i32
    return %arg0, %c0_i32, %c0_i32_0 : i32, i32, i32
  }
  func.func @transform_10(%arg0: i32) -> (i32, i32, i32) {
    %c0_i32 = arith.constant 0 : i32
    %c0_i32_0 = arith.constant 0 : i32
    %c0_i32_1 = arith.constant 0 : i32
    return %arg0, %c0_i32, %c0_i32_0 : i32, i32, i32
  }
  func.func @transform_11(%arg0: i32) -> (i32, i32, i32) {
    %c0_i32 = arith.constant 0 : i32
    %c0_i32_0 = arith.constant 0 : i32
    %c0_i32_1 = arith.constant 0 : i32
    return %arg0, %c0_i32, %c0_i32_0 : i32, i32, i32
  }
  func.func @transform_12(%arg0: i32) -> (i32, i32, i32) {
    %c0_i32 = arith.constant 0 : i32
    %c0_i32_0 = arith.constant 0 : i32
    %c0_i32_1 = arith.constant 0 : i32
    return %arg0, %c0_i32, %c0_i32_0 : i32, i32, i32
  }
  func.func @transform_13(%arg0: i32) -> (i32, i32, i32) {
    %c0_i32 = arith.constant 0 : i32
    %c0_i32_0 = arith.constant 0 : i32
    %c0_i32_1 = arith.constant 0 : i32
    return %arg0, %c0_i32, %c0_i32_0 : i32, i32, i32
  }
  func.func @transform_14(%arg0: i32) -> (i32, i32, i32) {
    %c0_i32 = arith.constant 0 : i32
    %c0_i32_0 = arith.constant 0 : i32
    %c0_i32_1 = arith.constant 0 : i32
    return %arg0, %c0_i32, %c0_i32_0 : i32, i32, i32
  }
  func.func @transform_15(%arg0: i32) -> (i32, i32, i32) {
    %c0_i32 = arith.constant 0 : i32
    %c0_i32_0 = arith.constant 0 : i32
    %c0_i32_1 = arith.constant 0 : i32
    return %arg0, %c0_i32, %c0_i32_0 : i32, i32, i32
  }
  func.func @transform_16(%arg0: i32) -> (i32, i32, i32) {
    %c0_i32 = arith.constant 0 : i32
    %c0_i32_0 = arith.constant 0 : i32
    %c0_i32_1 = arith.constant 0 : i32
    return %arg0, %c0_i32, %c0_i32_0 : i32, i32, i32
  }
  func.func @transform_17(%arg0: i32) -> (i32, i32, i32) {
    %c0_i32 = arith.constant 0 : i32
    %c0_i32_0 = arith.constant 0 : i32
    %c0_i32_1 = arith.constant 0 : i32
    return %arg0, %c0_i32, %c0_i32_0 : i32, i32, i32
  }
  func.func @transform_18(%arg0: i32) -> (i32, i32, i32) {
    %c0_i32 = arith.constant 0 : i32
    %c0_i32_0 = arith.constant 0 : i32
    %c0_i32_1 = arith.constant 0 : i32
    return %arg0, %c0_i32, %c0_i32_0 : i32, i32, i32
  }
  func.func @transform_19(%arg0: i32) -> (i32, i32, i32) {
    %c0_i32 = arith.constant 0 : i32
    %c0_i32_0 = arith.constant 0 : i32
    %c0_i32_1 = arith.constant 0 : i32
    return %arg0, %c0_i32, %c0_i32_0 : i32, i32, i32
  }
  func.func @transform_20(%arg0: i32) -> (i32, i32) {
    %c0_i32 = arith.constant 0 : i32
    %c0_i32_0 = arith.constant 0 : i32
    %c0_i32_1 = arith.constant 0 : i32
    return %c0_i32, %c0_i32_0 : i32, i32
  }
  func.func @transform_21(%arg0: i32) -> (i32, i32) {
    %c0_i32 = arith.constant 0 : i32
    %c0_i32_0 = arith.constant 0 : i32
    %c0_i32_1 = arith.constant 0 : i32
    return %c0_i32, %c0_i32_0 : i32, i32
  }
  func.func @transform_22(%arg0: i32) -> (i32, i32, i32) {
    %c0_i32 = arith.constant 0 : i32
    %c0_i32_0 = arith.constant 0 : i32
    %c0_i32_1 = arith.constant 0 : i32
    %c0_i32_2 = arith.constant 0 : i32
    return %c0_i32, %c0_i32_0, %c0_i32_1 : i32, i32, i32
  }
}

</mosaic_0001>

<bundles_post_ra>
// kernel: tpu_custom_call.1
= control target key start
LH: loop header
LB: loop body
LE: loop exit
PB: predicated region body
PF: predicated region fallthrough
CT: control target
= control target key end

     0   :  { %s9807_s0 = inlined_call_operand.vmem [shape: f32[2,8,256], index: 0, kind: input, shape index: {}]   ;;  %s9808_s1 = inlined_call_operand.hbm [shape: f32[2,16,256], index: 1, kind: input, shape index: {}]   ;;  %s9809_s2 = inlined_call_operand.hbm [shape: f32[8,8], index: 2, kind: input, shape index: {}]   ;;  %s9810_s3 = inlined_call_operand.hbm [shape: f32[8,16], index: 3, kind: input, shape index: {}]   ;;  %s9811_s4 = inlined_call_operand.hbm [shape: bf16[2,256,768], index: 4, kind: input, shape index: {}]   ;;  %s9812_s5 = inlined_call_operand.vmem [shape: f32[2,1,768], index: 5, kind: input, shape index: {}]   ;;  %s9813_s6 = inlined_call_operand.hbm [shape: bf16[2,256,256], index: 6, kind: input, shape index: {}]   ;;  %s9814_s7 = inlined_call_operand.vmem [shape: f32[2,1,256], index: 7, kind: input, shape index: {}]   ;;  %s9815_s8 = inlined_call_operand.hbm [shape: bf16[2,256,256], index: 8, kind: input, shape index: {}]   ;;  %s9816_s9 = inlined_call_operand.hbm [shape: f32[2,1,256], index: 9, kind: input, shape index: {}]   ;;  %s9817_s10 = inlined_call_operand.hbm [shape: bf16[2,256,512], index: 10, kind: input, shape index: {}]   ;;  %s9818_s11 = inlined_call_operand.hbm [shape: f32[2,1,512], index: 11, kind: input, shape index: {}]   ;;  %s9819_s12 = inlined_call_operand.hbm [shape: bf16[2,256,256], index: 12, kind: input, shape index: {}]   ;;  %s9820_s13 = inlined_call_operand.hbm [shape: f32[2,1,256], index: 13, kind: input, shape index: {}]   ;;  %s9821_s14 = inlined_call_operand.hbm [shape: bf16[2,256,512], index: 14, kind: input, shape index: {}]   ;;  %s9822_s15 = inlined_call_operand.hbm [shape: f32[2,1,512], index: 15, kind: input, shape index: {}]   ;;  %s9823_s16 = inlined_call_operand.hbm [shape: bf16[2,512,256], index: 16, kind: input, shape index: {}]   ;;  %s9824_s17 = inlined_call_operand.hbm [shape: f32[2,1,256], index: 17, kind: input, shape index: {}]   ;;  %s9825_s18 = inlined_call_operand.vmem [shape: f32[2,3,256], index: 18, kind: input, shape index: {}]   ;;  %s9826_s19 = inlined_call_operand.vmem [shape: f32[2,3,256], index: 19, kind: input, shape index: {}]   ;;  %s9827_s20 = inlined_call_operand.vmem [shape: f32[1,256], index: 20, kind: input, shape index: {}]   ;;  %s9828_s21 = inlined_call_operand.vmem [shape: f32[1,256], index: 21, kind: input, shape index: {}]   ;;  %s9829_s22 = inlined_call_operand.hbm [shape: f32[2,8,256], index: 22, kind: output, shape index: {}]  }
   0x1   :  { %9856 = sst [smem:[#allocation44_spill]] %s9807_s0 }
   0x2   :  { %9857 = sst [smem:[#allocation45_spill]] %s9808_s1 }
   0x3   :  { %9858 = sst [smem:[#allocation46_spill]] %s9809_s2 }
   0x4   :  { %9859 = sst [smem:[#allocation47_spill]] %s9810_s3 }
   0x5   :  { %9860 = sst [smem:[#allocation48_spill]] %s9811_s4 }
   0x6   :  { %9861 = sst [smem:[#allocation49_spill]] %s9812_s5 }
   0x7   :  { %9862 = sst [smem:[#allocation50_spill]] %s9813_s6 }
   0x8   :  { %9863 = sst [smem:[#allocation51_spill]] %s9814_s7 }
   0x9   :  { %9864 = sst [smem:[#allocation52_spill]] %s9815_s8 }
   0xa   :  { %9865 = sst [smem:[#allocation53_spill]] %s9816_s9 }
   0xb   :  { %9866 = sst [smem:[#allocation54_spill]] %s9817_s10 }
   0xc   :  { %9867 = sst [smem:[#allocation55_spill]] %s9818_s11 }
   0xd   :  { %9868 = sst [smem:[#allocation56_spill]] %s9819_s12 }
   0xe   :  { %9869 = sst [smem:[#allocation57_spill]] %s9820_s13 }
   0xf   :  { %9870 = sst [smem:[#allocation58_spill]] %s9821_s14 }
  0x10   :  { %9871 = sst [smem:[#allocation59_spill]] %s9822_s15 }
  0x11   :  { %9872 = sst [smem:[#allocation60_spill]] %s9823_s16 }
  0x12   :  { %9873 = sst [smem:[#allocation61_spill]] %s9824_s17 }
  0x13   :  { %9874 = sst [smem:[#allocation62_spill]] %s9825_s18 }
  0x14   :  { %9875 = sst [smem:[#allocation63_spill]] %s9826_s19 }
  0x15   :  { %9876 = sst [smem:[#allocation64_spill]] %s9827_s20 }
  0x16   :  { %9877 = sst [smem:[#allocation65_spill]] %s9828_s21 }
  0x17   :  { %9878 = sst [smem:[#allocation66_spill]] %s9829_s22 }
  0x18   :  { %27 = vsyncpa [#allocation3], 0 }
  0x19   :  { %28 = vsyncpa [#allocation6], 0 }
  0x1a   :  { %29 = vsyncpa [#allocation9], 0 }
  0x1b   :  { %31 = vsyncpa [#allocation9 + $0x1], 0 }
  0x1c   :  { %32 = vsyncpa [#allocation12], 0 }
  0x1d   :  { %34 = vsyncpa [#allocation12 + $0x1], 0 }
  0x1e   :  { %35 = vsyncpa [#allocation15], 0 }
  0x1f   :  { %37 = vsyncpa [#allocation15 + $0x1], 0 }
  0x20   :  { %38 = vsyncpa [#allocation18], 0 }
  0x21   :  { %40 = vsyncpa [#allocation18 + $0x1], 0 }
  0x22   :  { %41 = vsyncpa [#allocation21], 0 }
  0x23   :  { %43 = vsyncpa [#allocation21 + $0x1], 0 }
  0x24   :  { %44 = vsyncpa [#allocation24], 0 }
  0x25   :  { %46 = vsyncpa [#allocation24 + $0x1], 0 }
  0x26   :  { %47 = vsyncpa [#allocation4], 0  ;;  %s8330_s3 = smov 0   ;;  %s8332_s28 = smov 0  }
  0x27   :  { %s8334_s29 = smov 0   ;;  %s8336_s30 = smov 0  }
  0x28 LB: > { %9879 = sst [smem:[#allocation36_spill]] %s8190_s28  ;;  %s8349_s4 = sadd.s32 4294967295, %s8198_s30   ;;  %s8198_s30 = sphi %s8336_s30, %s9932_s30   ;;  %s8194_s29 = sphi %s8334_s29, %s9935_s29   ;;  %s8190_s28 = sphi %s8332_s28, %s9934_s28   ;;  %s8186_s3 = sphi %s8330_s3, %s9933_s3  }
  0x29   : > { %9880 = sst [smem:[#allocation37_spill]] %s8194_s29  ;;  %s8352_s0 = sadd.s32 1, %s8198_s30  }
  0x2a   : > { %9881 = sst [smem:[#allocation38_spill]] %s8349_s4  ;;  %s141_s23 = ssub.s32 %s8198_s30, %s8352_s0 }
  0x2b   : > { %9882 = sst [smem:[#allocation39_spill]] %s8352_s0  ;;  %s144_s1 = sadd.s32 1, %s8194_s29 }
  0x2c   : > { %p142_p0 = scmp.eq.s32.totalorder %s141_s23, 0  ;;  %p151_p1 = scmp.ne.s32.totalorder %s8194_s29, %s8190_s28 }
  0x2d   : > { %p152_p2 = scmp.eq.s32.totalorder %s8198_s30, 0  ;;  %p157_p3 = scmp.ne.s32.totalorder %s8190_s28, %s8186_s3 }
  0x2e   : > { %s8362_s5 = scalar_select %p142_p0, %s8194_s29, %s144_s1  }
  0x2f   : > { %p8364_p4 = por %p152_p2, %p151_p1  ;;  %p158_p5 = scmp.eq.s32.totalorder %s8349_s4, 0 }
  0x30   : > { %9883 = sst [smem:[#allocation40_spill]] %s8362_s5  ;;  %p5516_p6 = scmp.ge.s32.totalorder %s8198_s30, 1 }
  0x31   : > { %p621_p7 = scmp.lt.s32.totalorder %s8198_s30, 3  ;;  %p8373_p8 = por %p158_p5, %p157_p3 }
  0x32   : > { %p5517_p9 = scmp.ne.s32.totalorder %s8349_s4, 0  ;;  %s9889_s27 = sld [smem:[#allocation46_spill]] }
  0x33   : > { %s9885_s6 = scalar_select %p8373_p8, 1, 0 }
  0x34   : > { %p8378_p10 = pnand %p5516_p6, %p621_p7  ;;  %s8200_s23 = smov [#allocation5]  }
  0x35   : > { %9886 = sst [smem:[#allocation41_spill]] %s9885_s6  ;;  %s652_s1 = sshll.u32 %s8200_s23, 4  ;;  %s653_s1 = int_to_ptr.vmem [resolvable:$true] %s652_s1 }
  0x36   : > { %s9887_s25 = scalar_select %p8378_p10, 1, 0 }
  0x37   : > { %p7557_p11 = pneg %p8378_p10  ;;  %s9890_s22 = sld [smem:[#allocation45_spill]] }
  0x38   : > { %9888 = sst [smem:[#allocation42_spill]] %s9887_s25  ;;  %s650_s3 = sshll.u32 %s9889_s27, 4  ;;  %s651_s3 = int_to_ptr.hbm [resolvable:$true] %s650_s3 }
  0x39   : > { %p8392_p12 = pnand %p7557_p11, %p158_p5  ;;  %s8201_s26 = smov [#allocation2]  }
  0x3a   : > { %s637_s2 = sshll.u32 %s8201_s26, 4  ;;  %s8202_s27 = smov 256   ;;  %s638_s2 = int_to_ptr.vmem [resolvable:$true] %s637_s2 }
  0x3b   : > { %7563 = dma.hbm_to_vmem [thread:$0]  (!%p8392_p12), %s651_s3, 128, %s653_s1, [#allocation6]  }
  0x3c   : > { %s8203_s23 = smov 16   ;;  %s9892_s5 = sld [smem:[#allocation47_spill]] }
  0x3d   : > { %s635_s21 = sshll.u32 %s9890_s22, 4  ;;  %s8204_s18 = smov [#allocation7]   ;;  %s636_s21 = int_to_ptr.hbm [resolvable:$true] %s635_s21 }
  0x3e   : > { %7560 = dma.hbm_to_vmem [thread:$0]  (!%p8392_p12), %s636_s21, 1024, %s638_s2, [#allocation3], %s8202_s27, %s8202_s27, %s8203_s23  }
  0x3f   : > { %s664_s7 = sshll.u32 %s8204_s18, 4  ;;  %p5520_p13 = scmp.ge.s32.totalorder %s8198_s30, 2  ;;  %s665_s7 = int_to_ptr.vmem [resolvable:$true] %s664_s7 }
  0x40   : > { %s8407_s3 = sand.u32 (!%p5520_p13), 1, %s8198_s30   ;;  %s8410_s21 = sand.u32 (!%p5520_p13), 1, %s8194_s29  }
  0x41   : > { %677 = sbr.rel (%p5520_p13) target bundleno = 311 (0x137), region = 40  ;;  %s9893_s20 = sld [smem:[#allocation48_spill]] (!%p5520_p13) }
  0x42   : > { %s662_s19 = sshll.u32 %s9892_s5, 4  ;;  %s7513_s1 = smul.u32 (!%p5520_p13), 768, %s8410_s21  ;;  %s663_s19 = int_to_ptr.hbm [resolvable:$true] %s662_s19 }
  0x43   : > { %7566 = dma.hbm_to_vmem [thread:$0]  (!%p8392_p12), %s663_s19, 128, %s665_s7, [#allocation6]  }
  0x44   : > { %s7514_s26 = smul.u32 (!%p5520_p13), 768, %s8198_s30  ;;  %s685_s19 = scalar_lea.vmem (!%p5520_p13), [#allocation8], %s7513_s1 }
  0x45   : > { %s693_s27 = sshll.u32 (!%p5520_p13), %s685_s19, 4  ;;  %s8418_s0 = sshll.u32 (!%p5520_p13), %s8410_s21, 8  ;;  %s694_s27 = int_to_ptr.vmem [resolvable:$true] %s693_s27 }
  0x46   : > { %s9842_s22 = scalar_lea.sflag [#allocation9], %s8407_s3 }
  0x47   : > { %s690_s7 = scalar_lea.hbm %s9893_s20, %s7514_s26  ;;  %s7774_s18 = scalar_lea.hbm %s9893_s20, 1536 }
  0x48   : > { %s691_s23 = sshll.u32 %s690_s7, 4  ;;  %s692_s23 = int_to_ptr.hbm [resolvable:$true] %s691_s23 }
  0x49   : > { %s7768_s5 = sshra.s32 %s692_s23, 4  ;;  %s7769_s5 = int_to_ptr.hbm [resolvable:$true] %s7768_s5 }
  0x4a   : > { %s7770_s29 = scalar_lea.hbm %s7769_s5, 768  ;;  %p7775_p3 = scmp.lt.s32.totalorder %s7769_s5, %s9893_s20 }
  0x4b   : > { %p7771_p0 = scmp.ne.s32.totalorder %s7769_s5, %s7770_s29  ;;  %p7776_p6 = scmp.lt.s32.totalorder %s7774_s18, %s7770_s29 }
  0x4d   : > { %p7772_p1 = pnand %p7771_p0, %p8364_p4  ;;  %p7777_p7 = por %p7776_p6, %p7775_p3 }
  0x4f   : > { %p7773_p2 = pneg %p7772_p1 }
  0x51   : > { %p7778_p11 = pnand %p7777_p7, %p7773_p2 }
  0x53   : > { %7781 = shalt.err (!%p7778_p11)
}
  0x54   : > { %s8205_s2 = smov 384   ;;  %s8206_s7 = smov 24  }
  0x55   : > { %7523 = dma.hbm_to_vmem [thread:$0]  (%p8364_p4), %s692_s23, 12288, %s694_s27, %s9842_s22, %s8205_s2, %s8205_s2, %s8206_s7  }
  0x56   : > { %s8434_s28 = sshll.u32 %s8198_s30, 8  ;;  %s9894_s8 = sld [smem:[#allocation52_spill]] }
  0x57   : > { %s743_s18 = scalar_lea.vmem [#allocation11], %s8418_s0  ;;  %s9844_s1 = scalar_lea.sflag [#allocation12], %s8407_s3 }
  0x58   : > { %s751_s26 = sshll.u32 %s743_s18, 4  ;;  %s752_s26 = int_to_ptr.vmem [resolvable:$true] %s751_s26 }
  0x5c   : > { %s748_s29 = scalar_lea.hbm %s9894_s8, %s8434_s28  ;;  %s7802_s2 = scalar_lea.hbm %s9894_s8, 512 }
  0x5d   : > { %s749_s5 = sshll.u32 %s748_s29, 4  ;;  %s750_s5 = int_to_ptr.hbm [resolvable:$true] %s749_s5 }
  0x5e   : > { %s7796_s20 = sshra.s32 %s750_s5, 4  ;;  %s7797_s20 = int_to_ptr.hbm [resolvable:$true] %s7796_s20 }
  0x5f   : > { %s7798_s4 = scalar_lea.hbm %s7797_s20, 256  ;;  %p7803_p1 = scmp.lt.s32.totalorder %s7797_s20, %s9894_s8 }
  0x60   : > { %p7799_p12 = scmp.ne.s32.totalorder %s7797_s20, %s7798_s4  ;;  %p7804_p2 = scmp.lt.s32.totalorder %s7802_s2, %s7798_s4 }
  0x62   : > { %p7800_p13 = pnand %p7799_p12, %p8364_p4  ;;  %p7805_p3 = por %p7804_p2, %p7803_p1 }
  0x64   : > { %p7801_p0 = pneg %p7800_p13 }
  0x66   : > { %p7806_p6 = pnand %p7805_p3, %p7801_p0 }
  0x68   : > { %7809 = shalt.err (!%p7806_p6)
}
  0x69   : > { %s9845_s19 = smov 128   ;;  %s9847_s29 = smov 8  }
  0x6a   : > { %7525 = dma.hbm_to_vmem [thread:$0]  (%p8364_p4), %s750_s5, 4096, %s752_s26, %s9844_s1, %s9845_s19, %s9845_s19, %s9847_s29  }
  0x6b   : > { %s8458_s18 = sshll.u32 %s8410_s21, 9  ;;  %s8461_s4 = sshll.u32 %s8198_s30, 9 }
  0x6c   : > { %s9895_s10 = sld [smem:[#allocation54_spill]]  ;;  %s784_s2 = scalar_lea.vmem [#allocation14], %s8458_s18 }
  0x6d   : > { %s792_s7 = sshll.u32 %s784_s2, 4  ;;  %s9850_s22 = scalar_lea.sflag [#allocation15], %s8407_s3  ;;  %s793_s7 = int_to_ptr.vmem [resolvable:$true] %s792_s7 }
  0x72   : > { %s789_s23 = scalar_lea.hbm %s9895_s10, %s8461_s4  ;;  %s7830_s1 = scalar_lea.hbm %s9895_s10, 1024 }
  0x73   : > { %s790_s6 = sshll.u32 %s789_s23, 4  ;;  %s791_s6 = int_to_ptr.hbm [resolvable:$true] %s790_s6 }
  0x74   : > { %s7824_s8 = sshra.s32 %s791_s6, 4  ;;  %s7825_s8 = int_to_ptr.hbm [resolvable:$true] %s7824_s8 }
  0x75   : > { %s7826_s25 = scalar_lea.hbm %s7825_s8, 512  ;;  %p7831_p13 = scmp.lt.s32.totalorder %s7825_s8, %s9895_s10 }
  0x76   : > { %p7827_p7 = scmp.ne.s32.totalorder %s7825_s8, %s7826_s25  ;;  %p7832_p0 = scmp.lt.s32.totalorder %s7830_s1, %s7826_s25 }
  0x78   : > { %p7828_p11 = pnand %p7827_p7, %p8364_p4  ;;  %p7833_p1 = por %p7832_p0, %p7831_p13 }
  0x7a   : > { %p7829_p12 = pneg %p7828_p11 }
  0x7c   : > { %p7834_p2 = pnand %p7833_p1, %p7829_p12 }
  0x7e   : > { %7837 = shalt.err (!%p7834_p2)
}
  0x7f   : > { %s9851_s27 = smov 256   ;;  %s9852_s23 = smov 16  }
  0x80   : > { %7527 = dma.hbm_to_vmem [thread:$0]  (%p8364_p4), %s791_s6, 8192, %s793_s7, %s9850_s22, %s9851_s27, %s9851_s27, %s9852_s23  }
  0x81   : > { %s9896_s12 = sld [smem:[#allocation56_spill]]  ;;  %s825_s2 = scalar_lea.vmem [#allocation17], %s8418_s0 }
  0x82   : > { %s833_s5 = sshll.u32 %s825_s2, 4  ;;  %s9853_s26 = scalar_lea.sflag [#allocation18], %s8407_s3  ;;  %s834_s5 = int_to_ptr.vmem [resolvable:$true] %s833_s5 }
  0x87   : > { %s830_s25 = scalar_lea.hbm %s9896_s12, %s8434_s28  ;;  %s7858_s7 = scalar_lea.hbm %s9896_s12, 512 }
  0x88   : > { %s831_s1 = sshll.u32 %s830_s25, 4  ;;  %s832_s1 = int_to_ptr.hbm [resolvable:$true] %s831_s1 }
  0x89   : > { %s7852_s20 = sshra.s32 %s832_s1, 4  ;;  %s7853_s20 = int_to_ptr.hbm [resolvable:$true] %s7852_s20 }
  0x8a   : > { %s7854_s29 = scalar_lea.hbm %s7853_s20, 256  ;;  %p7859_p11 = scmp.lt.s32.totalorder %s7853_s20, %s9896_s12 }
  0x8b   : > { %p7855_p3 = scmp.ne.s32.totalorder %s7853_s20, %s7854_s29  ;;  %p7860_p12 = scmp.lt.s32.totalorder %s7858_s7, %s7854_s29 }
  0x8d   : > { %p7856_p6 = pnand %p7855_p3, %p8364_p4  ;;  %p7861_p13 = por %p7860_p12, %p7859_p11 }
  0x8f   : > { %p7857_p7 = pneg %p7856_p6 }
  0x91   : > { %p7862_p0 = pnand %p7861_p13, %p7857_p7 }
  0x93   : > { %7865 = shalt.err (!%p7862_p0)
}
  0x94   : > { %s9897_s8 = smov 8   ;;  %s9898_s25 = smov 128  }
  0x95   : > { %7529 = dma.hbm_to_vmem [thread:$0]  (%p8364_p4), %s832_s1, 4096, %s834_s5, %s9853_s26, %s9898_s25, %s9898_s25, %s9897_s8  }
  0x96   : > { %s9899_s14 = sld [smem:[#allocation58_spill]]  ;;  %s866_s29 = scalar_lea.vmem [#allocation20], %s8458_s18 }
  0x97   : > { %s874_s20 = sshll.u32 %s866_s29, 4  ;;  %s863_s6 = scalar_lea.sflag [#allocation21], %s8407_s3  ;;  %s875_s20 = int_to_ptr.vmem [resolvable:$true] %s874_s20 }
  0x9c   : > { %s871_s2 = scalar_lea.hbm %s9899_s14, %s8461_s4  ;;  %s7886_s1 = scalar_lea.hbm %s9899_s14, 1024 }
  0x9d   : > { %s872_s7 = sshll.u32 %s871_s2, 4  ;;  %s873_s7 = int_to_ptr.hbm [resolvable:$true] %s872_s7 }
  0x9e   : > { %s7880_s19 = sshra.s32 %s873_s7, 4  ;;  %s7881_s19 = int_to_ptr.hbm [resolvable:$true] %s7880_s19 }
  0x9f   : > { %s7882_s22 = scalar_lea.hbm %s7881_s19, 512  ;;  %p7887_p6 = scmp.lt.s32.totalorder %s7881_s19, %s9899_s14 }
  0xa0   : > { %p7883_p1 = scmp.ne.s32.totalorder %s7881_s19, %s7882_s22  ;;  %p7888_p7 = scmp.lt.s32.totalorder %s7886_s1, %s7882_s22 }
  0xa2   : > { %p7884_p2 = pnand %p7883_p1, %p8364_p4  ;;  %p7889_p11 = por %p7888_p7, %p7887_p6 }
  0xa4   : > { %p7885_p3 = pneg %p7884_p2 }
  0xa6   : > { %p7890_p12 = pnand %p7889_p11, %p7885_p3 }
  0xa8   : > { %7893 = shalt.err (!%p7890_p12)
}
  0xa9   : > { %s9900_s17 = smov 16   ;;  %s9901_s2 = smov 256  }
  0xaa   : > { %7531 = dma.hbm_to_vmem [thread:$0]  (%p8364_p4), %s873_s7, 8192, %s875_s20, %s863_s6, %s9901_s2, %s9901_s2, %s9900_s17  }
  0xab   : > { %s9902_s16 = sld [smem:[#allocation60_spill]]  ;;  %s907_s19 = scalar_lea.vmem [#allocation23], %s8458_s18 }
  0xac   : > { %s915_s1 = sshll.u32 %s907_s19, 4  ;;  %s904_s5 = scalar_lea.sflag [#allocation24], %s8407_s3  ;;  %s916_s1 = int_to_ptr.vmem [resolvable:$true] %s915_s1 }
  0xb1   : > { %s912_s29 = scalar_lea.hbm %s9902_s16, %s8461_s4  ;;  %s7914_s20 = scalar_lea.hbm %s9902_s16, 1024 }
  0xb2   : > { %s913_s22 = sshll.u32 %s912_s29, 4  ;;  %s914_s22 = int_to_ptr.hbm [resolvable:$true] %s913_s22 }
  0xb3   : > { %s7908_s10 = sshra.s32 %s914_s22, 4  ;;  %s7909_s10 = int_to_ptr.hbm [resolvable:$true] %s7908_s10 }
  0xb4   : > { %s7910_s26 = scalar_lea.hbm %s7909_s10, 512  ;;  %p7915_p2 = scmp.lt.s32.totalorder %s7909_s10, %s9902_s16 }
  0xb5   : > { %p7911_p13 = scmp.ne.s32.totalorder %s7909_s10, %s7910_s26  ;;  %p7916_p3 = scmp.lt.s32.totalorder %s7914_s20, %s7910_s26 }
  0xb7   : > { %p7912_p0 = pnand %p7911_p13, %p8364_p4  ;;  %p7917_p6 = por %p7916_p3, %p7915_p2 }
  0xb9   : > { %p7913_p1 = pneg %p7912_p0 }
  0xbb   : > { %p7918_p7 = pnand %p7917_p6, %p7913_p1 }
  0xbd   : > { %7921 = shalt.err (!%p7918_p7)
}
  0xbe   : > { %7533 = dma.hbm_to_vmem [thread:$0]  (%p8364_p4), %s914_s22, 8192, %s916_s1, %s904_s5, %s9898_s25, %s9898_s25, %s9897_s8  }
  0xbf   : > { %s9903_s18 = sld [smem:[#allocation50_spill]]  ;;  %s714_s26 = scalar_lea.vmem [#allocation10], %s8418_s0 }
  0xc0   : > { %s722_s27 = sshll.u32 %s714_s26, 4  ;;  %s723_s27 = int_to_ptr.vmem [resolvable:$true] %s722_s27 }
  0xc5   : > { %s719_s4 = scalar_lea.hbm %s9903_s18, %s8434_s28  ;;  %s7942_s22 = scalar_lea.hbm %s9903_s18, 512 }
  0xc6   : > { %s720_s2 = sshll.u32 %s719_s4, 4  ;;  %s721_s2 = int_to_ptr.hbm [resolvable:$true] %s720_s2 }
  0xc7   : > { %s7936_s23 = sshra.s32 %s721_s2, 4  ;;  %s7937_s23 = int_to_ptr.hbm [resolvable:$true] %s7936_s23 }
  0xc8   : > { %s7938_s29 = scalar_lea.hbm %s7937_s23, 256  ;;  %p7943_p0 = scmp.lt.s32.totalorder %s7937_s23, %s9903_s18 }
  0xc9   : > { %p7939_p11 = scmp.ne.s32.totalorder %s7937_s23, %s7938_s29  ;;  %p7944_p1 = scmp.lt.s32.totalorder %s7942_s22, %s7938_s29 }
  0xcb   : > { %p7940_p12 = pnand %p7939_p11, %p8364_p4  ;;  %p7945_p2 = por %p7944_p1, %p7943_p0 }
  0xcd   : > { %p7941_p13 = pneg %p7940_p12 }
  0xcf   : > { %p7946_p3 = pnand %p7945_p2, %p7941_p13 }
  0xd1   : > { %7949 = shalt.err (!%p7946_p3)
}
  0xd2   : > { %s9904_s0 = scalar_lea.sflag [#allocation9], %s8407_s3  ;;  %s8568_s28 = sshll.u32 %s8410_s21, 1 }
  0xd3   : > { %7524 = dma.hbm_to_vmem [thread:$0]  (%p8364_p4), %s721_s2, 4096, %s723_s27, %s9904_s0, %s9898_s25, %s9898_s25, %s9897_s8  }
  0xd4   : > { %s8571_s7 = sshll.u32 %s8198_s30, 1  ;;  %s9905_s9 = sld [smem:[#allocation53_spill]] }
  0xd5   : > { %s765_s26 = scalar_lea.vmem [#allocation13], %s8568_s28 }
  0xd6   : > { %s773_s23 = sshll.u32 %s765_s26, 4  ;;  %s774_s23 = int_to_ptr.vmem [resolvable:$true] %s773_s23 }
  0xda   : > { %s769_s14 = scalar_lea.hbm %s9905_s9, %s8571_s7  ;;  %s7970_s2 = scalar_lea.hbm %s9905_s9, 4 }
  0xdb   : > { %s771_s4 = sshll.u32 %s769_s14, 4  ;;  %s772_s4 = int_to_ptr.hbm [resolvable:$true] %s771_s4 }
  0xdc   : > { %s7964_s29 = sshra.s32 %s772_s4, 4  ;;  %s7965_s29 = int_to_ptr.hbm [resolvable:$true] %s7964_s29 }
  0xdd   : > { %s7966_s19 = scalar_lea.hbm %s7965_s29, 2  ;;  %p7971_p12 = scmp.lt.s32.totalorder %s7965_s29, %s9905_s9 }
  0xde   : > { %p7967_p6 = scmp.ne.s32.totalorder %s7965_s29, %s7966_s19  ;;  %p7972_p13 = scmp.lt.s32.totalorder %s7970_s2, %s7966_s19 }
  0xe0   : > { %p7968_p7 = pnand %p7967_p6, %p8364_p4  ;;  %p7973_p0 = por %p7972_p13, %p7971_p12 }
  0xe2   : > { %p7969_p11 = pneg %p7968_p7 }
  0xe4   : > { %p7974_p1 = pnand %p7973_p0, %p7969_p11 }
  0xe6   : > { %7977 = shalt.err (!%p7974_p1)
}
  0xe7   : > { %s9906_s22 = scalar_lea.sflag [#allocation12], %s8407_s3  ;;  %s5533_s1 = sshll.u32 %s8410_s21, 2 }
  0xe8   : > { %7526 = dma.hbm_to_vmem [thread:$0]  (%p8364_p4), %s772_s4, 32, %s774_s23, %s9906_s22  }
  0xe9   : > { %s5534_s20 = sshll.u32 %s8198_s30, 2  ;;  %s9907_s11 = sld [smem:[#allocation55_spill]] }
  0xea   : > { %s806_s26 = scalar_lea.vmem [#allocation16], %s5533_s1 }
  0xeb   : > { %s814_s29 = sshll.u32 %s806_s26, 4  ;;  %s815_s29 = int_to_ptr.vmem [resolvable:$true] %s814_s29 }
  0xef   : > { %s810_s12 = scalar_lea.hbm %s9907_s11, %s5534_s20  ;;  %s7998_s25 = scalar_lea.hbm %s9907_s11, 8 }
  0xf0   : > { %s812_s14 = sshll.u32 %s810_s12, 4  ;;  %s813_s14 = int_to_ptr.hbm [resolvable:$true] %s812_s14 }
  0xf1   : > { %s7992_s19 = sshra.s32 %s813_s14, 4  ;;  %s7993_s19 = int_to_ptr.hbm [resolvable:$true] %s7992_s19 }
  0xf2   : > { %s7994_s8 = scalar_lea.hbm %s7993_s19, 4  ;;  %p7999_p7 = scmp.lt.s32.totalorder %s7993_s19, %s9907_s11 }
  0xf3   : > { %p7995_p2 = scmp.ne.s32.totalorder %s7993_s19, %s7994_s8  ;;  %p8000_p11 = scmp.lt.s32.totalorder %s7998_s25, %s7994_s8 }
  0xf5   : > { %p7996_p3 = pnand %p7995_p2, %p8364_p4  ;;  %p8001_p12 = por %p8000_p11, %p7999_p7 }
  0xf7   : > { %p7997_p6 = pneg %p7996_p3 }
  0xf9   : > { %p8002_p13 = pnand %p8001_p12, %p7997_p6 }
  0xfb   : > { %8005 = shalt.err (!%p8002_p13)
}
  0xfc   : > { %s9908_s10 = scalar_lea.sflag [#allocation15], %s8407_s3  ;;  %s9909_s13 = sld [smem:[#allocation57_spill]] }
  0xfd   : > { %7528 = dma.hbm_to_vmem [thread:$0]  (%p8364_p4), %s813_s14, 64, %s815_s29, %s9908_s10  }
  0xfe   : > { %s847_s26 = scalar_lea.vmem [#allocation19], %s8568_s28 }
  0xff   : > { %s855_s4 = sshll.u32 %s847_s26, 4  ;;  %s856_s4 = int_to_ptr.vmem [resolvable:$true] %s855_s4 }
 0x102   : > { %s851_s17 = scalar_lea.hbm %s9909_s13, %s8571_s7  ;;  %s8026_s14 = scalar_lea.hbm %s9909_s13, 4 }
 0x103   : > { %s853_s12 = sshll.u32 %s851_s17, 4  ;;  %s854_s12 = int_to_ptr.hbm [resolvable:$true] %s853_s12 }
 0x104   : > { %s8020_s19 = sshra.s32 %s854_s12, 4  ;;  %s8021_s19 = int_to_ptr.hbm [resolvable:$true] %s8020_s19 }
 0x105   : > { %s8022_s8 = scalar_lea.hbm %s8021_s19, 2  ;;  %p8027_p3 = scmp.lt.s32.totalorder %s8021_s19, %s9909_s13 }
 0x106   : > { %p8023_p0 = scmp.ne.s32.totalorder %s8021_s19, %s8022_s8  ;;  %p8028_p6 = scmp.lt.s32.totalorder %s8026_s14, %s8022_s8 }
 0x108   : > { %p8024_p1 = pnand %p8023_p0, %p8364_p4  ;;  %p8029_p7 = por %p8028_p6, %p8027_p3 }
 0x10a   : > { %p8025_p2 = pneg %p8024_p1 }
 0x10c   : > { %p8030_p11 = pnand %p8029_p7, %p8025_p2 }
 0x10e   : > { %8033 = shalt.err (!%p8030_p11)
}
 0x10f   : > { %s9910_s27 = scalar_lea.sflag [#allocation18], %s8407_s3  ;;  %s9911_s15 = sld [smem:[#allocation59_spill]] }
 0x110   : > { %7530 = dma.hbm_to_vmem [thread:$0]  (%p8364_p4), %s854_s12, 32, %s856_s4, %s9910_s27  }
 0x111   : > { %s888_s26 = scalar_lea.vmem [#allocation22], %s5533_s1 }
 0x112   : > { %s896_s19 = sshll.u32 %s888_s26, 4  ;;  %s897_s19 = int_to_ptr.vmem [resolvable:$true] %s896_s19 }
 0x115   : > { %s892_s0 = scalar_lea.hbm %s9911_s15, %s5534_s20  ;;  %s8054_s30 = scalar_lea.hbm %s9911_s15, 8 }
 0x116   : > { %s894_s17 = sshll.u32 %s892_s0, 4  ;;  %s895_s17 = int_to_ptr.hbm [resolvable:$true] %s894_s17 }
 0x117   : > { %s8048_s8 = sshra.s32 %s895_s17, 4  ;;  %s8049_s8 = int_to_ptr.hbm [resolvable:$true] %s8048_s8 }
 0x118   : > { %s8050_s23 = scalar_lea.hbm %s8049_s8, 4  ;;  %p8055_p1 = scmp.lt.s32.totalorder %s8049_s8, %s9911_s15 }
 0x119   : > { %p8051_p12 = scmp.ne.s32.totalorder %s8049_s8, %s8050_s23  ;;  %p8056_p2 = scmp.lt.s32.totalorder %s8054_s30, %s8050_s23 }
 0x11b   : > { %p8052_p13 = pnand %p8051_p12, %p8364_p4  ;;  %p8057_p3 = por %p8056_p2, %p8055_p1 }
 0x11d   : > { %p8053_p0 = pneg %p8052_p13 }
 0x11f   : > { %p8058_p6 = pnand %p8057_p3, %p8053_p0 }
 0x121   : > { %8061 = shalt.err (!%p8058_p6)
}
 0x122   : > { %7532 = dma.hbm_to_vmem [thread:$0]  (%p8364_p4), %s895_s17, 64, %s897_s19, %s863_s6  }
 0x123   : > { %s9912_s20 = sld [smem:[#allocation61_spill]]  ;;  %s929_s27 = scalar_lea.vmem [#allocation25], %s8568_s28 }
 0x124   : > { %s937_s10 = sshll.u32 %s929_s27, 4  ;;  %s938_s10 = int_to_ptr.vmem [resolvable:$true] %s937_s10 }
 0x129   : > { %s933_s29 = scalar_lea.hbm %s9912_s20, %s8571_s7  ;;  %s8082_s6 = scalar_lea.hbm %s9912_s20, 4 }
 0x12a   : > { %s935_s2 = sshll.u32 %s933_s29, 4  ;;  %s936_s2 = int_to_ptr.hbm [resolvable:$true] %s935_s2 }
 0x12b   : > { %s8076_s22 = sshra.s32 %s936_s2, 4  ;;  %s8077_s22 = int_to_ptr.hbm [resolvable:$true] %s8076_s22 }
 0x12c   : > { %s8078_s0 = scalar_lea.hbm %s8077_s22, 2  ;;  %p8083_p13 = scmp.lt.s32.totalorder %s8077_s22, %s9912_s20 }
 0x12d   : > { %p8079_p7 = scmp.ne.s32.totalorder %s8077_s22, %s8078_s0  ;;  %p8084_p0 = scmp.lt.s32.totalorder %s8082_s6, %s8078_s0 }
 0x12f   : > { %p8080_p11 = pnand %p8079_p7, %p8364_p4  ;;  %p8085_p1 = por %p8084_p0, %p8083_p13 }
 0x131   : > { %p8081_p12 = pneg %p8080_p11 }
 0x133   : > { %p8086_p2 = pnand %p8085_p1, %p8081_p12 }
 0x135   : > { %8089 = shalt.err (!%p8086_p2)
}
 0x136   : > { %7534 = dma.hbm_to_vmem [thread:$0]  (%p8364_p4), %s936_s2, 32, %s938_s10, %s904_s5  }
 0x137 PF: > { %962 = sbr.rel (%p8378_p10) target bundleno = 3555 (0xde3), region = 108 }
 0x13c   : > { %s9914_s7 = sld [smem:[#allocation38_spill]] }
 0x13d   : > { %8149 = dma.done.wait (%p158_p5), [#allocation3], 1024  }
 0x13e   : > { %8151 = vsyncadd (%p158_p5), [#allocation3], 4294966272 }
 0x13f   : > { %8153 = dma.done.wait (%p158_p5), [#allocation6], 256  }
 0x140   : > { %8155 = vsyncadd (%p158_p5), [#allocation6], 4294967040  ;;  %s9915_s24 = sld [smem:[#allocation36_spill]] }
 0x142   : > { %s8675_s5 = sand.u32 1, %s9914_s7  }
 0x143   : > { %s980_s12 = scalar_lea.sflag [#allocation9], %s8675_s5 }
 0x146   : > { %s8678_s23 = sand.u32 1, %s9915_s24  }
 0x147   : > { %s7515_s25 = smul.u32 768, %s8678_s23 }
 0x149   : > { %s8682_s30 = scalar_lea.vmem [#allocation8], %s7515_s25 }
 0x14a   : > { %8157 = dma.done.wait (%p8373_p8), %s980_s12, 16384  }
 0x14b   : > { %8159 = vsyncadd (%p8373_p8), %s980_s12, 4294950912  ;;  %s5554_s4 = sshll.u32 %s8678_s23, 8  ;;  %s1000_s21 = scalar_lea.sflag [#allocation12], %s8675_s5 }
 0x14c   : > { %s8689_s14 = scalar_lea.vmem [#allocation10], %s5554_s4  ;;  %s8692_s1 = scalar_lea.vmem [#allocation11], %s5554_s4 }
 0x14d   : > { %8161 = dma.done.wait (%p8373_p8), %s1000_s21, 4128  }
 0x14e   : > { %8163 = vsyncadd (%p8373_p8), %s1000_s21, 4294963168  ;;  %s8699_s29 = sshll.u32 %s8678_s23, 1  ;;  %s5557_s2 = sshll.u32 %s8678_s23, 9 }
 0x14f   : > { %s1020_s10 = scalar_lea.sflag [#allocation15], %s8675_s5  ;;  %s8704_s22 = scalar_lea.vmem [#allocation14], %s5557_s2 }
 0x150   : > { %8165 = dma.done.wait (%p8373_p8), %s1020_s10, 8256  }
 0x151   : > { %8167 = vsyncadd (%p8373_p8), %s1020_s10, 4294959040  ;;  %s5558_s0 = sshll.u32 %s8678_s23, 2  ;;  %s1040_s8 = scalar_lea.sflag [#allocation18], %s8675_s5 }
 0x152   : > { %s8711_s26 = scalar_lea.vmem [#allocation16], %s5558_s0  ;;  %s8714_s6 = scalar_lea.vmem [#allocation17], %s5554_s4 }
 0x153   : > { %8169 = dma.done.wait (%p8373_p8), %s1040_s8, 4128  }
 0x154   : > { %8171 = vsyncadd (%p8373_p8), %s1040_s8, 4294963168  ;;  %s1060_s19 = scalar_lea.sflag [#allocation21], %s8675_s5  ;;  %s8722_s28 = scalar_lea.vmem [#allocation20], %s5557_s2 }
 0x155   : > { %8173 = dma.done.wait (%p8373_p8), %s1060_s19, 8256  }
 0x156   : > { %8175 = vsyncadd (%p8373_p8), %s1060_s19, 4294959040  ;;  %s8728_s24 = scalar_lea.vmem [#allocation22], %s5558_s0  ;;  %s1080_s23 = scalar_lea.sflag [#allocation24], %s8675_s5 }
 0x157   : > { %9917 = sst [smem:[#allocation43_spill]] %s8728_s24  ;;  %s8731_s25 = scalar_lea.vmem [#allocation23], %s5557_s2 }
 0x158   : > { %8177 = dma.done.wait (%p8373_p8), %s1080_s23, 8224  }
 0x159   : > { %8179 = vsyncadd (%p8373_p8), %s1080_s23, 4294959072  ;;  %p1223_p4 = scmp.lt.s32.totalorder %s9914_s7, 1  ;;  %s9918_s19 = sld [smem:[#allocation51_spill]] }
 0x15a   : > { %s9919_s27 = sld [smem:[#allocation49_spill]]  ;;  %s1093_s24 = scalar_lea.vmem [#allocation25], %s8699_s29 }
 0x15b   : > { %s1224_s12 = scalar_select %p1223_p4, %s9914_s7, 1 }
 0x15c   : > { %s9920_s11 = sld [smem:[#allocation62_spill]] }
 0x15d   : > { %s7516_s4 = smul.u32 6, %s1224_s12  ;;  %s5565_s21 = sshll.u32 %s1224_s12, 1 }
 0x15e   : > { %s7127_s5 = sshll.u32 %s1224_s12, 3  ;;  %s9921_s18 = sld [smem:[#allocation63_spill]] }
 0x15f   : > { %s8742_s0 = scalar_lea.vmem %s9918_s19, %s5565_s21  ;;  %s9922_s10 = sld [smem:[#allocation44_spill]] (!%p5517_p9) }
 0x160   : > { %s8747_s9 = scalar_lea.vmem %s9919_s27, %s7516_s4  ;;  %1245 = sbr.rel (%p5517_p9) target bundleno = 362 (0x16a), region = 172 }
 0x162   : > { %s8752_s13 = scalar_lea.vmem %s9920_s11, %s7127_s5 }
 0x164   : > { %s8757_s20 = scalar_lea.vmem %s9921_s18, %s7127_s5 }
 0x165   : > { %v1246_v0 = vld [vmem:[%s9922_s10] sm:$0xff]  ;;  %v1247_v1 = vld [vmem:[%s9922_s10 + $0x8] sm:$0xff]  ;;  %v1248_v2 = vld [vmem:[%s9922_s10 + $0x10] sm:$0xff] }
 0x166   : > { %1250 = vst [vmem:[#allocation26] sm:$0xff] %v1246_v0  ;;  %v1249_v3 = vld [vmem:[%s9922_s10 + $0x18] sm:$0xff] }
 0x167   : > { %1251 = vst [vmem:[#allocation26 + $0x8] sm:$0xff] %v1247_v1 }
 0x168   : > { %1252 = vst [vmem:[#allocation26 + $0x10] sm:$0xff] %v1248_v2 }
 0x169   : > { %1253 = vst [vmem:[#allocation26 + $0x18] sm:$0xff] %v1249_v3 }
 0x16a PF: > { %v5741_v4 = vld [vmem:[%s8682_s30 + $0x150] sm:$0xf]  ;;  %v7174_v5 = vld [vmem:[%s8682_s30 + $0x164] sm:$0xf0]  ;;  %v7171_v9 = vld [vmem:[%s8682_s30 + $0x154] sm:$0xf] }
 0x16b   : > { %v5933_v6 = vld [vmem:[%s8682_s30 + $0x2d0] sm:$0xf]  ;;  %v5742_v7 = vor.u32 %v7174_v5, %v5741_v4  ;;  %v7222_v8 = vld [vmem:[%s8682_s30 + $0x2e4] sm:$0xf0]  ;;  %v5743_v10 = vld [vmem:[%s8682_s30 + $0x168] sm:$0xf0] }
 0x16c   : > { %v5934_v11 = vor.u32 %v7222_v8, %v5933_v6  ;;  %v5746_v12 = vor.u32 %v7171_v9, %v5743_v10  ;;  %v7219_v13 = vld [vmem:[%s8682_s30 + $0x2d4] sm:$0xf]  ;;  %v5935_v14 = vld [vmem:[%s8682_s30 + $0x2e8] sm:$0xf0]  ;;  %v5717_v15 = vld [vmem:[%s8682_s30 + $0x120] sm:$0xf] }
 0x16d   : > { %1860 = vmatpush.bf16.msra.mxu0 %v5742_v7  ;;  %v5938_v16 = vor.u32 %v7219_v13, %v5935_v14  ;;  %v7168_v17 = vld [vmem:[%s8682_s30 + $0x134] sm:$0xf0]  ;;  %v5909_v18 = vld [vmem:[%s8682_s30 + $0x2a0] sm:$0xf]  ;;  %v7165_v22 = vld [vmem:[%s8682_s30 + $0x124] sm:$0xf] }
 0x16e   : > { %v7216_v19 = vld [vmem:[%s8682_s30 + $0x2b4] sm:$0xf0]  ;;  %1874 = vmatpush.bf16.msra.mxu1 %v5934_v11  ;;  %1888 = vmatpush.bf16.msra.mxu2 %v5746_v12  ;;  %v5718_v20 = vor.u32 %v7168_v17, %v5717_v15  ;;  %v5719_v23 = vld [vmem:[%s8682_s30 + $0x138] sm:$0xf0]  ;;  %v7213_v24 = vld [vmem:[%s8682_s30 + $0x2a4] sm:$0xf] }
 0x16f   : > { %v5910_v21 = vor.u32 %v7216_v19, %v5909_v18  ;;  %1902 = vmatpush.bf16.msra.mxu3 %v5938_v16  ;;  %v5722_v25 = vor.u32 %v7165_v22, %v5719_v23  ;;  %v5911_v26 = vld [vmem:[%s8682_s30 + $0x2b8] sm:$0xf0]  ;;  %v5693_v27 = vld [vmem:[%s8682_s30 + $0xf0] sm:$0xf]  ;;  %v7162_v28 = vld [vmem:[%s8682_s30 + $0x104] sm:$0xf0] }
 0x170   : > { %v5914_v29 = vor.u32 %v7213_v24, %v5911_v26  ;;  %v5885_v30 = vld [vmem:[%s8682_s30 + $0x270] sm:$0xf]  ;;  %v7210_v31 = vld [vmem:[%s8682_s30 + $0x284] sm:$0xf0]  ;;  %v7159_v32 = vld [vmem:[%s8682_s30 + $0xf4] sm:$0xf]  ;;  %v5694_v33 = vor.u32 %v7162_v28, %v5693_v27 }
 0x171   : > { %1861 = vmatpush.bf16.msra.mxu0 %v5718_v20  ;;  %v5695_v34 = vld [vmem:[%s8682_s30 + $0x108] sm:$0xf0]  ;;  %v7207_v35 = vld [vmem:[%s8682_s30 + $0x274] sm:$0xf]  ;;  %v5886_v37 = vor.u32 %v7210_v31, %v5885_v30  ;;  %v5669_v39 = vld [vmem:[%s8682_s30 + $0xc0] sm:$0xf] }
 0x172   : > { %v5887_v36 = vld [vmem:[%s8682_s30 + $0x288] sm:$0xf0]  ;;  %1875 = vmatpush.bf16.msra.mxu1 %v5910_v21  ;;  %1889 = vmatpush.bf16.msra.mxu2 %v5722_v25  ;;  %v5698_v38 = vor.u32 %v7159_v32, %v5695_v34  ;;  %v7156_v40 = vld [vmem:[%s8682_s30 + $0xd4] sm:$0xf0]  ;;  %v5861_v41 = vld [vmem:[%s8682_s30 + $0x240] sm:$0xf] }
 0x173   : > { %1903 = vmatpush.bf16.msra.mxu3 %v5914_v29  ;;  %v5890_v42 = vor.u32 %v7207_v35, %v5887_v36  ;;  %v7204_v43 = vld [vmem:[%s8682_s30 + $0x254] sm:$0xf0]  ;;  %v7153_v44 = vld [vmem:[%s8682_s30 + $0xc4] sm:$0xf]  ;;  %v5671_v45 = vld [vmem:[%s8682_s30 + $0xd8] sm:$0xf0]  ;;  %v5670_v48 = vor.u32 %v7156_v40, %v5669_v39 }
 0x174   : > { %v7201_v46 = vld [vmem:[%s8682_s30 + $0x244] sm:$0xf]  ;;  %v5863_v47 = vld [vmem:[%s8682_s30 + $0x258] sm:$0xf0]  ;;  %v5862_v49 = vor.u32 %v7204_v43, %v5861_v41  ;;  %v5674_v50 = vor.u32 %v7153_v44, %v5671_v45  ;;  %v5645_v51 = vld [vmem:[%s8682_s30 + $0x90] sm:$0xf] }
 0x175   : > { %1862 = vmatpush.bf16.msra.mxu0 %v5694_v33  ;;  %v7150_v52 = vld [vmem:[%s8682_s30 + $0xa4] sm:$0xf0]  ;;  %v5837_v53 = vld [vmem:[%s8682_s30 + $0x210] sm:$0xf]  ;;  %v5866_v54 = vor.u32 %v7201_v46, %v5863_v47  ;;  %v7147_v56 = vld [vmem:[%s8682_s30 + $0x94] sm:$0xf] }
 0x176   : > { %1876 = vmatpush.bf16.msra.mxu1 %v5886_v37  ;;  %1890 = vmatpush.bf16.msra.mxu2 %v5698_v38  ;;  %v7198_v55 = vld [vmem:[%s8682_s30 + $0x224] sm:$0xf0]  ;;  %v5647_v57 = vld [vmem:[%s8682_s30 + $0xa8] sm:$0xf0]  ;;  %v7195_v58 = vld [vmem:[%s8682_s30 + $0x214] sm:$0xf]  ;;  %v5646_v60 = vor.u32 %v7150_v52, %v5645_v51 }
 0x177   : > { %1904 = vmatpush.bf16.msra.mxu3 %v5890_v42  ;;  %v5839_v59 = vld [vmem:[%s8682_s30 + $0x228] sm:$0xf0]  ;;  %v5838_v61 = vor.u32 %v7198_v55, %v5837_v53  ;;  %v5650_v62 = vor.u32 %v7147_v56, %v5647_v57  ;;  %v5621_v63 = vld [vmem:[%s8682_s30 + $0x60] sm:$0xf]  ;;  %v7144_v0 = vld [vmem:[%s8682_s30 + $0x74] sm:$0xf0] }
 0x178   : > { %v5813_v1 = vld [vmem:[%s8682_s30 + $0x1e0] sm:$0xf]  ;;  %v5842_v2 = vor.u32 %v7195_v58, %v5839_v59  ;;  %v7192_v3 = vld [vmem:[%s8682_s30 + $0x1f4] sm:$0xf0]  ;;  %v7141_v4 = vld [vmem:[%s8682_s30 + $0x64] sm:$0xf]  ;;  %v5622_v8 = vor.u32 %v7144_v0, %v5621_v63 }
 0x179   : > { %1863 = vmatpush.bf16.msra.mxu0 %v5670_v48  ;;  %v5623_v5 = vld [vmem:[%s8682_s30 + $0x78] sm:$0xf0]  ;;  %v7189_v6 = vld [vmem:[%s8682_s30 + $0x1e4] sm:$0xf]  ;;  %v5814_v9 = vor.u32 %v7192_v3, %v5813_v1  ;;  %v5597_v11 = vld [vmem:[%s8682_s30 + $0x30] sm:$0xf] }
 0x17a   : > { %1877 = vmatpush.bf16.msra.mxu1 %v5862_v49  ;;  %1891 = vmatpush.bf16.msra.mxu2 %v5674_v50  ;;  %v5815_v7 = vld [vmem:[%s8682_s30 + $0x1f8] sm:$0xf0]  ;;  %v5626_v10 = vor.u32 %v7141_v4, %v5623_v5  ;;  %v7138_v12 = vld [vmem:[%s8682_s30 + $0x44] sm:$0xf0]  ;;  %v5789_v13 = vld [vmem:[%s8682_s30 + $0x1b0] sm:$0xf] }
 0x17b   : > { %1905 = vmatpush.bf16.msra.mxu3 %v5866_v54  ;;  %v5818_v14 = vor.u32 %v7189_v6, %v5815_v7  ;;  %v7186_v15 = vld [vmem:[%s8682_s30 + $0x1c4] sm:$0xf0]  ;;  %v7135_v16 = vld [vmem:[%s8682_s30 + $0x34] sm:$0xf]  ;;  %v5599_v17 = vld [vmem:[%s8682_s30 + $0x48] sm:$0xf0]  ;;  %v5598_v20 = vor.u32 %v7138_v12, %v5597_v11 }
 0x17c   : > { %v7183_v18 = vld [vmem:[%s8682_s30 + $0x1b4] sm:$0xf]  ;;  %v5791_v19 = vld [vmem:[%s8682_s30 + $0x1c8] sm:$0xf0]  ;;  %v5573_v21 = vld [vmem:[%s8682_s30] sm:$0xf]  ;;  %v5790_v24 = vor.u32 %v7186_v15, %v5789_v13  ;;  %v5602_v25 = vor.u32 %v7135_v16, %v5599_v17 }
 0x17d   : > { %1864 = vmatpush.bf16.msra.mxu0 %v5646_v60  ;;  %v7132_v22 = vld [vmem:[%s8682_s30 + $0x14] sm:$0xf0]  ;;  %v5765_v23 = vld [vmem:[%s8682_s30 + $0x180] sm:$0xf]  ;;  %v7129_v27 = vld [vmem:[%s8682_s30 + $0x4] sm:$0xf]  ;;  %v5794_v29 = vor.u32 %v7183_v18, %v5791_v19 }
 0x17e   : > { %1878 = vmatpush.bf16.msra.mxu1 %v5838_v61  ;;  %1892 = vmatpush.bf16.msra.mxu2 %v5650_v62  ;;  %v7180_v26 = vld [vmem:[%s8682_s30 + $0x194] sm:$0xf0]  ;;  %v5575_v28 = vld [vmem:[%s8682_s30 + $0x18] sm:$0xf0]  ;;  %v7177_v30 = vld [vmem:[%s8682_s30 + $0x184] sm:$0xf]  ;;  %v5574_v36 = vor.u32 %v7132_v22, %v5573_v21 }
 0x17f   : > { %1906 = vmatpush.bf16.msra.mxu3 %v5842_v2  ;;  %v5767_v31 = vld [vmem:[%s8682_s30 + $0x198] sm:$0xf0]  ;;  %v5749_v32 = vld [vmem:[%s8682_s30 + $0x158] sm:$0xf]  ;;  %v7175_v33 = vld [vmem:[%s8682_s30 + $0x16c] sm:$0xf0]  ;;  %v5766_v40 = vor.u32 %v7180_v26, %v5765_v23  ;;  %v5578_v41 = vor.u32 %v7129_v27, %v5575_v28 }
 0x180   : > { %v5941_v34 = vld [vmem:[%s8682_s30 + $0x2d8] sm:$0xf]  ;;  %v7223_v35 = vld [vmem:[%s8682_s30 + $0x2ec] sm:$0xf0]  ;;  %v7172_v37 = vld [vmem:[%s8682_s30 + $0x15c] sm:$0xf]  ;;  %v5770_v45 = vor.u32 %v7177_v30, %v5767_v31  ;;  %v5750_v46 = vor.u32 %v7175_v33, %v5749_v32 }
 0x181   : > { %1865 = vmatpush.bf16.msra.mxu0 %v5622_v8  ;;  %v5751_v38 = vld [vmem:[%s8682_s30 + $0x170] sm:$0xf0]  ;;  %v7220_v39 = vld [vmem:[%s8682_s30 + $0x2dc] sm:$0xf]  ;;  %v1256_v44 = vld [vmem:[#allocation26 + $0x10] sm:$0xff]  ;;  %v5942_v49 = vor.u32 %v7223_v35, %v5941_v34  ;;  %vm2196_vm0 = vcmask 1043456  }
 0x182   : > { %1879 = vmatpush.bf16.msra.mxu1 %v5814_v9  ;;  %1893 = vmatpush.bf16.msra.mxu2 %v5626_v10  ;;  %v5943_v42 = vld [vmem:[%s8682_s30 + $0x2f0] sm:$0xf0]  ;;  %v1254_v43 = vld [vmem:[#allocation26] sm:$0xff]  ;;  %v5725_v47 = vld [vmem:[%s8682_s30 + $0x128] sm:$0xf]  ;;  %v5754_v50 = vor.u32 %v7172_v37, %v5751_v38  ;;  %vm2144_vm1 = vcmask 64512  }
 0x183   : > { %1907 = vmatpush.bf16.msra.mxu3 %v5818_v14  ;;  %v7169_v48 = vld [vmem:[%s8682_s30 + $0x13c] sm:$0xf0]  ;;  %v5917_v51 = vld [vmem:[%s8682_s30 + $0x2a8] sm:$0xf]  ;;  %v1257_v53 = vld [vmem:[#allocation26 + $0x18] sm:$0xff]  ;;  %v5946_v54 = vor.u32 %v7220_v39, %v5943_v42  ;;  %v8852_v58 = vpack.c.bf16 %v1256_v44, %v1254_v43  ;;  %vm3528_vm9 = vcmask 130048  }
 0x184   : > { %v1255_v52 = vld [vmem:[#allocation26 + $0x8] sm:$0xff]  ;;  %v7217_v55 = vld [vmem:[%s8682_s30 + $0x2bc] sm:$0xf0]  ;;  %v7166_v56 = vld [vmem:[%s8682_s30 + $0x12c] sm:$0xf]  ;;  %v5726_v62 = vor.u32 %v7169_v48, %v5725_v47  ;;  %s9924_s18 = scalar_lea.vmem [#allocation19], %s8699_s29 }
 0x185   : > { %1866 = vmatpush.bf16.msra.mxu0 %v5598_v20  ;;  %v5727_v57 = vld [vmem:[%s8682_s30 + $0x140] sm:$0xf0]  ;;  %v7214_v59 = vld [vmem:[%s8682_s30 + $0x2ac] sm:$0xf]  ;;  %v8856_v61 = vpack.c.bf16 %v1257_v53, %v1255_v52  ;;  %v5918_v63 = vor.u32 %v7217_v55, %v5917_v51  ;;  %v5701_v1 = vld [vmem:[%s8682_s30 + $0xf8] sm:$0xf] }
 0x186   : > { %1880 = vmatpush.bf16.msra.mxu1 %v5790_v24  ;;  %1894 = vmatpush.bf16.msra.mxu2 %v5602_v25  ;;  %v5919_v60 = vld [vmem:[%s8682_s30 + $0x2c0] sm:$0xf0]  ;;  %v5730_v0 = vor.u32 %v7166_v56, %v5727_v57  ;;  %v7163_v2 = vld [vmem:[%s8682_s30 + $0x10c] sm:$0xf0]  ;;  %v5893_v3 = vld [vmem:[%s8682_s30 + $0x278] sm:$0xf] }
 0x187   : > { %1908 = vmatpush.bf16.msra.mxu3 %v5794_v29  ;;  %v5922_v4 = vor.u32 %v7214_v59, %v5919_v60  ;;  %v7211_v5 = vld [vmem:[%s8682_s30 + $0x28c] sm:$0xf0]  ;;  %v7160_v6 = vld [vmem:[%s8682_s30 + $0xfc] sm:$0xf]  ;;  %v5703_v7 = vld [vmem:[%s8682_s30 + $0x110] sm:$0xf0]  ;;  %v5702_v10 = vor.u32 %v7163_v2, %v5701_v1 }
 0x188   : > { %v7208_v8 = vld [vmem:[%s8682_s30 + $0x27c] sm:$0xf]  ;;  %v5895_v9 = vld [vmem:[%s8682_s30 + $0x290] sm:$0xf0]  ;;  %v5894_v11 = vor.u32 %v7211_v5, %v5893_v3  ;;  %v5706_v12 = vor.u32 %v7160_v6, %v5703_v7  ;;  %v5677_v13 = vld [vmem:[%s8682_s30 + $0xc8] sm:$0xf] }
 0x189   : > { %1867 = vmatpush.bf16.msra.mxu0 %v5574_v36  ;;  %v7157_v14 = vld [vmem:[%s8682_s30 + $0xdc] sm:$0xf0]  ;;  %v5869_v15 = vld [vmem:[%s8682_s30 + $0x248] sm:$0xf]  ;;  %v5898_v16 = vor.u32 %v7208_v8, %v5895_v9  ;;  %v7154_v18 = vld [vmem:[%s8682_s30 + $0xcc] sm:$0xf] }
 0x18a   : > { %1881 = vmatpush.bf16.msra.mxu1 %v5766_v40  ;;  %1895 = vmatpush.bf16.msra.mxu2 %v5578_v41  ;;  %v7205_v17 = vld [vmem:[%s8682_s30 + $0x25c] sm:$0xf0]  ;;  %v5679_v19 = vld [vmem:[%s8682_s30 + $0xe0] sm:$0xf0]  ;;  %v7202_v20 = vld [vmem:[%s8682_s30 + $0x24c] sm:$0xf]  ;;  %v5678_v22 = vor.u32 %v7157_v14, %v5677_v13 }
 0x18b   : > { %1909 = vmatpush.bf16.msra.mxu3 %v5770_v45  ;;  %v5871_v21 = vld [vmem:[%s8682_s30 + $0x260] sm:$0xf0]  ;;  %v5870_v23 = vor.u32 %v7205_v17, %v5869_v15  ;;  %v5682_v24 = vor.u32 %v7154_v18, %v5679_v19  ;;  %v5653_v25 = vld [vmem:[%s8682_s30 + $0x98] sm:$0xf]  ;;  %v7151_v26 = vld [vmem:[%s8682_s30 + $0xac] sm:$0xf0] }
 0x18c   : > { %1868 = vmatmul.bf16.vlgmr.msra.gmra.mxu0 %v8852_v58  ;;  %v5845_v27 = vld [vmem:[%s8682_s30 + $0x218] sm:$0xf]  ;;  %v5874_v28 = vor.u32 %v7202_v20, %v5871_v21  ;;  %v7199_v29 = vld [vmem:[%s8682_s30 + $0x22c] sm:$0xf0]  ;;  %v7148_v30 = vld [vmem:[%s8682_s30 + $0x9c] sm:$0xf]  ;;  %v5654_v34 = vor.u32 %v7151_v26, %v5653_v25 }
 0x18d   : > { %1916 = vmatpush.bf16.msrb.mxu0 %v5750_v46  ;;  %1896 = vmatmul.bf16.vlgmr.msra.gmra.mxu2 %v8852_v58  ;;  %v5655_v31 = vld [vmem:[%s8682_s30 + $0xb0] sm:$0xf0]  ;;  %v7196_v32 = vld [vmem:[%s8682_s30 + $0x21c] sm:$0xf]  ;;  %v5846_v35 = vor.u32 %v7199_v29, %v5845_v27  ;;  %v5629_v37 = vld [vmem:[%s8682_s30 + $0x68] sm:$0xf] }
 0x18e   : > { %1930 = vmatpush.bf16.msrb.mxu1 %v5942_v49  ;;  %1944 = vmatpush.bf16.msrb.mxu2 %v5754_v50  ;;  %v5847_v33 = vld [vmem:[%s8682_s30 + $0x230] sm:$0xf0]  ;;  %v5658_v36 = vor.u32 %v7148_v30, %v5655_v31  ;;  %v7145_v38 = vld [vmem:[%s8682_s30 + $0x7c] sm:$0xf0]  ;;  %v5821_v39 = vld [vmem:[%s8682_s30 + $0x1e8] sm:$0xf] }
 0x18f   : > { %1958 = vmatpush.bf16.msrb.mxu3 %v5946_v54  ;;  %1882 = vmatmul.bf16.vlgmr.msra.gmra.mxu1 %v8856_v61  ;;  %v5850_v40 = vor.u32 %v7196_v32, %v5847_v33  ;;  %v7193_v41 = vld [vmem:[%s8682_s30 + $0x1fc] sm:$0xf0]  ;;  %v7142_v42 = vld [vmem:[%s8682_s30 + $0x6c] sm:$0xf]  ;;  %v5631_v43 = vld [vmem:[%s8682_s30 + $0x80] sm:$0xf0]  ;;  %v5630_v46 = vor.u32 %v7145_v38, %v5629_v37 }
 0x190   : > { %1910 = vmatmul.bf16.vlgmr.msra.gmra.mxu3 %v8856_v61  ;;  %v7190_v44 = vld [vmem:[%s8682_s30 + $0x1ec] sm:$0xf]  ;;  %v5823_v45 = vld [vmem:[%s8682_s30 + $0x200] sm:$0xf0]  ;;  %v5822_v47 = vor.u32 %v7193_v41, %v5821_v39  ;;  %v5634_v48 = vor.u32 %v7142_v42, %v5631_v43  ;;  %v5605_v49 = vld [vmem:[%s8682_s30 + $0x38] sm:$0xf] }
 0x191   : > { %1917 = vmatpush.bf16.msrb.mxu0 %v5726_v62  ;;  %v7139_v50 = vld [vmem:[%s8682_s30 + $0x4c] sm:$0xf0]  ;;  %v5797_v51 = vld [vmem:[%s8682_s30 + $0x1b8] sm:$0xf]  ;;  %v5826_v52 = vor.u32 %v7190_v44, %v5823_v45  ;;  %v7136_v54 = vld [vmem:[%s8682_s30 + $0x3c] sm:$0xf] }
 0x192   : > { %1931 = vmatpush.bf16.msrb.mxu1 %v5918_v63  ;;  %1945 = vmatpush.bf16.msrb.mxu2 %v5730_v0  ;;  %v7187_v53 = vld [vmem:[%s8682_s30 + $0x1cc] sm:$0xf0]  ;;  %v5607_v55 = vld [vmem:[%s8682_s30 + $0x50] sm:$0xf0]  ;;  %v7184_v56 = vld [vmem:[%s8682_s30 + $0x1bc] sm:$0xf]  ;;  %v5606_v59 = vor.u32 %v7139_v50, %v5605_v49 }
 0x193   : > { %1959 = vmatpush.bf16.msrb.mxu3 %v5922_v4  ;;  %v5799_v57 = vld [vmem:[%s8682_s30 + $0x1d0] sm:$0xf0]  ;;  %v5581_v60 = vld [vmem:[%s8682_s30 + $0x8] sm:$0xf]  ;;  %v5798_v62 = vor.u32 %v7187_v53, %v5797_v51  ;;  %v5610_v63 = vor.u32 %v7136_v54, %v5607_v55  ;;  %v7133_v0 = vld [vmem:[%s8682_s30 + $0x1c] sm:$0xf0] }
 0x194   : > { %v5773_v1 = vld [vmem:[%s8682_s30 + $0x188] sm:$0xf]  ;;  %v7181_v2 = vld [vmem:[%s8682_s30 + $0x19c] sm:$0xf0]  ;;  %v5802_v3 = vor.u32 %v7184_v56, %v5799_v57  ;;  %v7130_v4 = vld [vmem:[%s8682_s30 + $0xc] sm:$0xf] }
 0x195   : > { %1918 = vmatpush.bf16.msrb.mxu0 %v5702_v10  ;;  %v5583_v5 = vld [vmem:[%s8682_s30 + $0x20] sm:$0xf0]  ;;  %v7178_v6 = vld [vmem:[%s8682_s30 + $0x18c] sm:$0xf]  ;;  %v5759_v9 = vld [vmem:[%s8682_s30 + $0x178] sm:$0xf0]  ;;  %v5582_v10 = vor.u32 %v7133_v0, %v5581_v60  ;;  %v5774_v13 = vor.u32 %v7181_v2, %v5773_v1 }
 0x196   : > { %1932 = vmatpush.bf16.msrb.mxu1 %v5894_v11  ;;  %1946 = vmatpush.bf16.msrb.mxu2 %v5706_v12  ;;  %v5775_v7 = vld [vmem:[%s8682_s30 + $0x1a0] sm:$0xf0]  ;;  %v5951_v12 = vld [vmem:[%s8682_s30 + $0x2f8] sm:$0xf0]  ;;  %v5586_v14 = vor.u32 %v7130_v4, %v5583_v5  ;;  %v7167_v17 = vld [vmem:[%s8682_s30 + $0x134] sm:$0xf] }
 0x197   : > { %1960 = vmatpush.bf16.msrb.mxu3 %v5898_v16  ;;  %v7173_v8 = vld [vmem:[%s8682_s30 + $0x164] sm:$0xf]  ;;  %v5778_v15 = vor.u32 %v7178_v6, %v5775_v7  ;;  %v5757_v18 = vld [vmem:[%s8682_s30 + $0x160] sm:$0xf]  ;;  %v7176_v19 = vld [vmem:[%s8682_s30 + $0x174] sm:$0xf0] }
 0x198   : > { %v7221_v11 = vld [vmem:[%s8682_s30 + $0x2e4] sm:$0xf]  ;;  %v5762_v16 = vor.u32 %v7173_v8, %v5759_v9  ;;  %v5735_v21 = vld [vmem:[%s8682_s30 + $0x148] sm:$0xf0]  ;;  %v5758_v26 = vor.u32 %v7176_v19, %v5757_v18  ;;  %v5733_v30 = vld [vmem:[%s8682_s30 + $0x130] sm:$0xf] }
 0x199   : > { %1919 = vmatpush.bf16.msrb.mxu0 %v5678_v22  ;;  %v5954_v20 = vor.u32 %v7221_v11, %v5951_v12  ;;  %v5949_v22 = vld [vmem:[%s8682_s30 + $0x2e0] sm:$0xf]  ;;  %v5927_v25 = vld [vmem:[%s8682_s30 + $0x2c8] sm:$0xf0]  ;;  %v5738_v27 = vor.u32 %v7167_v17, %v5735_v21  ;;  %v7161_v29 = vld [vmem:[%s8682_s30 + $0x104] sm:$0xf] }
 0x19a   : > { %1933 = vmatpush.bf16.msrb.mxu1 %v5870_v23  ;;  %1947 = vmatpush.bf16.msrb.mxu2 %v5682_v24  ;;  %v7224_v23 = vld [vmem:[%s8682_s30 + $0x2f4] sm:$0xf0]  ;;  %v7215_v24 = vld [vmem:[%s8682_s30 + $0x2b4] sm:$0xf]  ;;  %v7170_v31 = vld [vmem:[%s8682_s30 + $0x144] sm:$0xf0] }
 0x19b   : > { %1961 = vmatpush.bf16.msrb.mxu3 %v5874_v28  ;;  %v5950_v28 = vor.u32 %v7224_v23, %v5949_v22  ;;  %v5930_v32 = vor.u32 %v7215_v24, %v5927_v25  ;;  %v5711_v33 = vld [vmem:[%s8682_s30 + $0x118] sm:$0xf0]  ;;  %v5734_v38 = vor.u32 %v7170_v31, %v5733_v30  ;;  %v5709_v41 = vld [vmem:[%s8682_s30 + $0x100] sm:$0xf]  ;;  %v7164_v42 = vld [vmem:[%s8682_s30 + $0x114] sm:$0xf0] }
 0x19c   : > { %v5903_v37 = vld [vmem:[%s8682_s30 + $0x298] sm:$0xf0]  ;;  %v5714_v39 = vor.u32 %v7161_v29, %v5711_v33  ;;  %v7155_v44 = vld [vmem:[%s8682_s30 + $0xd4] sm:$0xf]  ;;  %v5687_v45 = vld [vmem:[%s8682_s30 + $0xe8] sm:$0xf0] }
 0x19d   : > { %1920 = vmatpush.bf16.msrb.mxu0 %v5654_v34  ;;  %v5925_v34 = vld [vmem:[%s8682_s30 + $0x2b0] sm:$0xf]  ;;  %v5690_v49 = vor.u32 %v7155_v44, %v5687_v45  ;;  %v5901_v51 = vld [vmem:[%s8682_s30 + $0x280] sm:$0xf]  ;;  %v7149_v53 = vld [vmem:[%s8682_s30 + $0xa4] sm:$0xf] }
 0x19e   : > { %1934 = vmatpush.bf16.msrb.mxu1 %v5846_v35  ;;  %1948 = vmatpush.bf16.msrb.mxu2 %v5658_v36  ;;  %v7218_v35 = vld [vmem:[%s8682_s30 + $0x2c4] sm:$0xf0]  ;;  %v7209_v36 = vld [vmem:[%s8682_s30 + $0x284] sm:$0xf]  ;;  %v5663_v55 = vld [vmem:[%s8682_s30 + $0xb8] sm:$0xf0] }
 0x19f   : > { %1962 = vmatpush.bf16.msrb.mxu3 %v5850_v40  ;;  %v5926_v40 = vor.u32 %v7218_v35, %v5925_v34  ;;  %v5906_v43 = vor.u32 %v7209_v36, %v5903_v37  ;;  %v5666_v56 = vor.u32 %v7149_v53, %v5663_v55  ;;  %v5685_v57 = vld [vmem:[%s8682_s30 + $0xd0] sm:$0xf]  ;;  %v7197_v60 = vld [vmem:[%s8682_s30 + $0x224] sm:$0xf]  ;;  %v7206_v1 = vld [vmem:[%s8682_s30 + $0x264] sm:$0xf0] }
 0x1a0   : > { %v5877_v0 = vld [vmem:[%s8682_s30 + $0x250] sm:$0xf]  ;;  %v7143_v4 = vld [vmem:[%s8682_s30 + $0x74] sm:$0xf]  ;;  %v5639_v5 = vld [vmem:[%s8682_s30 + $0x88] sm:$0xf0] }
 0x1a1   : > { %1921 = vmatpush.bf16.msrb.mxu0 %v5630_v46  ;;  %v7203_v46 = vld [vmem:[%s8682_s30 + $0x254] sm:$0xf]  ;;  %v5661_v6 = vld [vmem:[%s8682_s30 + $0xa0] sm:$0xf]  ;;  %v5642_v7 = vor.u32 %v7143_v4, %v5639_v5  ;;  %v7152_v8 = vld [vmem:[%s8682_s30 + $0xb4] sm:$0xf0] }
 0x1a2   : > { %1935 = vmatpush.bf16.msrb.mxu1 %v5822_v47  ;;  %1949 = vmatpush.bf16.msrb.mxu2 %v5634_v48  ;;  %v5879_v47 = vld [vmem:[%s8682_s30 + $0x268] sm:$0xf0]  ;;  %v5710_v48 = vor.u32 %v7164_v42, %v5709_v41  ;;  %v7191_v9 = vld [vmem:[%s8682_s30 + $0x1f4] sm:$0xf]  ;;  %v5662_v11 = vor.u32 %v7152_v8, %v5661_v6  ;;  %v5615_v17 = vld [vmem:[%s8682_s30 + $0x58] sm:$0xf0] }
 0x1a3   : > { %1963 = vmatpush.bf16.msrb.mxu3 %v5826_v52  ;;  %v5882_v50 = vor.u32 %v7203_v46, %v5879_v47  ;;  %v7212_v52 = vld [vmem:[%s8682_s30 + $0x294] sm:$0xf0]  ;;  %v5637_v19 = vld [vmem:[%s8682_s30 + $0x70] sm:$0xf]  ;;  %v7185_v21 = vld [vmem:[%s8682_s30 + $0x1c4] sm:$0xf] }
 0x1a4   : > { %v5902_v54 = vor.u32 %v7212_v52, %v5901_v51  ;;  %v5807_v23 = vld [vmem:[%s8682_s30 + $0x1d8] sm:$0xf0]  ;;  %v5829_v24 = vld [vmem:[%s8682_s30 + $0x1f0] sm:$0xf]  ;;  %v7194_v25 = vld [vmem:[%s8682_s30 + $0x204] sm:$0xf0] }
 0x1a5   : > { %1922 = vmatpush.bf16.msrb.mxu0 %v5606_v59  ;;  %v7158_v59 = vld [vmem:[%s8682_s30 + $0xe4] sm:$0xf0]  ;;  %v5591_v29 = vld [vmem:[%s8682_s30 + $0x28] sm:$0xf0]  ;;  %v5613_v30 = vld [vmem:[%s8682_s30 + $0x40] sm:$0xf] }
 0x1a6   : > { %1936 = vmatpush.bf16.msrb.mxu1 %v5798_v62  ;;  %1950 = vmatpush.bf16.msrb.mxu2 %v5610_v63  ;;  %v5686_v62 = vor.u32 %v7158_v59, %v5685_v57  ;;  %v5855_v63 = vld [vmem:[%s8682_s30 + $0x238] sm:$0xf0]  ;;  %v7179_v33 = vld [vmem:[%s8682_s30 + $0x194] sm:$0xf]  ;;  %v5783_v34 = vld [vmem:[%s8682_s30 + $0x1a8] sm:$0xf0] }
 0x1a7   : > { %1964 = vmatpush.bf16.msrb.mxu3 %v5802_v3  ;;  %v5858_v2 = vor.u32 %v7197_v60, %v5855_v63  ;;  %v5878_v3 = vor.u32 %v7206_v1, %v5877_v0  ;;  %v5786_v36 = vor.u32 %v7179_v33, %v5783_v34  ;;  %v5805_v37 = vld [vmem:[%s8682_s30 + $0x1c0] sm:$0xf]  ;;  %v7134_v41 = vld [vmem:[%s8682_s30 + $0x24] sm:$0xf0]  ;;  %v1366_v52 = vld [vmem:[%s8747_s9] sm:$0x3f] }
 0x1a8   : > { %v7182_v44 = vld [vmem:[%s8682_s30 + $0x1a4] sm:$0xf0]  ;;  %v1370_v55 = vperm.slane %v1366_v52, 2  ;;  %v1371_v59 = vperm.slane %v1366_v52, 3  ;;  %v1368_v60 = vperm.slane %v1366_v52, 0  ;;  %s9923_s9 = scalar_lea.vmem [#allocation13], %s8699_s29 }
 0x1a9   : > { %1923 = vmatpush.bf16.msrb.mxu0 %v5582_v10  ;;  %v5831_v10 = vld [vmem:[%s8682_s30 + $0x208] sm:$0xf0] }
 0x1aa   : > { %1937 = vmatpush.bf16.msrb.mxu1 %v5774_v13  ;;  %1951 = vmatpush.bf16.msrb.mxu2 %v5586_v14  ;;  %v5834_v12 = vor.u32 %v7191_v9, %v5831_v10  ;;  %v5853_v13 = vld [vmem:[%s8682_s30 + $0x220] sm:$0xf]  ;;  %v7200_v14 = vld [vmem:[%s8682_s30 + $0x234] sm:$0xf0] }
 0x1ab   : > { %1965 = vmatpush.bf16.msrb.mxu3 %v5778_v15  ;;  %v7137_v15 = vld [vmem:[%s8682_s30 + $0x44] sm:$0xf] }
 0x1ac   : > { %1924 = vmatmul.bf16.vlgmr.msrb.gmra.mxu0 %v8852_v58  ;;  %v5618_v18 = vor.u32 %v7137_v15, %v5615_v17 }
 0x1ad   : > { %1938 = vmatmul.bf16.vlgmr.msrb.gmra.mxu1 %v8856_v61  ;;  %1952 = vmatmul.bf16.vlgmr.msrb.gmra.mxu2 %v8852_v58 }
 0x1ae   : > { %2000 = vmatpush.bf16.msra.mxu2 %v5762_v16  ;;  %1966 = vmatmul.bf16.vlgmr.msrb.gmra.mxu3 %v8856_v61  ;;  %v5854_v16 = vor.u32 %v7200_v14, %v5853_v13 }
 0x1af   : > { %2014 = vmatpush.bf16.msra.mxu3 %v5954_v20  ;;  %1972 = vmatpush.bf16.msra.mxu0 %v5758_v26  ;;  %v7146_v20 = vld [vmem:[%s8682_s30 + $0x84] sm:$0xf0]  ;;  %v5810_v26 = vor.u32 %v7185_v21, %v5807_v23 }
 0x1b0   : > { %1986 = vmatpush.bf16.msra.mxu1 %v5950_v28  ;;  %v5638_v22 = vor.u32 %v7146_v20, %v5637_v19  ;;  %v7131_v28 = vld [vmem:[%s8682_s30 + $0x14] sm:$0xf] }
 0x1b1   : > { %v5594_v31 = vor.u32 %v7131_v28, %v5591_v29  ;;  %v1373_v28 = vperm.slane %v1366_v52, 5 }
 0x1b2   : > { %2001 = vmatpush.bf16.msra.mxu2 %v5738_v27  ;;  %v5830_v27 = vor.u32 %v7194_v25, %v5829_v24 }
 0x1b3   : > { %2015 = vmatpush.bf16.msra.mxu3 %v5930_v32  ;;  %1973 = vmatpush.bf16.msra.mxu0 %v5734_v38  ;;  %v7140_v32 = vld [vmem:[%s8682_s30 + $0x54] sm:$0xf0] }
 0x1b4   : > { %1987 = vmatpush.bf16.msra.mxu1 %v5926_v40  ;;  %v5614_v35 = vor.u32 %v7140_v32, %v5613_v30  ;;  %v7188_v38 = vld [vmem:[%s8682_s30 + $0x1d4] sm:$0xf0]  ;;  %v5589_v40 = vld [vmem:[%s8682_s30 + $0x10] sm:$0xf] }
 0x1b5   : > { %v5590_v42 = vor.u32 %v7134_v41, %v5589_v40 }
 0x1b6   : > { %2002 = vmatpush.bf16.msra.mxu2 %v5714_v39  ;;  %v5806_v39 = vor.u32 %v7188_v38, %v5805_v37 }
 0x1b7   : > { %2016 = vmatpush.bf16.msra.mxu3 %v5906_v43  ;;  %1974 = vmatpush.bf16.msra.mxu0 %v5710_v48  ;;  %v5781_v43 = vld [vmem:[%s8682_s30 + $0x190] sm:$0xf] }
 0x1b8   : > { %1988 = vmatpush.bf16.msra.mxu1 %v5902_v54  ;;  %v5782_v45 = vor.u32 %v7182_v44, %v5781_v43 }
 0x1ba   : > { %2003 = vmatpush.bf16.msra.mxu2 %v5690_v49 }
 0x1bb   : > { %2017 = vmatpush.bf16.msra.mxu3 %v5882_v50  ;;  %1975 = vmatpush.bf16.msra.mxu0 %v5686_v62  ;;  %v1369_v62 = vperm.slane %v1366_v52, 1 }
 0x1bc   : > { %1989 = vmatpush.bf16.msra.mxu1 %v5878_v3 }
 0x1be   : > { %2004 = vmatpush.bf16.msra.mxu2 %v5666_v56 }
 0x1bf   : > { %2018 = vmatpush.bf16.msra.mxu3 %v5858_v2  ;;  %1976 = vmatpush.bf16.msra.mxu0 %v5662_v11 }
 0x1c0   : > { %1990 = vmatpush.bf16.msra.mxu1 %v5854_v16 }
 0x1c2   : > { %2005 = vmatpush.bf16.msra.mxu2 %v5642_v7 }
 0x1c3   : > { %2019 = vmatpush.bf16.msra.mxu3 %v5834_v12  ;;  %1977 = vmatpush.bf16.msra.mxu0 %v5638_v22 }
 0x1c4   : > { %1991 = vmatpush.bf16.msra.mxu1 %v5830_v27  ;;  %v1372_v27 = vperm.slane %v1366_v52, 4 }
 0x1c6   : > { %2006 = vmatpush.bf16.msra.mxu2 %v5618_v18 }
 0x1c7   : > { %2020 = vmatpush.bf16.msra.mxu3 %v5810_v26  ;;  %1978 = vmatpush.bf16.msra.mxu0 %v5614_v35 }
 0x1c8   : > { %1992 = vmatpush.bf16.msra.mxu1 %v5806_v39 }
 0x1ca   : > { %2007 = vmatpush.bf16.msra.mxu2 %v5594_v31 }
 0x1cb   : > { %2021 = vmatpush.bf16.msra.mxu3 %v5786_v36  ;;  %1979 = vmatpush.bf16.msra.mxu0 %v5590_v42 }
 0x1cc   : > { %1993 = vmatpush.bf16.msra.mxu1 %v5782_v45 }
 0x1cd   : > { %2008 = vmatmul.bf16.vlgmr.msra.gmra.mxu2 %v8852_v58 }
 0x1ce   : > { %2022 = vmatmul.bf16.vlgmr.msra.gmra.mxu3 %v8856_v61  ;;  %1980 = vmatmul.bf16.vlgmr.msra.gmra.mxu0 %v8852_v58 }
 0x1cf   : > { %1994 = vmatmul.bf16.vlgmr.msra.gmra.mxu1 %v8856_v61 }
 0x209   : > { %v1869_v46 = vpop.f32.mrf.mxu0 }
 0x20a   : > { %v1870_v2 = vadd.f32 %v1869_v46, %v1368_v60 }
 0x20c   : > { %v1883_v47 = vpop.f32.mrf.mxu1 }
 0x20d   : > { %v1884_v7 = vadd.f32 %v1883_v47, %v1870_v2 }
 0x210   : > { %v1897_v48 = vpop.f32.mrf.mxu2 }
 0x211   : > { %v1871_v50 = vpop.f32.mrf.mxu0  ;;  %v1898_v3 = vadd.f32 %v1897_v48, %v1369_v62 }
 0x212   : > { %v1872_v14 = vadd.f32 %v1871_v50, %v1368_v60 }
 0x213   : > { %v1911_v49 = vpop.f32.mrf.mxu3 }
 0x214   : > { %v1885_v51 = vpop.f32.mrf.mxu1  ;;  %v1912_v8 = vadd.f32 %v1911_v49, %v1898_v3 }
 0x215   : > { %v1886_v22 = vadd.f32 %v1885_v51, %v1872_v14 }
 0x216   : > { %v2062_v13 = vpack.c.bf16 %v1912_v8, %v1884_v7 }
 0x218   : > { %v1899_v53 = vpop.f32.mrf.mxu2  ;;  %v2066_v21 = vrot.slane %v2062_v13, 4 }
 0x219   : > { %v1900_v15 = vadd.f32 %v1899_v53, %v1369_v62 }
 0x21b   : > { %v1913_v54 = vpop.f32.mrf.mxu3 }
 0x21c   : > { %v1914_v23 = vadd.f32 %v1913_v54, %v1900_v15  ;;  %v2028_v54 = vld [vmem:[#allocation5] sm:$0xff] }
 0x21e   : > { %v2063_v25 = vpack.c.bf16 %v1914_v23, %v1886_v22 }
 0x220   : > { %v2067_v26 = vrot.slane %v2063_v25, 4 }
 0x229   : > { %v1925_v56 = vpop.f32.mrf.mxu0 }
 0x22a   : > { %v1926_v57 = vadd.f32 %v1925_v56, %v1370_v55  ;;  %v1939_v63 = vpop.f32.mrf.mxu1 }
 0x22c   : > { %v1940_v58 = vadd.f32 %v1939_v63, %v1926_v57 }
 0x230   : > { %v1953_v0 = vpop.f32.mrf.mxu2 }
 0x231   : > { %v1954_v1 = vadd.f32 %v1953_v0, %v1371_v59  ;;  %v1967_v61 = vpop.f32.mrf.mxu3  ;;  %v1927_v5 = vpop.f32.mrf.mxu0 }
 0x232   : > { %v1928_v10 = vadd.f32 %v1927_v5, %v1370_v55  ;;  %v1941_v16 = vpop.f32.mrf.mxu1 }
 0x233   : > { %v1968_v4 = vadd.f32 %v1967_v61, %v1954_v1 }
 0x234   : > { %v1942_v18 = vadd.f32 %v1941_v16, %v1928_v10 }
 0x235   : > { %v2070_v6 = vpack.c.bf16 %v1968_v4, %v1940_v58 }
 0x237   : > { %v2074_v9 = vrot.slane %v2070_v6, 4  ;;  %2091 = vmatpush.bf16.xpose.msrb.mxu0 %v2070_v6 }
 0x238   : > { %v1955_v11 = vpop.f32.mrf.mxu2 }
 0x239   : > { %v1956_v12 = vadd.f32 %v1955_v11, %v1371_v59  ;;  %2117 = vmatpush.bf16.xpose.msrb.mxu2 %v2074_v9  ;;  %v1969_v17 = vpop.f32.mrf.mxu3 }
 0x23b   : > { %v1970_v19 = vadd.f32 %v1969_v17, %v1956_v12 }
 0x23d   : > { %v2071_v20 = vpack.c.bf16 %v1970_v19, %v1942_v18 }
 0x23e   : > { %2092 = vmatmul.bf16.vlgmr.msrb.gmra.mxu0 %v2062_v13 }
 0x23f   : > { %v2075_v24 = vrot.slane %v2071_v20, 4  ;;  %2104 = vmatpush.bf16.xpose.msrb.mxu1 %v2071_v20 }
 0x240   : > { %2118 = vmatmul.bf16.vlgmr.msrb.gmra.mxu2 %v2066_v21 }
 0x241   : > { %2130 = vmatpush.bf16.xpose.msrb.mxu3 %v2075_v24 }
 0x246   : > { %2105 = vmatmul.bf16.vlgmr.msrb.gmra.mxu1 %v2063_v25 }
 0x248   : > { %2131 = vmatmul.bf16.vlgmr.msrb.gmra.mxu3 %v2067_v26 }
 0x24b   : > { %v1981_v29 = vpop.f32.mrf.mxu0 }
 0x24c   : > { %v1982_v31 = vadd.f32 %v1981_v29, %v1372_v27  ;;  %v1995_v33 = vpop.f32.mrf.mxu1 }
 0x24e   : > { %v1996_v35 = vadd.f32 %v1995_v33, %v1982_v31  ;;  %v7240_v31 = vld [vmem:[%s8689_s14 + $0x74] sm:$0xf0] }
 0x250   : > { %v2009_v30 = vpop.f32.mrf.mxu2 }
 0x251   : > { %v2010_v32 = vadd.f32 %v2009_v30, %v1373_v28  ;;  %v2023_v34 = vpop.f32.mrf.mxu3  ;;  %v6081_v30 = vld [vmem:[%s8689_s14 + $0x70] sm:$0xf] }
 0x252   : > { %v6082_v33 = vor.u32 %v7240_v31, %v6081_v30  ;;  %v6001_v31 = vld [vmem:[%s8689_s14 + $0xd0] sm:$0xf] }
 0x253   : > { %v2024_v36 = vadd.f32 %v2023_v34, %v2010_v32  ;;  %v1983_v38 = vpop.f32.mrf.mxu0  ;;  %v7239_v32 = vld [vmem:[%s8689_s14 + $0x74] sm:$0xf]  ;;  %v6083_v34 = vld [vmem:[%s8689_s14 + $0x78] sm:$0xf0] }
 0x254   : > { %v1984_v40 = vadd.f32 %v1983_v38, %v1372_v27  ;;  %v1997_v42 = vpop.f32.mrf.mxu1  ;;  %v7237_v38 = vld [vmem:[%s8689_s14 + $0x64] sm:$0xf] }
 0x255   : > { %v2078_v37 = vpack.c.bf16 %v2024_v36, %v1996_v35  ;;  %v6073_v35 = vld [vmem:[%s8689_s14 + $0x60] sm:$0xf]  ;;  %v7238_v36 = vld [vmem:[%s8689_s14 + $0x64] sm:$0xf0] }
 0x256   : > { %v1998_v43 = vadd.f32 %v1997_v42, %v1984_v40 }
 0x257   : > { %v2082_v45 = vrot.slane %v2078_v37, 4  ;;  %v2198_v48 = vsel %vm2196_vm0, %v2078_v37, 0  ;;  %v6086_v37 = vor.u32 %v7239_v32, %v6083_v34  ;;  %v7252_v32 = vld [vmem:[%s8689_s14 + $0xd4] sm:$0xf0]  ;;  %v6003_v34 = vld [vmem:[%s8689_s14 + $0xd8] sm:$0xf0] }
 0x258   : > { %v2011_v39 = vpop.f32.mrf.mxu2  ;;  %2207 = vmatpush.bf16.msra.mxu0 %v2198_v48  ;;  %v7256_v48 = vld [vmem:[%s8689_s14 + $0xf4] sm:$0xf0] }
 0x259   : > { %v2012_v41 = vadd.f32 %v2011_v39, %v1373_v28  ;;  %v2025_v44 = vpop.f32.mrf.mxu3  ;;  %v2236_v50 = vsel %vm2196_vm0, %v2082_v45, 0  ;;  %v6075_v39 = vld [vmem:[%s8689_s14 + $0x68] sm:$0xf0]  ;;  %v7235_v45 = vld [vmem:[%s8689_s14 + $0x54] sm:$0xf] }
 0x25a   : > { %2245 = vmatpush.bf16.msra.mxu2 %v2236_v50  ;;  %v6078_v42 = vor.u32 %v7237_v38, %v6075_v39  ;;  %v7255_v50 = vld [vmem:[%s8689_s14 + $0xf4] sm:$0xf] }
 0x25b   : > { %v2026_v46 = vadd.f32 %v2025_v44, %v2012_v41  ;;  %v6074_v41 = vor.u32 %v7238_v36, %v6073_v35  ;;  %v7236_v44 = vld [vmem:[%s8689_s14 + $0x54] sm:$0xf0]  ;;  %v6033_v35 = vld [vmem:[%s8689_s14 + $0x10] sm:$0xf]  ;;  %v7227_v39 = vld [vmem:[%s8689_s14 + $0x14] sm:$0xf] }
 0x25c   : > { %v7228_v36 = vld [vmem:[%s8689_s14 + $0x14] sm:$0xf0] }
 0x25d   : > { %v2079_v47 = vpack.c.bf16 %v2026_v46, %v1998_v43  ;;  %v6065_v43 = vld [vmem:[%s8689_s14 + $0x50] sm:$0xf]  ;;  %v6067_v46 = vld [vmem:[%s8689_s14 + $0x58] sm:$0xf0]  ;;  %v6034_v38 = vor.u32 %v7228_v36, %v6033_v35 }
 0x25e   : > { %2460 = vmatpush.bf16.msrb.mxu2 %v6082_v33  ;;  %v7251_v33 = vld [vmem:[%s8689_s14 + $0xd4] sm:$0xf]  ;;  %v7668_v35 = vld [vmem:[#allocation26] sm:$0xff] }
 0x25f   : > { %v2217_v49 = vsel %vm2196_vm0, %v2079_v47, 0  ;;  %v2083_v51 = vrot.slane %v2079_v47, 4  ;;  %v6017_v47 = vld [vmem:[%s8689_s14 + $0xf0] sm:$0xf] }
 0x260   : > { %2226 = vmatpush.bf16.msra.mxu1 %v2217_v49  ;;  %v6018_v49 = vor.u32 %v7256_v48, %v6017_v47  ;;  %v6025_v48 = vld [vmem:[%s8689_s14] sm:$0xf] }
 0x261   : > { %v2255_v52 = vsel %vm2196_vm0, %v2083_v51, 0  ;;  %v6019_v51 = vld [vmem:[%s8689_s14 + $0xf8] sm:$0xf0] }
 0x262   : > { %2264 = vmatpush.bf16.msra.mxu3 %v2255_v52  ;;  %2461 = vmatpush.bf16.msrb.mxu2 %v6074_v41  ;;  %v6066_v52 = vor.u32 %v7236_v44, %v6065_v43  ;;  %v5993_v41 = vld [vmem:[%s8689_s14 + $0xc0] sm:$0xf]  ;;  %v7250_v43 = vld [vmem:[%s8689_s14 + $0xc4] sm:$0xf0]  ;;  %v7249_v44 = vld [vmem:[%s8689_s14 + $0xc4] sm:$0xf] }
 0x263   : > { %2352 = vmatpush.bf16.msrb.mxu0 %v6018_v49  ;;  %v7226_v49 = vld [vmem:[%s8689_s14 + $0x4] sm:$0xf0] }
 0x266   : > { %2474 = vmatpush.bf16.msrb.mxu3 %v6086_v37  ;;  %2462 = vmatpush.bf16.msrb.mxu2 %v6066_v52  ;;  %v6006_v37 = vor.u32 %v7251_v33, %v6003_v34  ;;  %v6027_v52 = vld [vmem:[%s8689_s14 + $0x8] sm:$0xf0] }
 0x26a   : > { %2475 = vmatpush.bf16.msrb.mxu3 %v6078_v42 }
 0x2bb   : > { %v2093_v53 = vpop.f32.mrf.mxu0 }
 0x2bc   : > { %v2136_v55 = vmul.f32 0.088388346, %v2093_v53  ;;  %v6057_v53 = vld [vmem:[%s8689_s14 + $0x40] sm:$0xf] }
 0x2be   : > { %v2140_v56 = vadd.f32 %v2136_v55, %v2028_v54  ;;  %v6022_v55 = vor.u32 %v7255_v50, %v6019_v51  ;;  %v7225_v50 = vld [vmem:[%s8689_s14 + $0x4] sm:$0xf]  ;;  %v6026_v51 = vor.u32 %v7226_v49, %v6025_v48  ;;  %v7670_v48 = vld [vmem:[#allocation26 + $0x10] sm:$0xff] }
 0x2c0   : > { %v2145_v57 = vsel %vm2144_vm1, %v2140_v56, -inf  ;;  %2366 = vmatpush.bf16.msrb.mxu1 %v6022_v55  ;;  %v7248_v55 = vld [vmem:[%s8689_s14 + $0xb4] sm:$0xf0] }
 0x2c1   : > { %2146 = vmax.xlane.f32.xlu0 %v2145_v57  ;;  %v6009_v57 = vld [vmem:[%s8689_s14 + $0xe0] sm:$0xf] }
 0x2c3   : > { %v2095_v59 = vpop.f32.mrf.mxu0  ;;  %v2106_v60 = vpop.f32.mrf.mxu1 }
 0x2c4   : > { %v2137_v62 = vmul.f32 0.088388346, %v2106_v60  ;;  %v2119_v63 = vpop.f32.mrf.mxu2  ;;  %v7254_v59 = vld [vmem:[%s8689_s14 + $0xe4] sm:$0xf0]  ;;  %v7253_v60 = vld [vmem:[%s8689_s14 + $0xe4] sm:$0xf] }
 0x2c5   : > { %v2138_v0 = vmul.f32 0.088388346, %v2119_v63  ;;  %v6059_v63 = vld [vmem:[%s8689_s14 + $0x48] sm:$0xf0] }
 0x2c6   : > { %v2141_v58 = vadd.f32 %v2137_v62, %v2028_v54  ;;  %v7233_v62 = vld [vmem:[%s8689_s14 + $0x44] sm:$0xf] }
 0x2c7   : > { %v2142_v1 = vadd.f32 %v2138_v0, %v2028_v54  ;;  %v6010_v0 = vor.u32 %v7254_v59, %v6009_v57  ;;  %v5987_v59 = vld [vmem:[%s8689_s14 + $0xb8] sm:$0xf0] }
 0x2c8   : > { %v2148_v61 = vsel %vm2144_vm1, %v2141_v58, -inf }
 0x2c9   : > { %2149 = vmax.xlane.f32.xlu0 %v2148_v61  ;;  %v2151_v2 = vsel %vm2144_vm1, %v2142_v1, -inf  ;;  %2353 = vmatpush.bf16.msrb.mxu0 %v6010_v0  ;;  %v7245_v0 = vld [vmem:[%s8689_s14 + $0xa4] sm:$0xf] }
 0x2ca   : > { %2152 = vmax.xlane.f32.xlu1 %v2151_v2 }
 0x2cb   : > { %v2108_v3 = vpop.f32.mrf.mxu1  ;;  %v2132_v4 = vpop.f32.mrf.mxu3 }
 0x2cc   : > { %v2121_v5 = vpop.f32.mrf.mxu2  ;;  %v2139_v6 = vmul.f32 0.088388346, %v2132_v4 }
 0x2ce   : > { %v2143_v7 = vadd.f32 %v2139_v6, %v2028_v54  ;;  %v7234_v54 = vld [vmem:[%s8689_s14 + $0x44] sm:$0xf0]  ;;  %v6062_v6 = vor.u32 %v7233_v62, %v6059_v63  ;;  %v5977_v62 = vld [vmem:[%s8689_s14 + $0xa0] sm:$0xf] }
 0x2cf   : > { %v6058_v4 = vor.u32 %v7234_v54, %v6057_v53  ;;  %v6030_v53 = vor.u32 %v7225_v50, %v6027_v52  ;;  %v5985_v54 = vld [vmem:[%s8689_s14 + $0xb0] sm:$0xf]  ;;  %v7246_v63 = vld [vmem:[%s8689_s14 + $0xa4] sm:$0xf0]  ;;  %v7671_v50 = vld [vmem:[#allocation26 + $0x18] sm:$0xff] }
 0x2d0   : > { %v2154_v8 = vsel %vm2144_vm1, %v2143_v7, -inf  ;;  %v5986_v57 = vor.u32 %v7248_v55, %v5985_v54 }
 0x2d1   : > { %2463 = vmatpush.bf16.msrb.mxu2 %v6058_v4  ;;  %v7243_v4 = vld [vmem:[%s8689_s14 + $0x94] sm:$0xf] }
 0x2d2   : > { %2155 = vmax.xlane.f32.xlu1 %v2154_v8  ;;  %v7232_v8 = vld [vmem:[%s8689_s14 + $0x34] sm:$0xf0] }
 0x2d3   : > { %v2134_v9 = vpop.f32.mrf.mxu3 }
 0x334   : > { %v2147_v10 = vpop.xlane.xlu0 %2146 }
 0x335   : > { %v2157_v11 = vsub.f32 %v2140_v56, %v2147_v10  ;;  %v6070_v56 = vor.u32 %v7235_v45, %v6067_v46  ;;  %v7231_v10 = vld [vmem:[%s8689_s14 + $0x34] sm:$0xf]  ;;  %v5995_v45 = vld [vmem:[%s8689_s14 + $0xc8] sm:$0xf0]  ;;  %v5994_v46 = vor.u32 %v7250_v43, %v5993_v41 }
 0x336   : > { %v5998_v47 = vor.u32 %v7249_v44, %v5995_v45 }
 0x337   : > { %v2161_v12 = vmul.f32 1.442695, %v2157_v11  ;;  %2476 = vmatpush.bf16.msrb.mxu3 %v6070_v56  ;;  %v6051_v11 = vld [vmem:[%s8689_s14 + $0x38] sm:$0xf0]  ;;  %v7247_v56 = vld [vmem:[%s8689_s14 + $0xb4] sm:$0xf] }
 0x339   : > { %7622 = vpow2.f32 %v2161_v12 }
 0x33b   : > { %2477 = vmatpush.bf16.msrb.mxu3 %v6062_v6  ;;  %v5971_v6 = vld [vmem:[%s8689_s14 + $0x98] sm:$0xf0] }
 0x33c   : > { %v2150_v13 = vpop.xlane.xlu0 %2149 }
 0x33d   : > { %v2158_v14 = vsub.f32 %v2141_v58, %v2150_v13  ;;  %v2153_v15 = vpop.xlane.xlu1 %2152  ;;  %v6011_v58 = vld [vmem:[%s8689_s14 + $0xe8] sm:$0xf0]  ;;  %v6054_v13 = vor.u32 %v7231_v10, %v6051_v11  ;;  %v7241_v10 = vld [vmem:[%s8689_s14 + $0x84] sm:$0xf] }
 0x33e   : > { %v2159_v16 = vsub.f32 %v2142_v1, %v2153_v15  ;;  %v6014_v61 = vor.u32 %v7253_v60, %v6011_v58  ;;  %v5990_v60 = vor.u32 %v7247_v56, %v5987_v59  ;;  %v5978_v58 = vor.u32 %v7246_v63, %v5977_v62  ;;  %v7272_v59 = vld [vmem:[%s8692_s1 + $0x74] sm:$0xf0] }
 0x33f   : > { %v8987_v17 = vpop.eup %7622  ;;  %v2163_v18 = vmul.f32 1.442695, %v2158_v14  ;;  %2478 = vmatpush.bf16.msrb.mxu3 %v6054_v13  ;;  %v7288_v63 = vld [vmem:[%s8692_s1 + $0xf4] sm:$0xf0] }
 0x340   : > { %v2165_v19 = vmul.f32 1.442695, %v2159_v16  ;;  %v2169_v20 = vsel %vm2144_vm1, %v8987_v17, 0.0  ;;  %2367 = vmatpush.bf16.msrb.mxu1 %v6014_v61 }
 0x341   : > { %7624 = vpow2.f32 %v2163_v18  ;;  %2170 = vadd.xlane.f32.xlu2 %v2169_v20 }
 0x342   : > { %7626 = vpow2.f32 %v2165_v19 }
 0x344   : > { %2368 = vmatpush.bf16.msrb.mxu1 %v6006_v37  ;;  %v7669_v37 = vld [vmem:[#allocation26 + $0x8] sm:$0xff] }
 0x345   : > { %v2156_v21 = vpop.xlane.xlu1 %2155 }
 0x346   : > { %v2160_v22 = vsub.f32 %v2143_v7, %v2156_v21  ;;  %v6049_v7 = vld [vmem:[%s8689_s14 + $0x30] sm:$0xf] }
 0x347   : > { %v8991_v23 = vpop.eup %7624  ;;  %v6050_v12 = vor.u32 %v7232_v8, %v6049_v7  ;;  %v5974_v7 = vor.u32 %v7243_v4, %v5971_v6  ;;  %v5961_v8 = vld [vmem:[%s8689_s14 + $0x80] sm:$0xf]  ;;  %v7270_v6 = vld [vmem:[%s8692_s1 + $0x64] sm:$0xf0] }
 0x348   : > { %v8993_v24 = vpop.eup %7626  ;;  %v2167_v25 = vmul.f32 1.442695, %v2160_v22  ;;  %v2172_v26 = vsel %vm2144_vm1, %v8991_v23, 0.0  ;;  %2369 = vmatpush.bf16.msrb.mxu1 %v5998_v47  ;;  %v6137_v4 = vld [vmem:[%s8692_s1 + $0x60] sm:$0xf] }
 0x349   : > { %2173 = vadd.xlane.f32.xlu2 %v2172_v26  ;;  %v2175_v27 = vsel %vm2144_vm1, %v8993_v24, 0.0  ;;  %2464 = vmatpush.bf16.msrb.mxu2 %v6050_v12  ;;  %v7229_v26 = vld [vmem:[%s8689_s14 + $0x24] sm:$0xf]  ;;  %v5963_v12 = vld [vmem:[%s8689_s14 + $0x88] sm:$0xf0] }
 0x34a   : > { %7628 = vpow2.f32 %v2167_v25  ;;  %2176 = vadd.xlane.f32.xlu0 %v2175_v27  ;;  %v7230_v25 = vld [vmem:[%s8689_s14 + $0x24] sm:$0xf0]  ;;  %v5966_v13 = vor.u32 %v7241_v10, %v5963_v12  ;;  %v6139_v12 = vld [vmem:[%s8692_s1 + $0x68] sm:$0xf0] }
 0x34c   : > { %2370 = vmatpush.bf16.msrb.mxu1 %v5990_v60  ;;  %v6209_v60 = vld [vmem:[%s8692_s1 + $0xf0] sm:$0xf] }
 0x350   : > { %v8999_v28 = vpop.eup %7628 }
 0x351   : > { %v2178_v29 = vsel %vm2144_vm1, %v8999_v28, 0.0 }
 0x352   : > { %2179 = vadd.xlane.f32.xlu1 %v2178_v29  ;;  %v6043_v29 = vld [vmem:[%s8689_s14 + $0x28] sm:$0xf0] }
 0x353   : > { %v6046_v30 = vor.u32 %v7229_v26, %v6043_v29 }
 0x355   : > { %2479 = vmatpush.bf16.msrb.mxu3 %v6046_v30 }
 0x3b4   : > { %v2171_v40 = vpop.xlane.xlu2 %2170 }
 0x3b5   : > { %7630 = vrcp.f32 %v2171_v40  ;;  %v6035_v40 = vld [vmem:[%s8689_s14 + $0x18] sm:$0xf0] }
 0x3b6   : > { %v6038_v42 = vor.u32 %v7227_v39, %v6035_v40 }
 0x3b8   : > { %2480 = vmatpush.bf16.msrb.mxu3 %v6038_v42 }
 0x3bb   : > { %v7631_v1 = vpop.eup %7630 }
 0x3bc   : > { %v2185_v2 = vmul.f32 %v7631_v1, %v8987_v17  ;;  %v2174_v3 = vpop.xlane.xlu2 %2173  ;;  %2481 = vmatpush.bf16.msrb.mxu3 %v6030_v53  ;;  %v5979_v1 = vld [vmem:[%s8689_s14 + $0xa8] sm:$0xf0]  ;;  %v8211_v53 = vmov 256.0  }
 0x3bd   : > { %7632 = vrcp.f32 %v2174_v3  ;;  %v2177_v5 = vpop.xlane.xlu0 %2176  ;;  %v5982_v61 = vor.u32 %v7245_v0, %v5979_v1  ;;  %v7244_v3 = vld [vmem:[%s8689_s14 + $0x94] sm:$0xf0]  ;;  %v7271_v0 = vld [vmem:[%s8692_s1 + $0x74] sm:$0xf]  ;;  %v6210_v1 = vor.u32 %v7288_v63, %v6209_v60 }
 0x3be   : > { %v2189_v9 = vpack.c.bf16 %v2185_v2, %v2185_v2  ;;  %7634 = vrcp.f32 %v2177_v5  ;;  %v5969_v2 = vld [vmem:[%s8689_s14 + $0x90] sm:$0xf]  ;;  %v7264_v60 = vld [vmem:[%s8692_s1 + $0x34] sm:$0xf0] }
 0x3bf   : > { %2371 = vmatpush.bf16.msrb.mxu1 %v5982_v61  ;;  %v5970_v5 = vor.u32 %v7244_v3, %v5969_v2  ;;  %v7287_v2 = vld [vmem:[%s8692_s1 + $0xf4] sm:$0xf]  ;;  %v6211_v3 = vld [vmem:[%s8692_s1 + $0xf8] sm:$0xf0] }
 0x3c0   : > { %5955 = vmatmul.msk.bf16.vlgmr.msra.gmra.mxu0 %vm2144_vm1, %v2189_v9  ;;  %v7242_v9 = vld [vmem:[%s8689_s14 + $0x84] sm:$0xf0] }
 0x3c1   : > { %v5962_v11 = vor.u32 %v7242_v9, %v5961_v8  ;;  %v7286_v8 = vld [vmem:[%s8692_s1 + $0xe4] sm:$0xf0]  ;;  %v6138_v9 = vor.u32 %v7270_v6, %v6137_v4  ;;  %v6179_v4 = vld [vmem:[%s8692_s1 + $0xb8] sm:$0xf0]  ;;  %v6105_v6 = vld [vmem:[%s8692_s1 + $0x20] sm:$0xf] }
 0x3c3   : > { %v7633_v14 = vpop.eup %7632  ;;  %2372 = vmatpush.bf16.msrb.mxu1 %v5974_v7  ;;  %v6201_v7 = vld [vmem:[%s8692_s1 + $0xe0] sm:$0xf] }
 0x3c4   : > { %v7635_v15 = vpop.eup %7634  ;;  %v2186_v16 = vmul.f32 %v7633_v14, %v8991_v23  ;;  %v6202_v10 = vor.u32 %v7286_v8, %v6201_v7  ;;  %v7262_v7 = vld [vmem:[%s8692_s1 + $0x24] sm:$0xf0]  ;;  %v6169_v8 = vld [vmem:[%s8692_s1 + $0xa0] sm:$0xf] }
 0x3c5   : > { %v2187_v17 = vmul.f32 %v7635_v15, %v8993_v24  ;;  %v2180_v18 = vpop.xlane.xlu1 %2179  ;;  %v6041_v24 = vld [vmem:[%s8689_s14 + $0x20] sm:$0xf] }
 0x3c6   : > { %v2190_v19 = vpack.c.bf16 %v2186_v16, %v2186_v16  ;;  %7636 = vrcp.f32 %v2180_v18  ;;  %v6042_v27 = vor.u32 %v7230_v25, %v6041_v24  ;;  %v2061_v24 = vld [vmem:[%s8742_s0] sm:$0x3] }
 0x3c7   : > { %v2191_v20 = vpack.c.bf16 %v2187_v17, %v2187_v17  ;;  %2373 = vmatpush.bf16.msrb.mxu1 %v5966_v13  ;;  %v2490_v29 = vperm.slane %v2061_v24, 1  ;;  %7638 = vrcp.f32 %v8211_v53  ;;  %v7285_v13 = vld [vmem:[%s8692_s1 + $0xe4] sm:$0xf] }
 0x3c8   : > { %5956 = vmatmul.msk.bf16.vlgmr.msra.gmra.mxu1 %vm2144_vm1, %v2190_v19  ;;  %2465 = vmatpush.bf16.msrb.mxu2 %v6042_v27  ;;  %v2489_v27 = vperm.slane %v2061_v24, 0 }
 0x3c9   : > { %5957 = vmatmul.msk.bf16.vlgmr.msra.gmra.mxu2 %vm2144_vm1, %v2191_v20 }
 0x3cb   : > { %2794 = vmatpush.bf16.msra.mxu1 %v6210_v1  ;;  %v6115_v1 = vld [vmem:[%s8692_s1 + $0x38] sm:$0xf0] }
 0x3cc   : > { %v7637_v21 = vpop.eup %7636  ;;  %2466 = vmatpush.bf16.msrb.mxu2 %v6034_v38 }
 0x3cd   : > { %v2188_v22 = vmul.f32 %v7637_v21, %v8999_v28  ;;  %v6002_v28 = vor.u32 %v7252_v32, %v6001_v31  ;;  %v7639_v54 = vpop.eup %7638 }
 0x3ce   : > { %v2508_v55 = vmul.f32 256.0, %v7639_v54  ;;  %vm2512_vm2 = vweird.f32 %v7639_v54 }
 0x3cf   : > { %v2192_v23 = vpack.c.bf16 %v2188_v22, %v2188_v22  ;;  %2354 = vmatpush.bf16.msrb.mxu0 %v6002_v28  ;;  %2795 = vmatpush.bf16.msra.mxu1 %v6202_v10  ;;  %v7278_v10 = vld [vmem:[%s8692_s1 + $0xa4] sm:$0xf0] }
 0x3d0   : > { %2467 = vmatpush.bf16.msrb.mxu2 %v6026_v51  ;;  %v2509_v56 = vsub.f32 1.0, %v2508_v55  ;;  %v7281_v55 = vld [vmem:[%s8692_s1 + $0xc4] sm:$0xf] }
 0x3d1   : > { %5958 = vmatmul.msk.bf16.vlgmr.msra.gmra.mxu3 %vm2144_vm1, %v2192_v23 }
 0x3d3   : > { %2355 = vmatpush.bf16.msrb.mxu0 %v5994_v46 }
 0x3d7   : > { %2356 = vmatpush.bf16.msrb.mxu0 %v5986_v57  ;;  %v6145_v57 = vld [vmem:[%s8692_s1 + $0x70] sm:$0xf] }
 0x3d8   : > { %v6146_v62 = vor.u32 %v7272_v59, %v6145_v57  ;;  %v6113_v59 = vld [vmem:[%s8692_s1 + $0x30] sm:$0xf] }
 0x3d9   : > { %v6114_v63 = vor.u32 %v7264_v60, %v6113_v59  ;;  %v6313_v59 = vld [vmem:[%s8704_s22 + $0xc0] sm:$0xf]  ;;  %v7315_v60 = vld [vmem:[%s8704_s22 + $0xcc] sm:$0xf0] }
 0x3db   : > { %2357 = vmatpush.bf16.msrb.mxu0 %v5978_v58  ;;  %v6147_v58 = vld [vmem:[%s8692_s1 + $0x78] sm:$0xf0] }
 0x3dc   : > { %v6150_v61 = vor.u32 %v7271_v0, %v6147_v58  ;;  %v7280_v0 = vld [vmem:[%s8692_s1 + $0xb4] sm:$0xf0]  ;;  %v7263_v58 = vld [vmem:[%s8692_s1 + $0x34] sm:$0xf] }
 0x3de   : > { %2808 = vmatpush.bf16.msra.mxu2 %v6150_v61 }
 0x3df   : > { %2358 = vmatpush.bf16.msrb.mxu0 %v5970_v5  ;;  %v6214_v5 = vor.u32 %v7287_v2, %v6211_v3  ;;  %v6118_v2 = vor.u32 %v7263_v58, %v6115_v1  ;;  %v7279_v3 = vld [vmem:[%s8692_s1 + $0xb4] sm:$0xf]  ;;  %v7313_v1 = vld [vmem:[%s8704_s22 + $0xc4] sm:$0xf] }
 0x3e0   : > { %v7347_v58 = vld [vmem:[%s8704_s22 + $0x1cc] sm:$0xf0] }
 0x3e1   : > { %2822 = vmatpush.bf16.msra.mxu3 %v6214_v5  ;;  %v6182_v5 = vor.u32 %v7279_v3, %v6179_v4  ;;  %v7345_v3 = vld [vmem:[%s8704_s22 + $0x1c4] sm:$0xf]  ;;  %v6443_v4 = vld [vmem:[%s8704_s22 + $0x1d0] sm:$0xf0] }
 0x3e3   : > { %2359 = vmatpush.bf16.msrb.mxu0 %v5962_v11  ;;  %v7269_v11 = vld [vmem:[%s8692_s1 + $0x64] sm:$0xf] }
 0x3e7   : > { %2780 = vmatpush.bf16.msra.mxu0 %v6146_v62  ;;  %v6177_v62 = vld [vmem:[%s8692_s1 + $0xb0] sm:$0xf] }
 0x3e8   : > { %v6178_v61 = vor.u32 %v7280_v0, %v6177_v62  ;;  %v6441_v0 = vld [vmem:[%s8704_s22 + $0x1c0] sm:$0xf] }
 0x3eb   : > { %2781 = vmatpush.bf16.msra.mxu0 %v6138_v9  ;;  %v6106_v9 = vor.u32 %v7262_v7, %v6105_v6  ;;  %v6446_v6 = vor.u32 %v7345_v3, %v6443_v4  ;;  %v6297_v7 = vld [vmem:[%s8704_s22 + $0xa0] sm:$0xf] }
 0x43d   : > { %v2209_v14 = vpop.f32.mrf.mxu0 }
 0x445   : > { %v2211_v15 = vpop.f32.mrf.mxu0  ;;  %v2228_v16 = vpop.f32.mrf.mxu1 }
 0x446   : > { %v2270_v17 = vpack.c.bf16 %v2228_v16, %v2209_v14  ;;  %v2510_v14 = vmul.f32 %v7639_v54, %v2509_v56  ;;  %v6142_v15 = vor.u32 %v7269_v11, %v6139_v12  ;;  %v6203_v16 = vld [vmem:[%s8692_s1 + $0xe8] sm:$0xf0]  ;;  %v7261_v11 = vld [vmem:[%s8692_s1 + $0x24] sm:$0xf] }
 0x447   : > { %v6187_v56 = vld [vmem:[%s8692_s1 + $0xc8] sm:$0xf0] }
 0x448   : > { %2468 = vmatmul.bf16.vlgmr.msrb.gmra.mxu2 %v2270_v17  ;;  %2482 = vmatmul.bf16.vlgmr.msrb.gmra.mxu3 %v2270_v17  ;;  %v6206_v17 = vor.u32 %v7285_v13, %v6203_v16  ;;  %v6190_v57 = vor.u32 %v7281_v55, %v6187_v56  ;;  %v6107_v12 = vld [vmem:[%s8692_s1 + $0x28] sm:$0xf0]  ;;  %v6170_v13 = vor.u32 %v7278_v10, %v6169_v8  ;;  %v7349_v55 = vld [vmem:[%s8704_s22 + $0x1e4] sm:$0xf]  ;;  %v7311_v8 = vld [vmem:[%s8704_s22 + $0xac] sm:$0xf0] }
 0x449   : > { %2809 = vmatpush.bf16.msra.mxu2 %v6142_v15  ;;  %v7277_v15 = vld [vmem:[%s8692_s1 + $0xa4] sm:$0xf]  ;;  %v6171_v16 = vld [vmem:[%s8692_s1 + $0xa8] sm:$0xf0]  ;;  %v6298_v10 = vor.u32 %v7311_v8, %v6297_v7  ;;  %v7327_v7 = vld [vmem:[%s8704_s22 + $0x12c] sm:$0xf0] }
 0x44a   : > { %2823 = vmatpush.bf16.msra.mxu3 %v6206_v17  ;;  %v6174_v17 = vor.u32 %v7277_v15, %v6171_v16  ;;  %v7341_v16 = vld [vmem:[%s8704_s22 + $0x1a4] sm:$0xf] }
 0x44b   : > { %v7293_v8 = vld [vmem:[%s8704_s22 + $0x24] sm:$0xf] }
 0x44c   : > { %v2247_v18 = vpop.f32.mrf.mxu2 }
 0x44d   : > { %v2230_v19 = vpop.f32.mrf.mxu1 }
 0x454   : > { %v2249_v20 = vpop.f32.mrf.mxu2  ;;  %v2266_v21 = vpop.f32.mrf.mxu3 }
 0x455   : > { %v2271_v22 = vpack.c.bf16 %v2266_v21, %v2247_v18  ;;  %v2511_v18 = vadd.f32 %v7639_v54, %v2510_v14  ;;  %v6110_v14 = vor.u32 %v7261_v11, %v6107_v12  ;;  %v7343_v11 = vld [vmem:[%s8704_s22 + $0x1ac] sm:$0xf0]  ;;  %v7309_v12 = vld [vmem:[%s8704_s22 + $0xa4] sm:$0xf] }
 0x457   : > { %2360 = vmatmul.bf16.vlgmr.msrb.gmra.mxu0 %v2271_v22  ;;  %2374 = vmatmul.bf16.vlgmr.msrb.gmra.mxu1 %v2271_v22  ;;  %v9092_v19 = vsel %vm2512_vm2, %v7639_v54, %v2511_v18  ;;  %v6097_v18 = vld [vmem:[%s8692_s1 + $0x10] sm:$0xf] }
 0x45c   : > { %v2268_v23 = vpop.f32.mrf.mxu3 }
 0x4cb   : > { %v2469_v25 = vpop.f32.mrf.mxu2  ;;  %v2483_v26 = vpop.f32.mrf.mxu3 }
 0x4d3   : > { %v2471_v39 = vpop.f32.mrf.mxu2  ;;  %v2485_v40 = vpop.f32.mrf.mxu3 }
 0x4d4   : > { %v2361_v30 = vpop.f32.mrf.mxu0  ;;  %v2375_v31 = vpop.f32.mrf.mxu1 }
 0x4d5   : > { %v2470_v32 = vadd.f32 %v2469_v25, %v2361_v30  ;;  %v2484_v33 = vadd.f32 %v2483_v26, %v2375_v31 }
 0x4d7   : > { %v2493_v28 = vadd.f32 %v2489_v27, %v2470_v32  ;;  %v2494_v34 = vadd.f32 %v2490_v29, %v2484_v33 }
 0x4d9   : > { %v2497_v36 = vadd.f32 %v7668_v35, %v2493_v28  ;;  %v2498_v38 = vadd.f32 %v7669_v37, %v2494_v34  ;;  %v6129_v34 = vld [vmem:[%s8692_s1 + $0x50] sm:$0xf]  ;;  %v7268_v35 = vld [vmem:[%s8692_s1 + $0x54] sm:$0xf0] }
 0x4da   : > { %v6130_v37 = vor.u32 %v7268_v35, %v6129_v34  ;;  %v6089_v35 = vld [vmem:[%s8692_s1] sm:$0xf] }
 0x4db   : > { %v2501_v41 = vadd.f32 %v2498_v38, %v2497_v36 }
 0x4dc   : > { %v2363_v42 = vpop.f32.mrf.mxu0  ;;  %v2377_v43 = vpop.f32.mrf.mxu1  ;;  %2782 = vmatpush.bf16.msra.mxu0 %v6130_v37  ;;  %v6153_v37 = vld [vmem:[%s8692_s1 + $0x80] sm:$0xf] }
 0x4dd   : > { %v2472_v44 = vadd.f32 %v2471_v39, %v2363_v42  ;;  %v2486_v45 = vadd.f32 %v2485_v40, %v2377_v43  ;;  %2502 = vadd.xlane.f32.xlu2 %v2501_v41  ;;  %v7267_v39 = vld [vmem:[%s8692_s1 + $0x54] sm:$0xf]  ;;  %v6131_v40 = vld [vmem:[%s8692_s1 + $0x58] sm:$0xf0] }
 0x4de   : > { %v6134_v42 = vor.u32 %v7267_v39, %v6131_v40  ;;  %v7283_v43 = vld [vmem:[%s8692_s1 + $0xd4] sm:$0xf]  ;;  %v7274_v39 = vld [vmem:[%s8692_s1 + $0x84] sm:$0xf0]  ;;  %v7257_v40 = vld [vmem:[%s8692_s1 + $0x4] sm:$0xf] }
 0x4df   : > { %v2495_v46 = vadd.f32 %v2489_v27, %v2472_v44  ;;  %v2496_v47 = vadd.f32 %v2490_v29, %v2486_v45  ;;  %v6195_v44 = vld [vmem:[%s8692_s1 + $0xd8] sm:$0xf0] }
 0x4e0   : > { %v6198_v45 = vor.u32 %v7283_v43, %v6195_v44  ;;  %2810 = vmatpush.bf16.msra.mxu2 %v6134_v42  ;;  %v6154_v42 = vor.u32 %v7274_v39, %v6153_v37  ;;  %v7273_v44 = vld [vmem:[%s8692_s1 + $0x84] sm:$0xf] }
 0x4e1   : > { %v2499_v49 = vadd.f32 %v7670_v48, %v2495_v46  ;;  %v2500_v51 = vadd.f32 %v7671_v50, %v2496_v47  ;;  %v6121_v46 = vld [vmem:[%s8692_s1 + $0x40] sm:$0xf]  ;;  %v7266_v47 = vld [vmem:[%s8692_s1 + $0x44] sm:$0xf0]  ;;  %v6265_v39 = vld [vmem:[%s8704_s22 + $0x60] sm:$0xf] }
 0x4e2   : > { %v6185_v48 = vld [vmem:[%s8692_s1 + $0xc0] sm:$0xf]  ;;  %2824 = vmatpush.bf16.msra.mxu3 %v6198_v45  ;;  %v7282_v50 = vld [vmem:[%s8692_s1 + $0xc4] sm:$0xf0]  ;;  %v6155_v45 = vld [vmem:[%s8692_s1 + $0x88] sm:$0xf0] }
 0x4e3   : > { %v2504_v52 = vadd.f32 %v2500_v51, %v2499_v49  ;;  %v6186_v53 = vor.u32 %v7282_v50, %v6185_v48  ;;  %v7319_v48 = vld [vmem:[%s8704_s22 + $0xec] sm:$0xf0] }
 0x4e4   : > { %v7351_v50 = vld [vmem:[%s8704_s22 + $0x1ec] sm:$0xf0] }
 0x4e5   : > { %2505 = vadd.xlane.f32.xlu0 %v2504_v52  ;;  %v6123_v52 = vld [vmem:[%s8692_s1 + $0x48] sm:$0xf0] }
 0x4e6   : > { %2825 = vmatpush.bf16.msra.mxu3 %v6190_v57  ;;  %v6459_v57 = vld [vmem:[%s8704_s22 + $0x1f0] sm:$0xf0] }
 0x4e7   : > { %v6462_v62 = vor.u32 %v7349_v55, %v6459_v57  ;;  %v6377_v55 = vld [vmem:[%s8704_s22 + $0x140] sm:$0xf] }
 0x4ea   : > { %2826 = vmatpush.bf16.msra.mxu3 %v6182_v5 }
 0x4ee   : > { %2827 = vmatpush.bf16.msra.mxu3 %v6174_v17  ;;  %v6427_v17 = vld [vmem:[%s8704_s22 + $0x1b0] sm:$0xf0] }
 0x550   : > { %v2503_v20 = vpop.xlane.xlu2 %2502 }
 0x551   : > { %v2514_v21 = vmul.f32 %v9092_v19, %v2503_v20  ;;  %v7260_v20 = vld [vmem:[%s8692_s1 + $0x14] sm:$0xf0] }
 0x553   : > { %v9095_v22 = vsub.f32 %v2497_v36, %v2514_v21  ;;  %v9097_v23 = vsub.f32 %v2498_v38, %v2514_v21  ;;  %v6193_v36 = vld [vmem:[%s8692_s1 + $0xd0] sm:$0xf]  ;;  %v7284_v38 = vld [vmem:[%s8692_s1 + $0xd4] sm:$0xf0] }
 0x554   : > { %v6194_v41 = vor.u32 %v7284_v38, %v6193_v36  ;;  %v6161_v21 = vld [vmem:[%s8692_s1 + $0x90] sm:$0xf]  ;;  %v7258_v36 = vld [vmem:[%s8692_s1 + $0x4] sm:$0xf0] }
 0x555   : > { %v2520_v24 = vmul.f32 %v9095_v22, %v9095_v22  ;;  %v2521_v25 = vmul.f32 %v9097_v23, %v9097_v23  ;;  %v6090_v38 = vor.u32 %v7258_v36, %v6089_v35  ;;  %v6411_v35 = vld [vmem:[%s8704_s22 + $0x190] sm:$0xf0] }
 0x556   : > { %2796 = vmatpush.bf16.msra.mxu1 %v6194_v41  ;;  %v6091_v41 = vld [vmem:[%s8692_s1 + $0x8] sm:$0xf0] }
 0x557   : > { %v2524_v26 = vadd.f32 %v2521_v25, %v2520_v24  ;;  %v6098_v24 = vor.u32 %v7260_v20, %v6097_v18  ;;  %v7276_v25 = vld [vmem:[%s8692_s1 + $0x94] sm:$0xf0]  ;;  %v6094_v43 = vor.u32 %v7257_v40, %v6091_v41  ;;  %v6281_v18 = vld [vmem:[%s8704_s22 + $0x80] sm:$0xf]  ;;  %v7303_v40 = vld [vmem:[%s8704_s22 + $0x6c] sm:$0xf0] }
 0x558   : > { %v2506_v27 = vpop.xlane.xlu0 %2505  ;;  %v6393_v41 = vld [vmem:[%s8704_s22 + $0x160] sm:$0xf] }
 0x559   : > { %v2515_v29 = vmul.f32 %v9092_v19, %v2506_v27  ;;  %2525 = vadd.xlane.f32.xlu1 %v2524_v26  ;;  %v7259_v26 = vld [vmem:[%s8692_s1 + $0x14] sm:$0xf]  ;;  %v6099_v27 = vld [vmem:[%s8692_s1 + $0x18] sm:$0xf0] }
 0x55a   : > { %2797 = vmatpush.bf16.msra.mxu1 %v6186_v53  ;;  %v7317_v53 = vld [vmem:[%s8704_s22 + $0xe4] sm:$0xf] }
 0x55b   : > { %v9104_v30 = vsub.f32 %v2499_v49, %v2515_v29  ;;  %v9106_v31 = vsub.f32 %v2500_v51, %v2515_v29  ;;  %v6122_v49 = vor.u32 %v7266_v47, %v6121_v46  ;;  %v7265_v51 = vld [vmem:[%s8692_s1 + $0x44] sm:$0xf]  ;;  %v6162_v29 = vor.u32 %v7276_v25, %v6161_v21 }
 0x55c   : > { %v6126_v54 = vor.u32 %v7265_v51, %v6123_v52  ;;  %v6329_v46 = vld [vmem:[%s8704_s22 + $0xe0] sm:$0xf]  ;;  %v6158_v47 = vor.u32 %v7273_v44, %v6155_v45  ;;  %v6430_v21 = vor.u32 %v7341_v16, %v6427_v17  ;;  %v7301_v44 = vld [vmem:[%s8704_s22 + $0x64] sm:$0xf]  ;;  %v6267_v45 = vld [vmem:[%s8704_s22 + $0x70] sm:$0xf0] }
 0x55d   : > { %v2522_v32 = vmul.f32 %v9104_v30, %v9104_v30  ;;  %v2523_v33 = vmul.f32 %v9106_v31, %v9106_v31  ;;  %2783 = vmatpush.bf16.msra.mxu0 %v6122_v49  ;;  %v6457_v49 = vld [vmem:[%s8704_s22 + $0x1e0] sm:$0xf]  ;;  %v6330_v51 = vor.u32 %v7319_v48, %v6329_v46  ;;  %v6270_v48 = vor.u32 %v7301_v44, %v6267_v45  ;;  %v7291_v17 = vld [vmem:[%s8704_s22 + $0xc] sm:$0xf0] }
 0x55e   : > { %2811 = vmatpush.bf16.msra.mxu2 %v6126_v54  ;;  %2798 = vmatpush.bf16.msra.mxu1 %v6178_v61  ;;  %v6458_v52 = vor.u32 %v7351_v50, %v6457_v49  ;;  %v6331_v54 = vld [vmem:[%s8704_s22 + $0xf0] sm:$0xf0]  ;;  %v6442_v61 = vor.u32 %v7347_v58, %v6441_v0  ;;  %v6409_v25 = vld [vmem:[%s8704_s22 + $0x180] sm:$0xf]  ;;  %v7333_v49 = vld [vmem:[%s8704_s22 + $0x164] sm:$0xf] }
 0x55f   : > { %v2527_v28 = vadd.f32 %v2523_v33, %v2522_v32  ;;  %v6102_v32 = vor.u32 %v7259_v26, %v6099_v27  ;;  %v7275_v33 = vld [vmem:[%s8692_s1 + $0x94] sm:$0xf]  ;;  %v6334_v56 = vor.u32 %v7317_v53, %v6331_v54  ;;  %v6395_v50 = vld [vmem:[%s8704_s22 + $0x170] sm:$0xf0] }
 0x560   : > { %v7339_v26 = vld [vmem:[%s8704_s22 + $0x18c] sm:$0xf0]  ;;  %v6398_v53 = vor.u32 %v7333_v49, %v6395_v50 }
 0x561   : > { %2528 = vadd.xlane.f32.xlu2 %v2527_v28  ;;  %2784 = vmatpush.bf16.msra.mxu0 %v6114_v63  ;;  %v6163_v28 = vld [vmem:[%s8692_s1 + $0x98] sm:$0xf0]  ;;  %v6314_v63 = vor.u32 %v7315_v60, %v6313_v59  ;;  %v7299_v54 = vld [vmem:[%s8704_s22 + $0x4c] sm:$0xf0]  ;;  %v7297_v60 = vld [vmem:[%s8704_s22 + $0x44] sm:$0xf] }
 0x562   : > { %2812 = vmatpush.bf16.msra.mxu2 %v6118_v2  ;;  %2799 = vmatpush.bf16.msra.mxu1 %v6170_v13  ;;  %v6166_v34 = vor.u32 %v7275_v33, %v6163_v28  ;;  %v6315_v2 = vld [vmem:[%s8704_s22 + $0xd0] sm:$0xf0]  ;;  %v7337_v33 = vld [vmem:[%s8704_s22 + $0x184] sm:$0xf] }
 0x563   : > { %v6318_v5 = vor.u32 %v7313_v1, %v6315_v2  ;;  %v6299_v13 = vld [vmem:[%s8704_s22 + $0xb0] sm:$0xf0]  ;;  %v6233_v2 = vld [vmem:[%s8704_s22 + $0x20] sm:$0xf] }
 0x564   : > { %2828 = vmatpush.bf16.msra.mxu3 %v6166_v34  ;;  %v6302_v15 = vor.u32 %v7309_v12, %v6299_v13  ;;  %v6410_v34 = vor.u32 %v7339_v26, %v6409_v25  ;;  %v7325_v13 = vld [vmem:[%s8704_s22 + $0x124] sm:$0xf]  ;;  %v6219_v26 = vld [vmem:[%s8704_s22 + $0x10] sm:$0xf0] }
 0x565   : > { %2785 = vmatpush.bf16.msra.mxu0 %v6106_v9  ;;  %v6425_v9 = vld [vmem:[%s8704_s22 + $0x1a0] sm:$0xf]  ;;  %v7289_v25 = vld [vmem:[%s8704_s22 + $0x4] sm:$0xf] }
 0x566   : > { %2813 = vmatpush.bf16.msra.mxu2 %v6110_v14  ;;  %2800 = vmatpush.bf16.msra.mxu1 %v6162_v29  ;;  %v6426_v14 = vor.u32 %v7343_v11, %v6425_v9  ;;  %v7305_v29 = vld [vmem:[%s8704_s22 + $0x84] sm:$0xf]  ;;  %v6235_v9 = vld [vmem:[%s8704_s22 + $0x30] sm:$0xf0] }
 0x567   : > { %v6238_v16 = vor.u32 %v7293_v8, %v6235_v9  ;;  %v7314_v9 = vld [vmem:[%s8704_s22 + $0xcc] sm:$0xf] }
 0x568   : > { %2829 = vmatpush.bf16.msra.mxu3 %v6158_v47 }
 0x569   : > { %2786 = vmatpush.bf16.msra.mxu0 %v6098_v24  ;;  %v7307_v24 = vld [vmem:[%s8704_s22 + $0x8c] sm:$0xf0] }
 0x56a   : > { %2814 = vmatpush.bf16.msra.mxu2 %v6102_v32  ;;  %2801 = vmatpush.bf16.msra.mxu1 %v6154_v42  ;;  %v6283_v32 = vld [vmem:[%s8704_s22 + $0x90] sm:$0xf0]  ;;  %v6282_v28 = vor.u32 %v7307_v24, %v6281_v18  ;;  %v6266_v42 = vor.u32 %v7303_v40, %v6265_v39  ;;  %v6345_v18 = vld [vmem:[%s8704_s22 + $0x100] sm:$0xf]  ;;  %v1266_v39 = vld [vmem:[%s8752_s13] sm:$0x77] }
 0x56b   : > { %v6286_v37 = vor.u32 %v7305_v29, %v6283_v32  ;;  %v6347_v29 = vld [vmem:[%s8704_s22 + $0x110] sm:$0xf0]  ;;  %v2560_v44 = vperm.slane %v1266_v39, 4 }
 0x56c   : > { %3291 = vmatpush.bf16.msrb.mxu3 %v6462_v62  ;;  %v6251_v62 = vld [vmem:[%s8704_s22 + $0x50] sm:$0xf0] }
 0x56d   : > { %2787 = vmatpush.bf16.msra.mxu0 %v6090_v38  ;;  %v6414_v38 = vor.u32 %v7337_v33, %v6411_v35  ;;  %v6254_v1 = vor.u32 %v7297_v60, %v6251_v62  ;;  %v6222_v35 = vor.u32 %v7289_v25, %v6219_v26  ;;  %v6289_v26 = vld [vmem:[%s8704_s22 + $0x88] sm:$0xf] }
 0x56e   : > { %2815 = vmatpush.bf16.msra.mxu2 %v6094_v43  ;;  %3253 = vmatpush.bf16.msrb.mxu1 %v6458_v52  ;;  %v7335_v43 = vld [vmem:[%s8704_s22 + $0x16c] sm:$0xf0] }
 0x56f   : > { %v6394_v47 = vor.u32 %v7335_v43, %v6393_v41  ;;  %v2559_v43 = vperm.slane %v1266_v39, 0  ;;  %v1263_v39 = vld [vmem:[#allocation2 + $0x28] sm:$0xff] }
 0x570   : > { %3292 = vmatpush.bf16.msrb.mxu3 %v6446_v6  ;;  %v6361_v6 = vld [vmem:[%s8704_s22 + $0x120] sm:$0xf] }
 0x571   : > { %3234 = vmatpush.bf16.msrb.mxu0 %v6330_v51  ;;  %v6249_v51 = vld [vmem:[%s8704_s22 + $0x40] sm:$0xf]  ;;  %v6362_v12 = vor.u32 %v7327_v7, %v6361_v6  ;;  %v6321_v6 = vld [vmem:[%s8704_s22 + $0xc8] sm:$0xf]  ;;  %v7316_v7 = vld [vmem:[%s8704_s22 + $0xd4] sm:$0xf0] }
 0x572   : > { %3272 = vmatpush.bf16.msrb.mxu2 %v6334_v56  ;;  %3254 = vmatpush.bf16.msrb.mxu1 %v6442_v61  ;;  %v7331_v56 = vld [vmem:[%s8704_s22 + $0x14c] sm:$0xf0]  ;;  %v6250_v57 = vor.u32 %v7299_v54, %v6249_v51  ;;  %v6379_v61 = vld [vmem:[%s8704_s22 + $0x150] sm:$0xf0] }
 0x573   : > { %v6378_v59 = vor.u32 %v7331_v56, %v6377_v55 }
 0x574   : > { %3293 = vmatpush.bf16.msrb.mxu3 %v6430_v21 }
 0x575   : > { %3235 = vmatpush.bf16.msrb.mxu0 %v6314_v63  ;;  %v7329_v63 = vld [vmem:[%s8704_s22 + $0x144] sm:$0xf] }
 0x576   : > { %3273 = vmatpush.bf16.msrb.mxu2 %v6318_v5  ;;  %3255 = vmatpush.bf16.msrb.mxu1 %v6426_v14  ;;  %v6382_v4 = vor.u32 %v7329_v63, %v6379_v61  ;;  %v7295_v5 = vld [vmem:[%s8704_s22 + $0x2c] sm:$0xf0]  ;;  %v6363_v14 = vld [vmem:[%s8704_s22 + $0x130] sm:$0xf0]  ;;  %v6337_v61 = vld [vmem:[%s8704_s22 + $0xe8] sm:$0xf] }
 0x577   : > { %v6234_v11 = vor.u32 %v7295_v5, %v6233_v2  ;;  %v6366_v24 = vor.u32 %v7325_v13, %v6363_v14  ;;  %v7320_v2 = vld [vmem:[%s8704_s22 + $0xf4] sm:$0xf0]  ;;  %v6339_v5 = vld [vmem:[%s8704_s22 + $0xf8] sm:$0xf0]  ;;  %v6305_v13 = vld [vmem:[%s8704_s22 + $0xa8] sm:$0xf] }
 0x578   : > { %3294 = vmatpush.bf16.msrb.mxu3 %v6414_v38  ;;  %v7312_v14 = vld [vmem:[%s8704_s22 + $0xb4] sm:$0xf0] }
 0x579   : > { %3236 = vmatpush.bf16.msrb.mxu0 %v6298_v10 }
 0x57a   : > { %3274 = vmatpush.bf16.msrb.mxu2 %v6302_v15  ;;  %3256 = vmatpush.bf16.msrb.mxu1 %v6410_v34  ;;  %v6217_v15 = vld [vmem:[%s8704_s22] sm:$0xf] }
 0x57b   : > { %v6218_v33 = vor.u32 %v7291_v17, %v6217_v15  ;;  %v7310_v15 = vld [vmem:[%s8704_s22 + $0xac] sm:$0xf] }
 0x57c   : > { %3295 = vmatpush.bf16.msrb.mxu3 %v6398_v53  ;;  %v1258_v17 = vld [vmem:[#allocation2] sm:$0xff] }
 0x57d   : > { %3237 = vmatpush.bf16.msrb.mxu0 %v6282_v28 }
 0x57e   : > { %3275 = vmatpush.bf16.msrb.mxu2 %v6286_v37  ;;  %3257 = vmatpush.bf16.msrb.mxu1 %v6394_v47 }
 0x580   : > { %3296 = vmatpush.bf16.msrb.mxu3 %v6382_v4  ;;  %v6338_v4 = vor.u32 %v7320_v2, %v6337_v61 }
 0x581   : > { %3238 = vmatpush.bf16.msrb.mxu0 %v6266_v42  ;;  %v1267_v42 = vld [vmem:[%s8757_s20] sm:$0x77] }
 0x582   : > { %3276 = vmatpush.bf16.msrb.mxu2 %v6270_v48  ;;  %3258 = vmatpush.bf16.msrb.mxu1 %v6378_v59  ;;  %v2570_v48 = vperm.slane %v1267_v42, 0  ;;  %v2571_v49 = vperm.slane %v1267_v42, 4 }
 0x584   : > { %3297 = vmatpush.bf16.msrb.mxu3 %v6366_v24  ;;  %v2574_v55 = vperm.slane %v2570_v48, 0  ;;  %v2575_v56 = vperm.slane %v2571_v49, 0  ;;  %v1261_v24 = vld [vmem:[#allocation2 + $0x18] sm:$0xff] }
 0x585   : > { %3239 = vmatpush.bf16.msrb.mxu0 %v6250_v57  ;;  %v6465_v49 = vld [vmem:[%s8704_s22 + $0x1e8] sm:$0xf] }
 0x586   : > { %3277 = vmatpush.bf16.msrb.mxu2 %v6254_v1  ;;  %3259 = vmatpush.bf16.msrb.mxu1 %v6362_v12 }
 0x589   : > { %3240 = vmatpush.bf16.msrb.mxu0 %v6234_v11  ;;  %v6322_v11 = vor.u32 %v7316_v7, %v6321_v6 }
 0x58a   : > { %3278 = vmatpush.bf16.msrb.mxu2 %v6238_v16  ;;  %v6307_v16 = vld [vmem:[%s8704_s22 + $0xb8] sm:$0xf0] }
 0x58b   : > { %v6310_v25 = vor.u32 %v7310_v15, %v6307_v16  ;;  %v7340_v15 = vld [vmem:[%s8704_s22 + $0x194] sm:$0xf0]  ;;  %v6241_v16 = vld [vmem:[%s8704_s22 + $0x28] sm:$0xf] }
 0x58d   : > { %3241 = vmatpush.bf16.msrb.mxu0 %v6218_v33 }
 0x58e   : > { %3279 = vmatpush.bf16.msrb.mxu2 %v6222_v35 }
 0x5cc   : > { %v2526_v20 = vpop.xlane.xlu1 %2525 }
 0x5cd   : > { %v2530_v27 = vmul.f32 %v2526_v20, %v9092_v19  ;;  %v7323_v20 = vld [vmem:[%s8704_s22 + $0x10c] sm:$0xf0] }
 0x5ce   : > { %v6346_v28 = vor.u32 %v7323_v20, %v6345_v18  ;;  %v6306_v18 = vor.u32 %v7312_v14, %v6305_v13  ;;  %v1260_v20 = vld [vmem:[#allocation2 + $0x10] sm:$0xff] }
 0x5cf   : > { %v9193_v36 = vadd.f32 1e-05, %v2530_v27  ;;  %v7321_v27 = vld [vmem:[%s8704_s22 + $0x104] sm:$0xf]  ;;  %v9270_v33 = vpack.c.bf16 %v1260_v20, %v1258_v17  ;;  %v7296_v17 = vld [vmem:[%s8704_s22 + $0x34] sm:$0xf0] }
 0x5d0   : > { %v6350_v40 = vor.u32 %v7321_v27, %v6347_v29  ;;  %3260 = vmatpush.bf16.msrb.mxu1 %v6346_v28  ;;  %v7308_v27 = vld [vmem:[%s8704_s22 + $0x94] sm:$0xf0]  ;;  %v7306_v29 = vld [vmem:[%s8704_s22 + $0x8c] sm:$0xf] }
 0x5d1   : > { %7640 = vrsqrt.f32 %v9193_v36  ;;  %vm2540_vm4 = vweird.f32 %v9193_v36  ;;  %v7330_v20 = vld [vmem:[%s8704_s22 + $0x14c] sm:$0xf] }
 0x5d2   : > { %3298 = vmatpush.bf16.msrb.mxu3 %v6350_v40  ;;  %v1265_v40 = vld [vmem:[#allocation2 + $0x38] sm:$0xff] }
 0x5d3   : > { %v9280_v42 = vpack.c.bf16 %v1265_v40, %v1263_v39  ;;  %v7326_v39 = vld [vmem:[%s8704_s22 + $0x12c] sm:$0xf] }
 0x5d4   : > { %v2529_v46 = vpop.xlane.xlu2 %2528 }
 0x5d5   : > { %v2531_v52 = vmul.f32 %v2529_v46, %v9092_v19 }
 0x5d7   : > { %v7641_v0 = vpop.eup %7640  ;;  %v9212_v58 = vadd.f32 1e-05, %v2531_v52  ;;  %v2564_v52 = vperm.slane %v2560_v44, 0  ;;  %v6467_v44 = vld [vmem:[%s8704_s22 + $0x1f8] sm:$0xf0] }
 0x5d8   : > { %v2535_v3 = vmul.f32 %v7641_v0, %v9193_v36  ;;  %vm2541_vm3 = vweird.f32 %v7641_v0  ;;  %v2563_v36 = vperm.slane %v2559_v43, 0  ;;  %v7350_v43 = vld [vmem:[%s8704_s22 + $0x1ec] sm:$0xf] }
 0x5d9   : > { %7642 = vrsqrt.f32 %v9212_v58  ;;  %vm2542_vm5 = vmor %vm2540_vm4, %vm2541_vm3  ;;  %vm2550_vm7 = vweird.f32 %v9212_v58 }
 0x5da   : > { %v2536_v10 = vmul.f32 %v7641_v0, %v2535_v3  ;;  %v7318_v3 = vld [vmem:[%s8704_s22 + $0xec] sm:$0xf] }
 0x5db   : > { %v6342_v8 = vor.u32 %v7318_v3, %v6339_v5  ;;  %v7344_v3 = vld [vmem:[%s8704_s22 + $0x1b4] sm:$0xf0] }
 0x5dc   : > { %v2537_v21 = vmul.f32 0.5, %v2536_v10  ;;  %v6323_v10 = vld [vmem:[%s8704_s22 + $0xd8] sm:$0xf0]  ;;  %v7300_v5 = vld [vmem:[%s8704_s22 + $0x54] sm:$0xf0] }
 0x5dd   : > { %v6326_v12 = vor.u32 %v7314_v9, %v6323_v10  ;;  %v6403_v9 = vld [vmem:[%s8704_s22 + $0x178] sm:$0xf0]  ;;  %v7298_v10 = vld [vmem:[%s8704_s22 + $0x4c] sm:$0xf] }
 0x5de   : > { %v2538_v32 = vsub.f32 1.5, %v2537_v21  ;;  %v1259_v21 = vld [vmem:[#allocation2 + $0x8] sm:$0xff] }
 0x5df   : > { %v7643_v34 = vpop.eup %7642  ;;  %v9272_v28 = vpack.c.bf16 %v1261_v24, %v1259_v21  ;;  %v6242_v21 = vor.u32 %v7296_v17, %v6241_v16  ;;  %v6387_v24 = vld [vmem:[%s8704_s22 + $0x158] sm:$0xf0] }
 0x5e0   : > { %v2539_v37 = vmul.f32 %v7641_v0, %v2538_v32  ;;  %v2545_v38 = vmul.f32 %v7643_v34, %v9212_v58  ;;  %vm2551_vm6 = vweird.f32 %v7643_v34  ;;  %v6291_v32 = vld [vmem:[%s8704_s22 + $0x98] sm:$0xf0] }
 0x5e1   : > { %vm2552_vm8 = vmor %vm2550_vm7, %vm2551_vm6  ;;  %v6294_v35 = vor.u32 %v7306_v29, %v6291_v32  ;;  %v6390_v29 = vor.u32 %v7330_v20, %v6387_v24  ;;  %v2614_v16 = vld [vmem:[%s9923_s9] sm:$0x3] }
 0x5e2   : > { %v2546_v41 = vmul.f32 %v7643_v34, %v2545_v38  ;;  %v2543_v45 = vsel %vm2542_vm5, %v7641_v0, %v2539_v37  ;;  %v1262_v37 = vld [vmem:[#allocation2 + $0x20] sm:$0xff]  ;;  %v1264_v38 = vld [vmem:[#allocation2 + $0x30] sm:$0xff] }
 0x5e3   : > { %v2554_v50 = vmul.f32 %v2543_v45, %v9095_v22  ;;  %v2555_v51 = vmul.f32 %v2543_v45, %v9097_v23  ;;  %v6470_v45 = vor.u32 %v7350_v43, %v6467_v44  ;;  %v6371_v43 = vld [vmem:[%s8704_s22 + $0x138] sm:$0xf0]  ;;  %v7290_v44 = vld [vmem:[%s8704_s22 + $0xc] sm:$0xf] }
 0x5e4   : > { %v2547_v46 = vmul.f32 0.5, %v2546_v41  ;;  %v9278_v41 = vpack.c.bf16 %v1264_v38, %v1262_v37  ;;  %v7292_v37 = vld [vmem:[%s8704_s22 + $0x14] sm:$0xf0] }
 0x5e5   : > { %v2565_v60 = vmul.f32 %v2563_v36, %v2554_v50  ;;  %v2566_v22 = vmul.f32 %v2564_v52, %v2555_v51  ;;  %v7352_v50 = vld [vmem:[%s8704_s22 + $0x1f4] sm:$0xf0] }
 0x5e6   : > { %v2548_v47 = vsub.f32 1.5, %v2547_v46  ;;  %v7346_v46 = vld [vmem:[%s8704_s22 + $0x1cc] sm:$0xf]  ;;  %v6466_v51 = vor.u32 %v7352_v50, %v6465_v49  ;;  %v7332_v49 = vld [vmem:[%s8704_s22 + $0x154] sm:$0xf0] }
 0x5e7   : > { %v9242_v63 = vadd.f32 %v2574_v55, %v2565_v60  ;;  %v9246_v58 = vadd.f32 %v2575_v56, %v2566_v22  ;;  %v7338_v60 = vld [vmem:[%s8704_s22 + $0x18c] sm:$0xf] }
 0x5e8   : > { %v2549_v53 = vmul.f32 %v7643_v34, %v2548_v47  ;;  %v6451_v47 = vld [vmem:[%s8704_s22 + $0x1d8] sm:$0xf0] }
 0x5e9   : > { %v6454_v48 = vor.u32 %v7346_v46, %v6451_v47  ;;  %v6385_v46 = vld [vmem:[%s8704_s22 + $0x148] sm:$0xf]  ;;  %v6374_v47 = vor.u32 %v7326_v39, %v6371_v43 }
 0x5ea   : > { %v2553_v54 = vsel %vm2552_vm8, %v7643_v34, %v2549_v53  ;;  %v6290_v34 = vor.u32 %v7308_v27, %v6289_v26  ;;  %v6243_v26 = vld [vmem:[%s8704_s22 + $0x38] sm:$0xf0]  ;;  %v6401_v27 = vld [vmem:[%s8704_s22 + $0x168] sm:$0xf]  ;;  %v6386_v50 = vor.u32 %v7332_v49, %v6385_v46 }
 0x5eb   : > { %v2556_v57 = vmul.f32 %v2553_v54, %v9104_v30  ;;  %v2557_v59 = vmul.f32 %v2553_v54, %v9106_v31  ;;  %v6449_v54 = vld [vmem:[%s8704_s22 + $0x1c8] sm:$0xf] }
 0x5ed   : > { %v2567_v62 = vmul.f32 %v2563_v36, %v2556_v57  ;;  %v2568_v23 = vmul.f32 %v2564_v52, %v2557_v59  ;;  %v7342_v36 = vld [vmem:[%s8704_s22 + $0x1ac] sm:$0xf]  ;;  %v6435_v52 = vld [vmem:[%s8704_s22 + $0x1b8] sm:$0xf0]  ;;  %v6273_v57 = vld [vmem:[%s8704_s22 + $0x68] sm:$0xf] }
 0x5ee   : > { %v6438_v53 = vor.u32 %v7342_v36, %v6435_v52  ;;  %v7304_v59 = vld [vmem:[%s8704_s22 + $0x74] sm:$0xf0]  ;;  %v6355_v36 = vld [vmem:[%s8704_s22 + $0x118] sm:$0xf0] }
 0x5ef   : > { %v9244_v0 = vadd.f32 %v2574_v55, %v2567_v62  ;;  %v9248_v30 = vadd.f32 %v2575_v56, %v2568_v23  ;;  %v7348_v55 = vld [vmem:[%s8704_s22 + $0x1d4] sm:$0xf0]  ;;  %v6274_v22 = vor.u32 %v7304_v59, %v6273_v57  ;;  %v6419_v62 = vld [vmem:[%s8704_s22 + $0x198] sm:$0xf0]  ;;  %v7302_v23 = vld [vmem:[%s8704_s22 + $0x6c] sm:$0xf] }
 0x5f0   : > { %v6450_v56 = vor.u32 %v7348_v55, %v6449_v54  ;;  %v6422_v61 = vor.u32 %v7338_v60, %v6419_v62  ;;  %v7328_v54 = vld [vmem:[%s8704_s22 + $0x134] sm:$0xf0] }
 0x5f1   : > { %v2612_v31 = vpack.c.bf16 %v9244_v0, %v9242_v63  ;;  %v2613_v1 = vpack.c.bf16 %v9248_v30, %v9246_v58  ;;  %v7324_v57 = vld [vmem:[%s8704_s22 + $0x114] sm:$0xf0] }
 0x5f3   : > { %2788 = vmatmul.bf16.vlgmr.msra.gmra.mxu0 %v2612_v31  ;;  %2802 = vmatmul.bf16.vlgmr.msra.gmra.mxu1 %v2613_v1 }
 0x5f4   : > { %2816 = vmatmul.bf16.vlgmr.msra.gmra.mxu2 %v2612_v31  ;;  %2830 = vmatmul.bf16.vlgmr.msra.gmra.mxu3 %v2613_v1  ;;  %v6275_v31 = vld [vmem:[%s8704_s22 + $0x78] sm:$0xf0]  ;;  %v6433_v1 = vld [vmem:[%s8704_s22 + $0x1a8] sm:$0xf] }
 0x5f5   : > { %3310 = vmatpush.bf16.msra.mxu0 %v6338_v4  ;;  %3348 = vmatpush.bf16.msra.mxu2 %v6342_v8  ;;  %v6278_v2 = vor.u32 %v7302_v23, %v6275_v31  ;;  %v6257_v4 = vld [vmem:[%s8704_s22 + $0x48] sm:$0xf]  ;;  %v6434_v6 = vor.u32 %v7344_v3, %v6433_v1  ;;  %v7334_v8 = vld [vmem:[%s8704_s22 + $0x16c] sm:$0xf] }
 0x5f6   : > { %3367 = vmatpush.bf16.msra.mxu3 %v6470_v45  ;;  %3329 = vmatpush.bf16.msra.mxu1 %v6466_v51  ;;  %v6258_v7 = vor.u32 %v7300_v5, %v6257_v4  ;;  %v6406_v13 = vor.u32 %v7334_v8, %v6403_v9  ;;  %v6227_v45 = vld [vmem:[%s8704_s22 + $0x18] sm:$0xf0]  ;;  %v7322_v51 = vld [vmem:[%s8704_s22 + $0x10c] sm:$0xf] }
 0x5f7   : > { %v6358_v52 = vor.u32 %v7322_v51, %v6355_v36 }
 0x5f9   : > { %3311 = vmatpush.bf16.msra.mxu0 %v6322_v11  ;;  %3349 = vmatpush.bf16.msra.mxu2 %v6326_v12  ;;  %v6259_v11 = vld [vmem:[%s8704_s22 + $0x58] sm:$0xf0]  ;;  %v6417_v12 = vld [vmem:[%s8704_s22 + $0x188] sm:$0xf] }
 0x5fa   : > { %3368 = vmatpush.bf16.msra.mxu3 %v6454_v48  ;;  %3330 = vmatpush.bf16.msra.mxu1 %v6450_v56  ;;  %v6262_v14 = vor.u32 %v7298_v10, %v6259_v11  ;;  %v6230_v48 = vor.u32 %v7290_v44, %v6227_v45  ;;  %v6353_v56 = vld [vmem:[%s8704_s22 + $0x108] sm:$0xf] }
 0x5fb   : > { %v6354_v59 = vor.u32 %v7324_v57, %v6353_v56 }
 0x5fd   : > { %3312 = vmatpush.bf16.msra.mxu0 %v6306_v18  ;;  %3350 = vmatpush.bf16.msra.mxu2 %v6310_v25  ;;  %v6418_v18 = vor.u32 %v7340_v15, %v6417_v12  ;;  %v7294_v25 = vld [vmem:[%s8704_s22 + $0x2c] sm:$0xf] }
 0x5fe   : > { %3369 = vmatpush.bf16.msra.mxu3 %v6438_v53  ;;  %3331 = vmatpush.bf16.msra.mxu1 %v6434_v6  ;;  %v6246_v32 = vor.u32 %v7294_v25, %v6243_v26  ;;  %v6369_v53 = vld [vmem:[%s8704_s22 + $0x128] sm:$0xf]  ;;  %v2616_v25 = vperm.slane %v2614_v16, 0 }
 0x5ff   : > { %v6370_v55 = vor.u32 %v7328_v54, %v6369_v53 }
 0x601   : > { %3313 = vmatpush.bf16.msra.mxu0 %v6290_v34  ;;  %3351 = vmatpush.bf16.msra.mxu2 %v6294_v35  ;;  %v7336_v34 = vld [vmem:[%s8704_s22 + $0x174] sm:$0xf0]  ;;  %v6225_v35 = vld [vmem:[%s8704_s22 + $0x8] sm:$0xf] }
 0x602   : > { %3370 = vmatpush.bf16.msra.mxu3 %v6422_v61  ;;  %3332 = vmatpush.bf16.msra.mxu1 %v6418_v18  ;;  %v6402_v38 = vor.u32 %v7336_v34, %v6401_v27  ;;  %v6226_v40 = vor.u32 %v7292_v37, %v6225_v35  ;;  %v2617_v18 = vperm.slane %v2614_v16, 1 }
 0x603   : > { %3242 = vmatmul.bf16.vlgmr.msrb.gmra.mxu0 %v9270_v33  ;;  %3261 = vmatmul.bf16.vlgmr.msrb.gmra.mxu1 %v9272_v28 }
 0x604   : > { %3280 = vmatmul.bf16.vlgmr.msrb.gmra.mxu2 %v9270_v33  ;;  %3299 = vmatmul.bf16.vlgmr.msrb.gmra.mxu3 %v9272_v28 }
 0x605   : > { %3314 = vmatpush.bf16.msra.mxu0 %v6274_v22  ;;  %3352 = vmatpush.bf16.msra.mxu2 %v6278_v2 }
 0x606   : > { %3371 = vmatpush.bf16.msra.mxu3 %v6406_v13  ;;  %3333 = vmatpush.bf16.msra.mxu1 %v6402_v38 }
 0x609   : > { %3315 = vmatpush.bf16.msra.mxu0 %v6258_v7  ;;  %3353 = vmatpush.bf16.msra.mxu2 %v6262_v14 }
 0x60a   : > { %3372 = vmatpush.bf16.msra.mxu3 %v6390_v29  ;;  %3334 = vmatpush.bf16.msra.mxu1 %v6386_v50 }
 0x60d   : > { %3316 = vmatpush.bf16.msra.mxu0 %v6242_v21  ;;  %3354 = vmatpush.bf16.msra.mxu2 %v6246_v32 }
 0x60e   : > { %3373 = vmatpush.bf16.msra.mxu3 %v6374_v47  ;;  %3335 = vmatpush.bf16.msra.mxu1 %v6370_v55 }
 0x611   : > { %3317 = vmatpush.bf16.msra.mxu0 %v6226_v40  ;;  %3355 = vmatpush.bf16.msra.mxu2 %v6230_v48 }
 0x612   : > { %3374 = vmatpush.bf16.msra.mxu3 %v6358_v52  ;;  %3336 = vmatpush.bf16.msra.mxu1 %v6354_v59 }
 0x613   : > { %3247 = vmatmul.bf16.gmra.mxu0 %v9278_v41  ;;  %3266 = vmatmul.bf16.gmra.mxu1 %v9280_v42 }
 0x614   : > { %3285 = vmatmul.bf16.gmra.mxu2 %v9278_v41  ;;  %3304 = vmatmul.bf16.gmra.mxu3 %v9280_v42 }
 0x623   : > { %3318 = vmatmul.bf16.vlgmr.msra.gmra.mxu0 %v9270_v33  ;;  %3337 = vmatmul.bf16.vlgmr.msra.gmra.mxu1 %v9272_v28 }
 0x624   : > { %3356 = vmatmul.bf16.vlgmr.msra.gmra.mxu2 %v9270_v33  ;;  %3375 = vmatmul.bf16.vlgmr.msra.gmra.mxu3 %v9272_v28  ;;  %v9351_v28 = vld [vmem:[%s8711_s26] sm:$0xf] }
 0x625   : > { %v2907_v4 = vperm.slane %v9351_v28, 1  ;;  %v2909_v16 = vperm.slane %v9351_v28, 3 }
 0x633   : > { %3323 = vmatmul.bf16.gmra.mxu0 %v9278_v41  ;;  %3342 = vmatmul.bf16.gmra.mxu1 %v9280_v42 }
 0x634   : > { %3361 = vmatmul.bf16.gmra.mxu2 %v9278_v41  ;;  %3380 = vmatmul.bf16.gmra.mxu3 %v9280_v42  ;;  %v2906_v41 = vperm.slane %v9351_v28, 0 }
 0x670   : > { %v2789_v60 = vpop.f32.mrf.mxu0  ;;  %v2803_v22 = vpop.f32.mrf.mxu1 }
 0x671   : > { %v2790_v38 = vadd.f32 %v2789_v60, %v2616_v25 }
 0x673   : > { %v2804_v50 = vadd.f32 %v2803_v22, %v2790_v38 }
 0x677   : > { %v2817_v33 = vpop.f32.mrf.mxu2  ;;  %v2831_v62 = vpop.f32.mrf.mxu3 }
 0x678   : > { %v9341_v23 = vpop.f32.mrf.mxu0  ;;  %v9343_v31 = vpop.f32.mrf.mxu1  ;;  %v2818_v29 = vadd.f32 %v2817_v33, %v2617_v18 }
 0x67a   : > { %v2832_v48 = vadd.f32 %v2831_v62, %v2818_v29 }
 0x67c   : > { %v3420_v53 = vpack.c.bf16 %v2832_v48, %v2804_v50 }
 0x67e   : > { %v3424_v59 = vrot.slane %v3420_v53, 4 }
 0x67f   : > { %v9346_v1 = vpop.f32.mrf.mxu2  ;;  %v9348_v61 = vpop.f32.mrf.mxu3 }
 0x680   : > { %v3243_v2 = vpop.f32.mrf.mxu0  ;;  %v3262_v3 = vpop.f32.mrf.mxu1  ;;  %v2820_v22 = vadd.f32 %v9346_v1, %v2617_v18 }
 0x681   : > { %v3244_v5 = vadd.f32 %v3243_v2, %v2906_v41 }
 0x683   : > { %v3263_v10 = vadd.f32 %v3262_v3, %v3244_v5 }
 0x687   : > { %v3281_v6 = vpop.f32.mrf.mxu2  ;;  %v3300_v7 = vpop.f32.mrf.mxu3 }
 0x688   : > { %v3282_v8 = vadd.f32 %v3281_v6, %v2907_v4  ;;  %v3245_v9 = vpop.f32.mrf.mxu0  ;;  %v3264_v11 = vpop.f32.mrf.mxu1 }
 0x689   : > { %v3246_v12 = vadd.f32 %v3245_v9, %v2906_v41  ;;  %v2792_v9 = vadd.f32 %v9341_v23, %v2616_v25 }
 0x68a   : > { %v3301_v42 = vadd.f32 %v3300_v7, %v3282_v8 }
 0x68b   : > { %v3265_v21 = vadd.f32 %v3264_v11, %v3246_v12  ;;  %v2806_v12 = vadd.f32 %v9343_v31, %v2792_v9 }
 0x68c   : > { %v3428_v13 = vpack.c.bf16 %v3301_v42, %v3263_v10 }
 0x68e   : > { %v3436_v26 = vrot.slane %v3428_v13, 4  ;;  %v3452_v32 = vunpack.c.l.b16 %v3428_v13 }
 0x68f   : > { %v3283_v14 = vpop.f32.mrf.mxu2  ;;  %v3302_v15 = vpop.f32.mrf.mxu3 }
 0x690   : > { %v3284_v17 = vadd.f32 %v3283_v14, %v2907_v4  ;;  %v3248_v20 = vpop.f32.mrf.mxu0  ;;  %v3267_v37 = vpop.f32.mrf.mxu1  ;;  %v3486_v39 = vunpack.c.l.b16 %v3436_v26 }
 0x691   : > { %v3249_v46 = vadd.f32 %v3248_v20, %v2906_v41 }
 0x692   : > { %v3303_v24 = vadd.f32 %v3302_v15, %v3284_v17  ;;  %v2908_v15 = vperm.slane %v9351_v28, 2 }
 0x693   : > { %v3268_v36 = vadd.f32 %v3267_v37, %v3249_v46 }
 0x694   : > { %v3429_v27 = vpack.c.bf16 %v3303_v24, %v3265_v21 }
 0x696   : > { %v3437_v34 = vrot.slane %v3429_v27, 4  ;;  %v3453_v35 = vunpack.c.l.b16 %v3429_v27 }
 0x697   : > { %v3286_v40 = vpop.f32.mrf.mxu2  ;;  %v3305_v43 = vpop.f32.mrf.mxu3 }
 0x698   : > { %v3454_v44 = vpack.c.b16 %v3453_v35, %v3452_v32  ;;  %v3487_v45 = vunpack.c.l.b16 %v3437_v34  ;;  %v3287_v47 = vadd.f32 %v3286_v40, %v2907_v4  ;;  %v3250_v51 = vpop.f32.mrf.mxu0  ;;  %v3269_v60 = vpop.f32.mrf.mxu1 }
 0x699   : > { %v3251_v54 = vadd.f32 %v3250_v51, %v2906_v41 }
 0x69a   : > { %v3488_v49 = vpack.c.b16 %v3487_v45, %v3486_v39  ;;  %3463 = vmatpush.bf16.xpose.msrb.mxu0 %v3454_v44  ;;  %v3306_v52 = vadd.f32 %v3305_v43, %v3287_v47 }
 0x69b   : > { %v3270_v2 = vadd.f32 %v3269_v60, %v3251_v54 }
 0x69c   : > { %3497 = vmatpush.bf16.xpose.msrb.mxu2 %v3488_v49  ;;  %v3430_v56 = vpack.c.bf16 %v3306_v52, %v3268_v36 }
 0x69e   : > { %v3438_v62 = vrot.slane %v3430_v56, 4  ;;  %v3469_v6 = vunpack.c.l.b16 %v3430_v56 }
 0x69f   : > { %v3288_v55 = vpop.f32.mrf.mxu2  ;;  %v3307_v33 = vpop.f32.mrf.mxu3 }
 0x6a0   : > { %v3289_v57 = vadd.f32 %v3288_v55, %v2907_v4  ;;  %v3503_v41 = vunpack.c.l.b16 %v3438_v62  ;;  %v2834_v4 = vadd.f32 %v9348_v61, %v2820_v22  ;;  %v3319_v1 = vpop.f32.mrf.mxu0  ;;  %v3338_v21 = vpop.f32.mrf.mxu1 }
 0x6a1   : > { %3464 = vmatmul.bf16.vlgmr.msrb.gmra.mxu0 %v3420_v53  ;;  %v3320_v23 = vadd.f32 %v3319_v1, %v2908_v15 }
 0x6a2   : > { %v3308_v3 = vadd.f32 %v3307_v33, %v3289_v57  ;;  %v3421_v13 = vpack.c.bf16 %v2834_v4, %v2806_v12 }
 0x6a3   : > { %3498 = vmatmul.bf16.vlgmr.msrb.gmra.mxu2 %v3424_v59  ;;  %v3339_v24 = vadd.f32 %v3338_v21, %v3320_v23 }
 0x6a4   : > { %v3431_v5 = vpack.c.bf16 %v3308_v3, %v3270_v2  ;;  %v3425_v14 = vrot.slane %v3421_v13, 4 }
 0x6a6   : > { %v3439_v7 = vrot.slane %v3431_v5, 4  ;;  %v3470_v8 = vunpack.c.l.b16 %v3431_v5 }
 0x6a7   : > { %v3357_v17 = vpop.f32.mrf.mxu2  ;;  %v3376_v61 = vpop.f32.mrf.mxu3 }
 0x6a8   : > { %v3471_v10 = vpack.c.b16 %v3470_v8, %v3469_v6  ;;  %v3504_v42 = vunpack.c.l.b16 %v3439_v7  ;;  %v3358_v18 = vadd.f32 %v3357_v17, %v2909_v16  ;;  %v3321_v20 = vpop.f32.mrf.mxu0  ;;  %v3340_v32 = vpop.f32.mrf.mxu1 }
 0x6a9   : > { %v3322_v26 = vadd.f32 %v3321_v20, %v2908_v15 }
 0x6aa   : > { %v3505_v11 = vpack.c.b16 %v3504_v42, %v3503_v41  ;;  %3480 = vmatpush.bf16.xpose.msrb.mxu1 %v3471_v10  ;;  %v3377_v25 = vadd.f32 %v3376_v61, %v3358_v18 }
 0x6ab   : > { %v3341_v35 = vadd.f32 %v3340_v32, %v3322_v26 }
 0x6ac   : > { %3514 = vmatpush.bf16.xpose.msrb.mxu3 %v3505_v11  ;;  %v3440_v27 = vpack.c.bf16 %v3377_v25, %v3339_v24  ;;  %v3386_v11 = vld [vmem:[#allocation7] sm:$0xff] }
 0x6ae   : > { %v3448_v37 = vrot.slane %v3440_v27, 4  ;;  %v3577_v40 = vunpack.c.l.b16 %v3440_v27 }
 0x6af   : > { %v3359_v31 = vpop.f32.mrf.mxu2  ;;  %v3378_v34 = vpop.f32.mrf.mxu3 }
 0x6b0   : > { %v3360_v29 = vadd.f32 %v3359_v31, %v2909_v16  ;;  %v3324_v39 = vpop.f32.mrf.mxu0  ;;  %v3617_v44 = vunpack.c.l.b16 %v3448_v37  ;;  %v3343_v49 = vpop.f32.mrf.mxu1 }
 0x6b1   : > { %3481 = vmatmul.bf16.vlgmr.msrb.gmra.mxu1 %v3421_v13  ;;  %v3325_v36 = vadd.f32 %v3324_v39, %v2908_v15 }
 0x6b2   : > { %v3379_v38 = vadd.f32 %v3378_v34, %v3360_v29 }
 0x6b3   : > { %3515 = vmatmul.bf16.vlgmr.msrb.gmra.mxu3 %v3425_v14  ;;  %v3344_v56 = vadd.f32 %v3343_v49, %v3325_v36 }
 0x6b4   : > { %v3441_v28 = vpack.c.bf16 %v3379_v38, %v3341_v35 }
 0x6b6   : > { %v3449_v45 = vrot.slane %v3441_v28, 4  ;;  %v3578_v46 = vunpack.c.l.b16 %v3441_v28 }
 0x6b7   : > { %v3362_v43 = vpop.f32.mrf.mxu2  ;;  %v3381_v50 = vpop.f32.mrf.mxu3 }
 0x6b8   : > { %v3579_v47 = vpack.c.b16 %v3578_v46, %v3577_v40  ;;  %v3618_v48 = vunpack.c.l.b16 %v3449_v45  ;;  %v3326_v52 = vpop.f32.mrf.mxu0  ;;  %v3363_v53 = vadd.f32 %v3362_v43, %v2909_v16  ;;  %v3345_v59 = vpop.f32.mrf.mxu1 }
 0x6b9   : > { %v3327_v54 = vadd.f32 %v3326_v52, %v2908_v15 }
 0x6ba   : > { %v3619_v51 = vpack.c.b16 %v3618_v48, %v3617_v44  ;;  %3591 = vmatpush.bf16.msra.mxu0 %v3579_v47  ;;  %v3382_v60 = vadd.f32 %v3381_v50, %v3363_v53 }
 0x6bb   : > { %v3346_v2 = vadd.f32 %v3345_v59, %v3327_v54  ;;  %v7367_v59 = vld [vmem:[%s8714_s6 + $0x74] sm:$0xf] }
 0x6bc   : > { %3631 = vmatpush.bf16.msra.mxu2 %v3619_v51  ;;  %v3442_v62 = vpack.c.bf16 %v3382_v60, %v3344_v56  ;;  %v6597_v56 = vld [vmem:[%s8714_s6 + $0x70] sm:$0xf] }
 0x6be   : > { %v3450_v22 = vrot.slane %v3442_v62, 4  ;;  %v3597_v6 = vunpack.c.l.b16 %v3442_v62 }
 0x6bf   : > { %v3364_v55 = vpop.f32.mrf.mxu2  ;;  %v3383_v33 = vpop.f32.mrf.mxu3 }
 0x6c0   : > { %v3365_v57 = vadd.f32 %v3364_v55, %v2909_v16  ;;  %v3637_v9 = vunpack.c.l.b16 %v3450_v22  ;;  %v6591_v22 = vld [vmem:[%s8714_s6 + $0x68] sm:$0xf0] }
 0x6c2   : > { %v3384_v3 = vadd.f32 %v3383_v33, %v3365_v57  ;;  %v7368_v57 = vld [vmem:[%s8714_s6 + $0x74] sm:$0xf0]  ;;  %v6599_v33 = vld [vmem:[%s8714_s6 + $0x78] sm:$0xf0] }
 0x6c3   : > { %v6598_v60 = vor.u32 %v7368_v57, %v6597_v56  ;;  %v6602_v62 = vor.u32 %v7367_v59, %v6599_v33  ;;  %v7357_v56 = vld [vmem:[%s8714_s6 + $0x24] sm:$0xf]  ;;  %v6559_v59 = vld [vmem:[%s8714_s6 + $0x28] sm:$0xf0]  ;;  %v6517_v33 = vld [vmem:[%s8714_s6 + $0xd0] sm:$0xf] }
 0x6c4   : > { %v3443_v5 = vpack.c.bf16 %v3384_v3, %v3346_v2  ;;  %v6589_v2 = vld [vmem:[%s8714_s6 + $0x60] sm:$0xf]  ;;  %v7366_v3 = vld [vmem:[%s8714_s6 + $0x64] sm:$0xf0] }
 0x6c5   : > { %3847 = vmatpush.bf16.msrb.mxu2 %v6598_v60  ;;  %v6562_v60 = vor.u32 %v7357_v56, %v6559_v59 }
 0x6c6   : > { %v3451_v7 = vrot.slane %v3443_v5, 4  ;;  %v3598_v8 = vunpack.c.l.b16 %v3443_v5  ;;  %v7365_v5 = vld [vmem:[%s8714_s6 + $0x64] sm:$0xf] }
 0x6c8   : > { %v3599_v41 = vpack.c.b16 %v3598_v8, %v3597_v6  ;;  %v3638_v10 = vunpack.c.l.b16 %v3451_v7  ;;  %v6590_v7 = vor.u32 %v7366_v3, %v6589_v2  ;;  %v7380_v2 = vld [vmem:[%s8714_s6 + $0xd4] sm:$0xf0]  ;;  %v7379_v3 = vld [vmem:[%s8714_s6 + $0xd4] sm:$0xf] }
 0x6ca   : > { %v3639_v42 = vpack.c.b16 %v3638_v10, %v3637_v9  ;;  %3611 = vmatpush.bf16.msra.mxu1 %v3599_v41  ;;  %v6594_v41 = vor.u32 %v7365_v5, %v6591_v22  ;;  %v6581_v10 = vld [vmem:[%s8714_s6 + $0x50] sm:$0xf]  ;;  %3848 = vmatpush.bf16.msrb.mxu2 %v6590_v7  ;;  %v6519_v5 = vld [vmem:[%s8714_s6 + $0xd8] sm:$0xf0] }
 0x6cb   : > { %v6549_v22 = vld [vmem:[%s8714_s6 + $0x10] sm:$0xf]  ;;  %v6522_v7 = vor.u32 %v7379_v3, %v6519_v5 }
 0x6cc   : > { %3651 = vmatpush.bf16.msra.mxu3 %v3639_v42  ;;  %v7364_v42 = vld [vmem:[%s8714_s6 + $0x54] sm:$0xf0] }
 0x6d0   : > { %3861 = vmatpush.bf16.msrb.mxu3 %v6602_v62  ;;  %v6518_v62 = vor.u32 %v7380_v2, %v6517_v33 }
 0x6d4   : > { %3862 = vmatpush.bf16.msrb.mxu3 %v6594_v41  ;;  %v6551_v41 = vld [vmem:[%s8714_s6 + $0x18] sm:$0xf0] }
 0x71e   : > { %v3465_v4 = vpop.f32.mrf.mxu0 }
 0x71f   : > { %v3520_v12 = vmul.f32 0.088388346, %v3465_v4  ;;  %v7363_v4 = vld [vmem:[%s8714_s6 + $0x54] sm:$0xf] }
 0x721   : > { %v3524_v13 = vadd.f32 %v3520_v12, %v3386_v11 }
 0x723   : > { %v3529_v14 = vsel %vm3528_vm9, %v3524_v13, -inf }
 0x724   : > { %3530 = vmax.xlane.f32.xlu0 %v3529_v14 }
 0x726   : > { %v3467_v1 = vpop.f32.mrf.mxu0  ;;  %v3499_v15 = vpop.f32.mrf.mxu2 }
 0x727   : > { %v3522_v16 = vmul.f32 0.088388346, %v3499_v15 }
 0x729   : > { %v3526_v23 = vadd.f32 %v3522_v16, %v3386_v11 }
 0x72b   : > { %v3535_v17 = vsel %vm3528_vm9, %v3526_v23, -inf }
 0x72c   : > { %3536 = vmax.xlane.f32.xlu2 %v3535_v17 }
 0x72e   : > { %v3482_v18 = vpop.f32.mrf.mxu1  ;;  %v3501_v20 = vpop.f32.mrf.mxu2 }
 0x72f   : > { %v3521_v21 = vmul.f32 0.088388346, %v3482_v18 }
 0x731   : > { %v3525_v61 = vadd.f32 %v3521_v21, %v3386_v11 }
 0x733   : > { %v3532_v24 = vsel %vm3528_vm9, %v3525_v61, -inf }
 0x734   : > { %3533 = vmax.xlane.f32.xlu1 %v3532_v24 }
 0x736   : > { %v3484_v25 = vpop.f32.mrf.mxu1  ;;  %v3516_v26 = vpop.f32.mrf.mxu3 }
 0x737   : > { %v3523_v31 = vmul.f32 0.088388346, %v3516_v26  ;;  %v6573_v26 = vld [vmem:[%s8714_s6 + $0x40] sm:$0xf] }
 0x739   : > { %v3527_v27 = vadd.f32 %v3523_v31, %v3386_v11  ;;  %v6583_v11 = vld [vmem:[%s8714_s6 + $0x58] sm:$0xf0]  ;;  %v7362_v31 = vld [vmem:[%s8714_s6 + $0x44] sm:$0xf0] }
 0x73a   : > { %v6586_v14 = vor.u32 %v7363_v4, %v6583_v11  ;;  %v7378_v4 = vld [vmem:[%s8714_s6 + $0xc4] sm:$0xf0]  ;;  %v7377_v11 = vld [vmem:[%s8714_s6 + $0xc4] sm:$0xf] }
 0x73b   : > { %v3538_v29 = vsel %vm3528_vm9, %v3527_v27, -inf }
 0x73c   : > { %3539 = vmax.xlane.f32.xlu0 %v3538_v29  ;;  %3863 = vmatpush.bf16.msrb.mxu3 %v6586_v14  ;;  %v6574_v29 = vor.u32 %v7362_v31, %v6573_v26  ;;  %v6493_v31 = vld [vmem:[%s8714_s6 + $0xa0] sm:$0xf] }
 0x73e   : > { %v3518_v32 = vpop.f32.mrf.mxu3 }
 0x73f   : > { %v6575_v32 = vld [vmem:[%s8714_s6 + $0x48] sm:$0xf0] }
 0x797   : > { %v3531_v34 = vpop.xlane.xlu0 %3530 }
 0x798   : > { %v3541_v35 = vsub.f32 %v3524_v13, %v3531_v34  ;;  %v6582_v13 = vor.u32 %v7364_v42, %v6581_v10  ;;  %v6509_v42 = vld [vmem:[%s8714_s6 + $0xc0] sm:$0xf] }
 0x79a   : > { %v3545_v37 = vmul.f32 1.442695, %v3541_v35  ;;  %3849 = vmatpush.bf16.msrb.mxu2 %v6582_v13  ;;  %v6533_v35 = vld [vmem:[%s8714_s6 + $0xf0] sm:$0xf]  ;;  %v6511_v13 = vld [vmem:[%s8714_s6 + $0xc8] sm:$0xf0] }
 0x79b   : > { %v6514_v14 = vor.u32 %v7377_v11, %v6511_v13 }
 0x79c   : > { %7644 = vpow2.f32 %v3545_v37  ;;  %v7384_v37 = vld [vmem:[%s8714_s6 + $0xf4] sm:$0xf0] }
 0x79e   : > { %3850 = vmatpush.bf16.msrb.mxu2 %v6574_v29  ;;  %v7373_v29 = vld [vmem:[%s8714_s6 + $0xa4] sm:$0xf] }
 0x79f   : > { %v3537_v38 = vpop.xlane.xlu2 %3536 }
 0x7a0   : > { %v3543_v39 = vsub.f32 %v3526_v23, %v3537_v38  ;;  %v7383_v38 = vld [vmem:[%s8714_s6 + $0xf4] sm:$0xf] }
 0x7a2   : > { %v7645_v40 = vpop.eup %7644  ;;  %v3549_v28 = vmul.f32 1.442695, %v3543_v39  ;;  %v6534_v39 = vor.u32 %v7384_v37, %v6533_v35  ;;  %v6485_v37 = vld [vmem:[%s8714_s6 + $0x90] sm:$0xf] }
 0x7a3   : > { %v3553_v43 = vsel %vm3528_vm9, %v7645_v40, 0.0 }
 0x7a4   : > { %7646 = vpow2.f32 %v3549_v28  ;;  %3554 = vadd.xlane.f32.xlu1 %v3553_v43  ;;  %v6565_v28 = vld [vmem:[%s8714_s6 + $0x30] sm:$0xf]  ;;  %v7360_v43 = vld [vmem:[%s8714_s6 + $0x34] sm:$0xf0]  ;;  %3739 = vmatpush.bf16.msrb.mxu0 %v6534_v39  ;;  %v7371_v39 = vld [vmem:[%s8714_s6 + $0x94] sm:$0xf] }
 0x7a7   : > { %v3534_v44 = vpop.xlane.xlu1 %3533 }
 0x7a8   : > { %v3542_v45 = vsub.f32 %v3525_v61, %v3534_v44 }
 0x7aa   : > { %v7647_v46 = vpop.eup %7646  ;;  %v3547_v47 = vmul.f32 1.442695, %v3542_v45  ;;  %v6566_v45 = vor.u32 %v7360_v43, %v6565_v28  ;;  %v6487_v28 = vld [vmem:[%s8714_s6 + $0x98] sm:$0xf0] }
 0x7ab   : > { %v3559_v48 = vsel %vm3528_vm9, %v7647_v46, 0.0  ;;  %v6490_v43 = vor.u32 %v7371_v39, %v6487_v28  ;;  %v7409_v39 = vld [vmem:[%s8722_s28 + $0xc4] sm:$0xf] }
 0x7ac   : > { %7648 = vpow2.f32 %v3547_v47  ;;  %3560 = vadd.xlane.f32.xlu0 %v3559_v48  ;;  %v6567_v47 = vld [vmem:[%s8714_s6 + $0x38] sm:$0xf0]  ;;  %v6525_v48 = vld [vmem:[%s8714_s6 + $0xe0] sm:$0xf]  ;;  %3851 = vmatpush.bf16.msrb.mxu2 %v6566_v45  ;;  %v7370_v45 = vld [vmem:[%s8714_s6 + $0x84] sm:$0xf0] }
 0x7ad   : > { %v7441_v28 = vld [vmem:[%s8722_s28 + $0x1c4] sm:$0xf] }
 0x7af   : > { %v3540_v49 = vpop.xlane.xlu0 %3539 }
 0x7b0   : > { %v3544_v50 = vsub.f32 %v3527_v27, %v3540_v49  ;;  %v7361_v27 = vld [vmem:[%s8714_s6 + $0x44] sm:$0xf] }
 0x7b1   : > { %v6578_v34 = vor.u32 %v7361_v27, %v6575_v32  ;;  %v7374_v27 = vld [vmem:[%s8714_s6 + $0xa4] sm:$0xf0] }
 0x7b2   : > { %v7649_v51 = vpop.eup %7648  ;;  %v3551_v36 = vmul.f32 1.442695, %v3544_v50  ;;  %v7382_v50 = vld [vmem:[%s8714_s6 + $0xe4] sm:$0xf0]  ;;  %v6494_v32 = vor.u32 %v7374_v27, %v6493_v31  ;;  %v6847_v27 = vld [vmem:[%s8722_s28 + $0x1f0] sm:$0xf0] }
 0x7b3   : > { %v3556_v52 = vsel %vm3528_vm9, %v7649_v51, 0.0  ;;  %3864 = vmatpush.bf16.msrb.mxu3 %v6578_v34  ;;  %v6495_v34 = vld [vmem:[%s8714_s6 + $0xa8] sm:$0xf0] }
 0x7b4   : > { %7650 = vpow2.f32 %v3551_v36  ;;  %3557 = vadd.xlane.f32.xlu2 %v3556_v52  ;;  %v6527_v36 = vld [vmem:[%s8714_s6 + $0xe8] sm:$0xf0]  ;;  %v6526_v52 = vor.u32 %v7382_v50, %v6525_v48  ;;  %v6498_v35 = vor.u32 %v7373_v29, %v6495_v34  ;;  %v6829_v34 = vld [vmem:[%s8722_s28 + $0x1c0] sm:$0xf] }
 0x7b5   : > { %v6479_v48 = vld [vmem:[%s8714_s6 + $0x88] sm:$0xf0] }
 0x7b6   : > { %3740 = vmatpush.bf16.msrb.mxu0 %v6526_v52 }
 0x7ba   : > { %v7651_v53 = vpop.eup %7650  ;;  %3741 = vmatpush.bf16.msrb.mxu0 %v6518_v62 }
 0x7bb   : > { %v3562_v54 = vsel %vm3528_vm9, %v7651_v53, 0.0 }
 0x7bc   : > { %3563 = vadd.xlane.f32.xlu1 %v3562_v54  ;;  %v6557_v54 = vld [vmem:[%s8714_s6 + $0x20] sm:$0xf] }
 0x817   : > { %v3555_v55 = vpop.xlane.xlu1 %3554 }
 0x818   : > { %7652 = vrcp.f32 %v3555_v55  ;;  %v7358_v55 = vld [vmem:[%s8714_s6 + $0x24] sm:$0xf0] }
 0x819   : > { %v6558_v57 = vor.u32 %v7358_v55, %v6557_v54 }
 0x81b   : > { %3852 = vmatpush.bf16.msrb.mxu2 %v6558_v57 }
 0x81e   : > { %v7653_v6 = vpop.eup %7652 }
 0x81f   : > { %v3569_v8 = vmul.f32 %v7653_v6, %v7645_v40  ;;  %v3561_v9 = vpop.xlane.xlu0 %3560  ;;  %v6535_v40 = vld [vmem:[%s8714_s6 + $0xf8] sm:$0xf0]  ;;  %v7356_v6 = vld [vmem:[%s8714_s6 + $0x14] sm:$0xf0] }
 0x820   : > { %7654 = vrcp.f32 %v3561_v9  ;;  %v6538_v44 = vor.u32 %v7383_v38, %v6535_v40  ;;  %v7355_v9 = vld [vmem:[%s8714_s6 + $0x14] sm:$0xf]  ;;  %v7372_v38 = vld [vmem:[%s8714_s6 + $0x94] sm:$0xf0] }
 0x821   : > { %v3573_v12 = vpack.c.bf16 %v3569_v8, %v3569_v8  ;;  %v6550_v8 = vor.u32 %v7356_v6, %v6549_v22  ;;  %v6554_v10 = vor.u32 %v7355_v9, %v6551_v41  ;;  %v6486_v40 = vor.u32 %v7372_v38, %v6485_v37 }
 0x822   : > { %3753 = vmatpush.bf16.msrb.mxu1 %v6538_v44  ;;  %v6477_v44 = vld [vmem:[%s8714_s6 + $0x80] sm:$0xf] }
 0x823   : > { %6471 = vmatmul.msk.bf16.vlgmr.msra.gmra.mxu0 %vm3528_vm9, %v3573_v12  ;;  %3853 = vmatpush.bf16.msrb.mxu2 %v6550_v8  ;;  %v6510_v12 = vor.u32 %v7378_v4, %v6509_v42 }
 0x825   : > { %3742 = vmatpush.bf16.msrb.mxu0 %v6510_v12 }
 0x826   : > { %v7655_v1 = vpop.eup %7654 }
 0x827   : > { %v3571_v15 = vmul.f32 %v7655_v1, %v7647_v46  ;;  %v3558_v16 = vpop.xlane.xlu2 %3557  ;;  %v7359_v46 = vld [vmem:[%s8714_s6 + $0x34] sm:$0xf]  ;;  %v6541_v1 = vld [vmem:[%s8714_s6] sm:$0xf] }
 0x828   : > { %7656 = vrcp.f32 %v3558_v16  ;;  %v6570_v49 = vor.u32 %v7359_v46, %v6567_v47  ;;  %v7353_v16 = vld [vmem:[%s8714_s6 + $0x4] sm:$0xf]  ;;  %v6478_v47 = vor.u32 %v7370_v45, %v6477_v44  ;;  %v6831_v44 = vld [vmem:[%s8722_s28 + $0x1d0] sm:$0xf0] }
 0x829   : > { %v3575_v23 = vpack.c.bf16 %v3571_v15, %v3571_v15  ;;  %v7354_v15 = vld [vmem:[%s8714_s6 + $0x4] sm:$0xf0]  ;;  %v7369_v46 = vld [vmem:[%s8714_s6 + $0x84] sm:$0xf]  ;;  %v6834_v45 = vor.u32 %v7441_v28, %v6831_v44 }
 0x82a   : > { %3865 = vmatpush.bf16.msrb.mxu3 %v6570_v49  ;;  %v6482_v49 = vor.u32 %v7369_v46, %v6479_v48  ;;  %v7425_v28 = vld [vmem:[%s8722_s28 + $0x144] sm:$0xf] }
 0x82b   : > { %6473 = vmatmul.msk.bf16.vlgmr.msra.gmra.mxu2 %vm3528_vm9, %v3575_v23  ;;  %v6542_v23 = vor.u32 %v7354_v15, %v6541_v1 }
 0x82d   : > { %3854 = vmatpush.bf16.msrb.mxu2 %v6542_v23 }
 0x82e   : > { %v7657_v17 = vpop.eup %7656  ;;  %3866 = vmatpush.bf16.msrb.mxu3 %v6562_v60  ;;  %v3419_v60 = vld [vmem:[%s9924_s18] sm:$0x3] }
 0x82f   : > { %v3570_v18 = vmul.f32 %v7657_v17, %v7649_v51  ;;  %v3564_v20 = vpop.xlane.xlu1 %3563  ;;  %v7381_v51 = vld [vmem:[%s8714_s6 + $0xe4] sm:$0xf]  ;;  %v6543_v17 = vld [vmem:[%s8714_s6 + $0x8] sm:$0xf0]  ;;  %v3876_v3 = vperm.slane %v3419_v60, 0  ;;  %v3877_v62 = vperm.slane %v3419_v60, 1 }
 0x830   : > { %7658 = vrcp.f32 %v3564_v20  ;;  %v6501_v20 = vld [vmem:[%s8714_s6 + $0xb0] sm:$0xf]  ;;  %v6685_v60 = vld [vmem:[%s8722_s28 + $0xa0] sm:$0xf] }
 0x831   : > { %v3574_v21 = vpack.c.bf16 %v3570_v18, %v3570_v18  ;;  %v6546_v18 = vor.u32 %v7353_v16, %v6543_v17  ;;  %v6717_v17 = vld [vmem:[%s8722_s28 + $0xe0] sm:$0xf] }
 0x832   : > { %3867 = vmatpush.bf16.msrb.mxu3 %v6554_v10 }
 0x833   : > { %6472 = vmatmul.msk.bf16.vlgmr.msra.gmra.mxu1 %vm3528_vm9, %v3574_v21  ;;  %v7376_v21 = vld [vmem:[%s8714_s6 + $0xb4] sm:$0xf0] }
 0x836   : > { %v7659_v61 = vpop.eup %7658  ;;  %3868 = vmatpush.bf16.msrb.mxu3 %v6546_v18  ;;  %v7415_v18 = vld [vmem:[%s8722_s28 + $0xec] sm:$0xf0] }
 0x837   : > { %v3572_v24 = vmul.f32 %v7659_v61, %v7651_v53  ;;  %v6530_v53 = vor.u32 %v7381_v51, %v6527_v36  ;;  %v7375_v61 = vld [vmem:[%s8714_s6 + $0xb4] sm:$0xf] }
 0x839   : > { %v3576_v25 = vpack.c.bf16 %v3572_v24, %v3572_v24  ;;  %3754 = vmatpush.bf16.msrb.mxu1 %v6530_v53  ;;  %v6502_v24 = vor.u32 %v7376_v21, %v6501_v20  ;;  %v6845_v20 = vld [vmem:[%s8722_s28 + $0x1e0] sm:$0xf]  ;;  %v6718_v21 = vor.u32 %v7415_v18, %v6717_v17  ;;  %v7399_v17 = vld [vmem:[%s8722_s28 + $0x6c] sm:$0xf0] }
 0x83a   : > { %v6781_v18 = vld [vmem:[%s8722_s28 + $0x160] sm:$0xf] }
 0x83b   : > { %6474 = vmatmul.msk.bf16.vlgmr.msra.gmra.mxu3 %vm3528_vm9, %v3576_v25  ;;  %v6503_v25 = vld [vmem:[%s8714_s6 + $0xb8] sm:$0xf0]  ;;  %3743 = vmatpush.bf16.msrb.mxu0 %v6502_v24  ;;  %v7413_v24 = vld [vmem:[%s8722_s28 + $0xe4] sm:$0xf] }
 0x83c   : > { %v6506_v26 = vor.u32 %v7375_v61, %v6503_v25  ;;  %v7447_v61 = vld [vmem:[%s8722_s28 + $0x1ec] sm:$0xf0]  ;;  %v6719_v25 = vld [vmem:[%s8722_s28 + $0xf0] sm:$0xf0] }
 0x83d   : > { %3755 = vmatpush.bf16.msrb.mxu1 %v6522_v7  ;;  %v6722_v31 = vor.u32 %v7413_v24, %v6719_v25  ;;  %v6655_v24 = vld [vmem:[%s8722_s28 + $0x70] sm:$0xf0] }
 0x83f   : > { %3744 = vmatpush.bf16.msrb.mxu0 %v6494_v32  ;;  %v7411_v32 = vld [vmem:[%s8722_s28 + $0xcc] sm:$0xf0]  ;;  %4382 = vmatpush.bf16.msra.mxu2 %v6722_v31  ;;  %v7429_v31 = vld [vmem:[%s8722_s28 + $0x164] sm:$0xf] }
 0x841   : > { %3756 = vmatpush.bf16.msrb.mxu1 %v6514_v14 }
 0x843   : > { %3745 = vmatpush.bf16.msrb.mxu0 %v6486_v40  ;;  %v6703_v40 = vld [vmem:[%s8722_s28 + $0xd0] sm:$0xf0] }
 0x845   : > { %3757 = vmatpush.bf16.msrb.mxu1 %v6506_v26  ;;  %v6846_v26 = vor.u32 %v7447_v61, %v6845_v20  ;;  %v7397_v61 = vld [vmem:[%s8722_s28 + $0x64] sm:$0xf] }
 0x847   : > { %3746 = vmatpush.bf16.msrb.mxu0 %v6478_v47 }
 0x849   : > { %3758 = vmatpush.bf16.msrb.mxu1 %v6498_v35  ;;  %v7443_v35 = vld [vmem:[%s8722_s28 + $0x1cc] sm:$0xf0] }
 0x84a   : > { %v6830_v38 = vor.u32 %v7443_v35, %v6829_v34  ;;  %v7427_v35 = vld [vmem:[%s8722_s28 + $0x14c] sm:$0xf0] }
 0x84b   : > { %4354 = vmatpush.bf16.msra.mxu0 %v6718_v21  ;;  %v7431_v21 = vld [vmem:[%s8722_s28 + $0x16c] sm:$0xf0] }
 0x84c   : > { %v6782_v25 = vor.u32 %v7431_v21, %v6781_v18  ;;  %v6837_v21 = vld [vmem:[%s8722_s28 + $0x1c8] sm:$0xf] }
 0x84d   : > { %3759 = vmatpush.bf16.msrb.mxu1 %v6490_v43  ;;  %v6706_v43 = vor.u32 %v7409_v39, %v6703_v40 }
 0x84f   : > { %4383 = vmatpush.bf16.msra.mxu2 %v6706_v43  ;;  %v6767_v43 = vld [vmem:[%s8722_s28 + $0x150] sm:$0xf0] }
 0x850   : > { %v6770_v44 = vor.u32 %v7425_v28, %v6767_v43 }
 0x851   : > { %3760 = vmatpush.bf16.msrb.mxu1 %v6482_v49 }
 0x855   : > { %4368 = vmatpush.bf16.msra.mxu1 %v6846_v26  ;;  %v6658_v26 = vor.u32 %v7397_v61, %v6655_v24  ;;  %v7444_v61 = vld [vmem:[%s8722_s28 + $0x1d4] sm:$0xf0]  ;;  %v7410_v24 = vld [vmem:[%s8722_s28 + $0xcc] sm:$0xf] }
 0x859   : > { %4369 = vmatpush.bf16.msra.mxu1 %v6830_v38  ;;  %v6639_v38 = vld [vmem:[%s8722_s28 + $0x50] sm:$0xf0] }
 0x8a0   : > { %v3593_v50 = vpop.f32.mrf.mxu0 }
 0x8a8   : > { %v3595_v51 = vpop.f32.mrf.mxu0 }
 0x8ae   : > { %v3633_v36 = vpop.f32.mrf.mxu2 }
 0x8b0   : > { %v3613_v52 = vpop.f32.mrf.mxu1 }
 0x8b1   : > { %v3657_v53 = vpack.c.bf16 %v3613_v52, %v3593_v50 }
 0x8b3   : > { %3855 = vmatmul.bf16.vlgmr.msrb.gmra.mxu2 %v3657_v53  ;;  %3869 = vmatmul.bf16.vlgmr.msrb.gmra.mxu3 %v3657_v53 }
 0x8b6   : > { %v3635_v54 = vpop.f32.mrf.mxu2 }
 0x8b8   : > { %v3615_v55 = vpop.f32.mrf.mxu1 }
 0x8be   : > { %v3653_v56 = vpop.f32.mrf.mxu3 }
 0x8bf   : > { %v3658_v57 = vpack.c.bf16 %v3653_v56, %v3633_v36 }
 0x8c1   : > { %3747 = vmatmul.bf16.vlgmr.msrb.gmra.mxu0 %v3658_v57  ;;  %3761 = vmatmul.bf16.vlgmr.msrb.gmra.mxu1 %v3658_v57 }
 0x8c6   : > { %v3655_v59 = vpop.f32.mrf.mxu3 }
 0x936   : > { %v3856_v33 = vpop.f32.mrf.mxu2  ;;  %v3870_v2 = vpop.f32.mrf.mxu3 }
 0x93e   : > { %v3748_v5 = vpop.f32.mrf.mxu0  ;;  %v3762_v22 = vpop.f32.mrf.mxu1 }
 0x93f   : > { %v3857_v6 = vadd.f32 %v3856_v33, %v3748_v5  ;;  %v3871_v7 = vadd.f32 %v3870_v2, %v3762_v22  ;;  %v3858_v42 = vpop.f32.mrf.mxu2  ;;  %v3872_v4 = vpop.f32.mrf.mxu3  ;;  %v7407_v33 = vld [vmem:[%s8722_s28 + $0xac] sm:$0xf0]  ;;  %v6813_v2 = vld [vmem:[%s8722_s28 + $0x1a0] sm:$0xf]  ;;  %v7405_v5 = vld [vmem:[%s8722_s28 + $0xa4] sm:$0xf] }
 0x940   : > { %v6687_v22 = vld [vmem:[%s8722_s28 + $0xb0] sm:$0xf0] }
 0x941   : > { %v3880_v8 = vadd.f32 %v3876_v3, %v3857_v6  ;;  %v3881_v9 = vadd.f32 %v3877_v62, %v3871_v7  ;;  %v6690_v7 = vor.u32 %v7405_v5, %v6687_v22  ;;  %v7419_v5 = vld [vmem:[%s8722_s28 + $0x10c] sm:$0xf0]  ;;  %v7385_v22 = vld [vmem:[%s8722_s28 + $0x4] sm:$0xf] }
 0x943   : > { %v3884_v41 = vadd.f32 %v3880_v8, %v9242_v63  ;;  %v3885_v10 = vadd.f32 %v3881_v9, %v9246_v58  ;;  %v7437_v8 = vld [vmem:[%s8722_s28 + $0x1a4] sm:$0xf]  ;;  %v6815_v9 = vld [vmem:[%s8722_s28 + $0x1b0] sm:$0xf0]  ;;  %4384 = vmatpush.bf16.msra.mxu2 %v6690_v7 }
 0x945   : > { %v3888_v11 = vadd.f32 %v3885_v10, %v3884_v41 }
 0x946   : > { %v3750_v12 = vpop.f32.mrf.mxu0  ;;  %v3764_v13 = vpop.f32.mrf.mxu1 }
 0x947   : > { %v3859_v14 = vadd.f32 %v3858_v42, %v3750_v12  ;;  %v3873_v1 = vadd.f32 %v3872_v4, %v3764_v13  ;;  %3889 = vadd.xlane.f32.xlu2 %v3888_v11  ;;  %v7403_v42 = vld [vmem:[%s8722_s28 + $0x8c] sm:$0xf0]  ;;  %v6797_v4 = vld [vmem:[%s8722_s28 + $0x180] sm:$0xf]  ;;  %v7401_v13 = vld [vmem:[%s8722_s28 + $0x84] sm:$0xf] }
 0x948   : > { %v7435_v12 = vld [vmem:[%s8722_s28 + $0x18c] sm:$0xf0] }
 0x949   : > { %v3882_v15 = vadd.f32 %v3876_v3, %v3859_v14  ;;  %v3883_v63 = vadd.f32 %v3877_v62, %v3873_v1  ;;  %v6686_v3 = vor.u32 %v7407_v33, %v6685_v60  ;;  %v7439_v62 = vld [vmem:[%s8722_s28 + $0x1ac] sm:$0xf0]  ;;  %v6671_v14 = vld [vmem:[%s8722_s28 + $0x90] sm:$0xf0]  ;;  %v6798_v1 = vor.u32 %v7435_v12, %v6797_v4  ;;  %v6605_v33 = vld [vmem:[%s8722_s28] sm:$0xf] }
 0x94a   : > { %v6814_v6 = vor.u32 %v7439_v62, %v6813_v2  ;;  %v7387_v2 = vld [vmem:[%s8722_s28 + $0xc] sm:$0xf0]  ;;  %v7416_v4 = vld [vmem:[%s8722_s28 + $0xf4] sm:$0xf0] }
 0x94b   : > { %v3886_v58 = vadd.f32 %v3882_v15, %v9244_v0  ;;  %v3887_v16 = vadd.f32 %v3883_v63, %v9248_v30  ;;  %v7445_v0 = vld [vmem:[%s8722_s28 + $0x1e4] sm:$0xf]  ;;  %v6701_v30 = vld [vmem:[%s8722_s28 + $0xc0] sm:$0xf]  ;;  %v6674_v15 = vor.u32 %v7401_v13, %v6671_v14  ;;  %v6606_v62 = vor.u32 %v7387_v2, %v6605_v33  ;;  %v7448_v12 = vld [vmem:[%s8722_s28 + $0x1f4] sm:$0xf0] }
 0x94c   : > { %v6850_v29 = vor.u32 %v7445_v0, %v6847_v27  ;;  %v6702_v37 = vor.u32 %v7411_v32, %v6701_v30  ;;  %4370 = vmatpush.bf16.msra.mxu1 %v6814_v6  ;;  %v7433_v63 = vld [vmem:[%s8722_s28 + $0x184] sm:$0xf]  ;;  %v6783_v0 = vld [vmem:[%s8722_s28 + $0x170] sm:$0xf0]  ;;  %v6637_v30 = vld [vmem:[%s8722_s28 + $0x40] sm:$0xf] }
 0x94d   : > { %v3891_v23 = vadd.f32 %v3887_v16, %v3886_v58  ;;  %4385 = vmatpush.bf16.msra.mxu2 %v6674_v15  ;;  %v6786_v27 = vor.u32 %v7429_v31, %v6783_v0  ;;  %v6765_v32 = vld [vmem:[%s8722_s28 + $0x140] sm:$0xf]  ;;  %v6607_v6 = vld [vmem:[%s8722_s28 + $0x10] sm:$0xf0]  ;;  %v6727_v15 = vld [vmem:[%s8722_s28 + $0xf8] sm:$0xf0] }
 0x94e   : > { %4396 = vmatpush.bf16.msra.mxu3 %v6850_v29  ;;  %4355 = vmatpush.bf16.msra.mxu0 %v6702_v37  ;;  %v7395_v29 = vld [vmem:[%s8722_s28 + $0x4c] sm:$0xf0]  ;;  %v7393_v37 = vld [vmem:[%s8722_s28 + $0x44] sm:$0xf]  ;;  %v6766_v39 = vor.u32 %v7427_v35, %v6765_v32  ;;  %v7442_v31 = vld [vmem:[%s8722_s28 + $0x1cc] sm:$0xf] }
 0x94f   : > { %3892 = vadd.xlane.f32.xlu0 %v3891_v23  ;;  %v6653_v23 = vld [vmem:[%s8722_s28 + $0x60] sm:$0xf]  ;;  %v6638_v34 = vor.u32 %v7395_v29, %v6637_v30  ;;  %v6642_v40 = vor.u32 %v7393_v37, %v6639_v38  ;;  %v6839_v0 = vld [vmem:[%s8722_s28 + $0x1d8] sm:$0xf0]  ;;  %v6693_v29 = vld [vmem:[%s8722_s28 + $0xa8] sm:$0xf] }
 0x950   : > { %4371 = vmatpush.bf16.msra.mxu1 %v6798_v1  ;;  %v6654_v20 = vor.u32 %v7399_v17, %v6653_v23  ;;  %v7414_v1 = vld [vmem:[%s8722_s28 + $0xec] sm:$0xf]  ;;  %v6709_v23 = vld [vmem:[%s8722_s28 + $0xc8] sm:$0xf]  ;;  %v7412_v17 = vld [vmem:[%s8722_s28 + $0xd4] sm:$0xf0]  ;;  %v6842_v30 = vor.u32 %v7442_v31, %v6839_v0 }
 0x951   : > { %4386 = vmatpush.bf16.msra.mxu2 %v6658_v26  ;;  %v6711_v26 = vld [vmem:[%s8722_s28 + $0xd8] sm:$0xf0]  ;;  %v7408_v32 = vld [vmem:[%s8722_s28 + $0xb4] sm:$0xf0]  ;;  %v7406_v38 = vld [vmem:[%s8722_s28 + $0xac] sm:$0xf] }
 0x952   : > { %4397 = vmatpush.bf16.msra.mxu3 %v6834_v45  ;;  %4356 = vmatpush.bf16.msra.mxu0 %v6686_v3  ;;  %v6621_v45 = vld [vmem:[%s8722_s28 + $0x20] sm:$0xf]  ;;  %v6694_v35 = vor.u32 %v7408_v32, %v6693_v29  ;;  %v7440_v37 = vld [vmem:[%s8722_s28 + $0x1b4] sm:$0xf0]  ;;  %v7434_v33 = vld [vmem:[%s8722_s28 + $0x18c] sm:$0xf] }
 0x953   : > { %v6733_v3 = vld [vmem:[%s8722_s28 + $0x100] sm:$0xf]  ;;  %v6807_v2 = vld [vmem:[%s8722_s28 + $0x198] sm:$0xf0]  ;;  %v7392_v0 = vld [vmem:[%s8722_s28 + $0x34] sm:$0xf0] }
 0x954   : > { %4372 = vmatpush.bf16.msra.mxu1 %v6782_v25  ;;  %v6734_v7 = vor.u32 %v7419_v5, %v6733_v3  ;;  %v6838_v25 = vor.u32 %v7444_v61, %v6837_v21  ;;  %v6661_v5 = vld [vmem:[%s8722_s28 + $0x68] sm:$0xf]  ;;  %v7390_v32 = vld [vmem:[%s8722_s28 + $0x2c] sm:$0xf] }
 0x955   : > { %4387 = vmatpush.bf16.msra.mxu2 %v6642_v40 }
 0x958   : > { %4373 = vmatpush.bf16.msra.mxu1 %v6766_v39  ;;  %v6695_v39 = vld [vmem:[%s8722_s28 + $0xb8] sm:$0xf0] }
 0x959   : > { %v6698_v43 = vor.u32 %v7406_v38, %v6695_v39  ;;  %v6759_v38 = vld [vmem:[%s8722_s28 + $0x138] sm:$0xf0] }
 0x9ba   : > { %v3890_v46 = vpop.xlane.xlu2 %3889 }
 0x9bb   : > { %v3894_v47 = vmul.f32 %v3890_v46, %v9092_v19  ;;  %v7391_v46 = vld [vmem:[%s8722_s28 + $0x2c] sm:$0xf0] }
 0x9bd   : > { %v9462_v48 = vsub.f32 %v3884_v41, %v3894_v47  ;;  %v9464_v49 = vsub.f32 %v3885_v10, %v3894_v47  ;;  %v6818_v41 = vor.u32 %v7437_v8, %v6815_v9  ;;  %v6669_v10 = vld [vmem:[%s8722_s28 + $0x80] sm:$0xf]  ;;  %v6610_v8 = vor.u32 %v7385_v22, %v6607_v6  ;;  %v7417_v9 = vld [vmem:[%s8722_s28 + $0x104] sm:$0xf]  ;;  %v7400_v22 = vld [vmem:[%s8722_s28 + $0x74] sm:$0xf0] }
 0x9be   : > { %v6670_v11 = vor.u32 %v7403_v42, %v6669_v10  ;;  %v6749_v47 = vld [vmem:[%s8722_s28 + $0x120] sm:$0xf]  ;;  %v6725_v10 = vld [vmem:[%s8722_s28 + $0xe8] sm:$0xf] }
 0x9bf   : > { %v3900_v50 = vmul.f32 %v9462_v48, %v9462_v48  ;;  %v3901_v51 = vmul.f32 %v9464_v49, %v9464_v49  ;;  %4398 = vmatpush.bf16.msra.mxu3 %v6818_v41  ;;  %v6735_v41 = vld [vmem:[%s8722_s28 + $0x110] sm:$0xf0]  ;;  %v6726_v13 = vor.u32 %v7416_v4, %v6725_v10  ;;  %v6789_v6 = vld [vmem:[%s8722_s28 + $0x168] sm:$0xf] }
 0x9c0   : > { %4357 = vmatpush.bf16.msra.mxu0 %v6670_v11  ;;  %v6738_v42 = vor.u32 %v7417_v9, %v6735_v41  ;;  %v6853_v11 = vld [vmem:[%s8722_s28 + $0x1e8] sm:$0xf]  ;;  %v7398_v9 = vld [vmem:[%s8722_s28 + $0x6c] sm:$0xf]  ;;  %v6663_v41 = vld [vmem:[%s8722_s28 + $0x78] sm:$0xf0] }
 0x9c1   : > { %v3904_v36 = vadd.f32 %v3901_v51, %v3900_v50  ;;  %v6622_v50 = vor.u32 %v7391_v46, %v6621_v45  ;;  %v7423_v51 = vld [vmem:[%s8722_s28 + $0x12c] sm:$0xf0]  ;;  %v6854_v14 = vor.u32 %v7448_v12, %v6853_v11  ;;  %v6823_v45 = vld [vmem:[%s8722_s28 + $0x1b8] sm:$0xf0]  ;;  %v6666_v4 = vor.u32 %v7398_v9, %v6663_v41  ;;  %v7430_v11 = vld [vmem:[%s8722_s28 + $0x16c] sm:$0xf] }
 0x9c2   : > { %v3893_v52 = vpop.xlane.xlu0 %3892  ;;  %v6791_v12 = vld [vmem:[%s8722_s28 + $0x178] sm:$0xf0] }
 0x9c3   : > { %v3895_v53 = vmul.f32 %v3893_v52, %v9092_v19  ;;  %3905 = vadd.xlane.f32.xlu1 %v3904_v36  ;;  %v7389_v36 = vld [vmem:[%s8722_s28 + $0x24] sm:$0xf]  ;;  %v6623_v52 = vld [vmem:[%s8722_s28 + $0x30] sm:$0xf0] }
 0x9c4   : > { %4358 = vmatpush.bf16.msra.mxu0 %v6654_v20  ;;  %v6710_v20 = vor.u32 %v7412_v17, %v6709_v23  ;;  %v6647_v23 = vld [vmem:[%s8722_s28 + $0x58] sm:$0xf0]  ;;  %v7426_v17 = vld [vmem:[%s8722_s28 + $0x14c] sm:$0xf] }
 0x9c5   : > { %v9471_v54 = vsub.f32 %v3886_v58, %v3895_v53  ;;  %v9473_v55 = vsub.f32 %v3887_v16, %v3895_v53  ;;  %v6799_v58 = vld [vmem:[%s8722_s28 + $0x190] sm:$0xf0]  ;;  %v6750_v53 = vor.u32 %v7423_v51, %v6749_v47  ;;  %v7404_v51 = vld [vmem:[%s8722_s28 + $0x94] sm:$0xf0] }
 0x9c6   : > { %v6802_v16 = vor.u32 %v7433_v63, %v6799_v58  ;;  %v7446_v63 = vld [vmem:[%s8722_s28 + $0x1ec] sm:$0xf]  ;;  %v6730_v58 = vor.u32 %v7414_v1, %v6727_v15  ;;  %v6794_v1 = vor.u32 %v7430_v11, %v6791_v12  ;;  %v7396_v15 = vld [vmem:[%s8722_s28 + $0x54] sm:$0xf0] }
 0x9c7   : > { %v3902_v56 = vmul.f32 %v9471_v54, %v9471_v54  ;;  %v3903_v57 = vmul.f32 %v9473_v55, %v9473_v55  ;;  %4374 = vmatpush.bf16.msra.mxu1 %v6750_v53 }
 0x9c8   : > { %4399 = vmatpush.bf16.msra.mxu3 %v6802_v16  ;;  %4359 = vmatpush.bf16.msra.mxu0 %v6638_v34  ;;  %v6855_v16 = vld [vmem:[%s8722_s28 + $0x1f8] sm:$0xf0]  ;;  %v6821_v34 = vld [vmem:[%s8722_s28 + $0x1a8] sm:$0xf] }
 0x9c9   : > { %v3907_v59 = vadd.f32 %v3903_v57, %v3902_v56  ;;  %v6626_v56 = vor.u32 %v7389_v36, %v6623_v52  ;;  %v7421_v57 = vld [vmem:[%s8722_s28 + $0x124] sm:$0xf]  ;;  %v6858_v18 = vor.u32 %v7446_v63, %v6855_v16  ;;  %v6822_v28 = vor.u32 %v7440_v37, %v6821_v34  ;;  %v6805_v36 = vld [vmem:[%s8722_s28 + $0x188] sm:$0xf]  ;;  %v7394_v16 = vld [vmem:[%s8722_s28 + $0x4c] sm:$0xf] }
 0x9ca   : > { %v6773_v63 = vld [vmem:[%s8722_s28 + $0x148] sm:$0xf]  ;;  %v6650_v31 = vor.u32 %v7394_v16, %v6647_v23  ;;  %v6631_v34 = vld [vmem:[%s8722_s28 + $0x38] sm:$0xf0]  ;;  %v7422_v37 = vld [vmem:[%s8722_s28 + $0x12c] sm:$0xf] }
 0x9cb   : > { %3908 = vadd.xlane.f32.xlu2 %v3907_v59  ;;  %v6751_v59 = vld [vmem:[%s8722_s28 + $0x130] sm:$0xf0]  ;;  %4388 = vmatpush.bf16.msra.mxu2 %v6626_v56  ;;  %v7436_v56 = vld [vmem:[%s8722_s28 + $0x194] sm:$0xf0] }
 0x9cc   : > { %4400 = vmatpush.bf16.msra.mxu3 %v6786_v27  ;;  %4360 = vmatpush.bf16.msra.mxu0 %v6622_v50  ;;  %v6754_v60 = vor.u32 %v7421_v57, %v6751_v59  ;;  %v6714_v27 = vor.u32 %v7410_v24, %v6711_v26  ;;  %v6677_v50 = vld [vmem:[%s8722_s28 + $0x88] sm:$0xf]  ;;  %v7402_v57 = vld [vmem:[%s8722_s28 + $0x8c] sm:$0xf]  ;;  %v6806_v59 = vor.u32 %v7436_v56, %v6805_v36  ;;  %v6775_v24 = vld [vmem:[%s8722_s28 + $0x158] sm:$0xf0] }
 0x9cd   : > { %4375 = vmatpush.bf16.msra.mxu1 %v6734_v7  ;;  %v6678_v53 = vor.u32 %v7404_v51, %v6677_v50  ;;  %v6662_v7 = vor.u32 %v7400_v22, %v6661_v5  ;;  %v6778_v29 = vor.u32 %v7426_v17, %v6775_v24  ;;  %v6762_v50 = vor.u32 %v7422_v37, %v6759_v38  ;;  %v7386_v51 = vld [vmem:[%s8722_s28 + $0xc] sm:$0xf]  ;;  %v6615_v36 = vld [vmem:[%s8722_s28 + $0x18] sm:$0xf0]  ;;  %v7480_v24 = vld [vmem:[%s8731_s25 + $0xf4] sm:$0xf0] }
 0x9ce   : > { %v7418_v56 = vld [vmem:[%s8722_s28 + $0x10c] sm:$0xf]  ;;  %v7462_v37 = vld [vmem:[%s8731_s25 + $0x64] sm:$0xf0] }
 0x9cf   : > { %4389 = vmatpush.bf16.msra.mxu2 %v6610_v8  ;;  %v7432_v8 = vld [vmem:[%s8722_s28 + $0x174] sm:$0xf0] }
 0x9d0   : > { %4401 = vmatpush.bf16.msra.mxu3 %v6770_v44  ;;  %4361 = vmatpush.bf16.msra.mxu0 %v6606_v62  ;;  %v7438_v44 = vld [vmem:[%s8722_s28 + $0x1ac] sm:$0xf]  ;;  %v6810_v62 = vor.u32 %v7434_v33, %v6807_v2 }
 0x9d1   : > { %4424 = vmatpush.bf16.msrb.mxu1 %v6854_v14  ;;  %v6826_v47 = vor.u32 %v7438_v44, %v6823_v45  ;;  %v6634_v45 = vor.u32 %v7390_v32, %v6631_v34 }
 0x9d3   : > { %4438 = vmatpush.bf16.msrb.mxu2 %v6730_v58  ;;  %v7428_v58 = vld [vmem:[%s8722_s28 + $0x154] sm:$0xf0] }
 0x9d4   : > { %4402 = vmatpush.bf16.msra.mxu3 %v6754_v60  ;;  %4410 = vmatpush.bf16.msrb.mxu0 %v6726_v13  ;;  %v6679_v60 = vld [vmem:[%s8722_s28 + $0x98] sm:$0xf0]  ;;  %v6645_v13 = vld [vmem:[%s8722_s28 + $0x48] sm:$0xf]  ;;  %v6774_v61 = vor.u32 %v7428_v58, %v6773_v63 }
 0x9d5   : > { %4425 = vmatpush.bf16.msrb.mxu1 %v6838_v25  ;;  %v6682_v3 = vor.u32 %v7402_v57, %v6679_v60  ;;  %v6646_v21 = vor.u32 %v7396_v15, %v6645_v13  ;;  %v6629_v25 = vld [vmem:[%s8722_s28 + $0x28] sm:$0xf]  ;;  %v6743_v57 = vld [vmem:[%s8722_s28 + $0x118] sm:$0xf0] }
 0x9d6   : > { %v6630_v39 = vor.u32 %v7392_v0, %v6629_v25  ;;  %v6746_v5 = vor.u32 %v7418_v56, %v6743_v57  ;;  %v7045_v25 = vld [vmem:[%s8731_s25 + $0x170] sm:$0xf]  ;;  %v7476_v57 = vld [vmem:[%s8731_s25 + $0xd4] sm:$0xf0] }
 0x9d7   : > { %4439 = vmatpush.bf16.msrb.mxu2 %v6714_v27  ;;  %v6757_v27 = vld [vmem:[%s8722_s28 + $0x128] sm:$0xf]  ;;  %v6965_v56 = vld [vmem:[%s8731_s25 + $0xd0] sm:$0xf] }
 0x9d8   : > { %4403 = vmatpush.bf16.msra.mxu3 %v6738_v42  ;;  %4411 = vmatpush.bf16.msrb.mxu0 %v6710_v20  ;;  %v6790_v42 = vor.u32 %v7432_v8, %v6789_v6  ;;  %v9603_v6 = vld [vmem:[%s8752_s13] sm:$0x77]  ;;  %s9925_s13 = sld [smem:[#allocation43_spill]] }
 0x9d9   : > { %4426 = vmatpush.bf16.msrb.mxu1 %v6822_v28  ;;  %v6613_v28 = vld [vmem:[%s8722_s28 + $0x8] sm:$0xf]  ;;  %v3939_v8 = vperm.slane %v9603_v6, 5 }
 0x9db   : > { %4440 = vmatpush.bf16.msrb.mxu2 %v6698_v43  ;;  %v7388_v43 = vld [vmem:[%s8722_s28 + $0x14] sm:$0xf0]  ;;  %v3943_v12 = vperm.slane %v3939_v8, 1  ;;  %v7474_v8 = vld [vmem:[%s8731_s25 + $0xc4] sm:$0xf0] }
 0x9dc   : > { %4452 = vmatpush.bf16.msrb.mxu3 %v6858_v18  ;;  %4412 = vmatpush.bf16.msrb.mxu0 %v6694_v35  ;;  %v6614_v60 = vor.u32 %v7388_v43, %v6613_v28  ;;  %v7037_v43 = vld [vmem:[%s8731_s25 + $0x160] sm:$0xf] }
 0x9dd   : > { %4427 = vmatpush.bf16.msrb.mxu1 %v6806_v59 }
 0x9df   : > { %4441 = vmatpush.bf16.msrb.mxu2 %v6682_v3 }
 0x9e0   : > { %4453 = vmatpush.bf16.msrb.mxu3 %v6842_v30  ;;  %4413 = vmatpush.bf16.msrb.mxu0 %v6678_v53  ;;  %v7424_v30 = vld [vmem:[%s8722_s28 + $0x134] sm:$0xf0] }
 0x9e1   : > { %4428 = vmatpush.bf16.msrb.mxu1 %v6790_v42 }
 0x9e3   : > { %4442 = vmatpush.bf16.msrb.mxu2 %v6666_v4 }
 0x9e4   : > { %4454 = vmatpush.bf16.msrb.mxu3 %v6826_v47  ;;  %4414 = vmatpush.bf16.msrb.mxu0 %v6662_v7  ;;  %v7420_v47 = vld [vmem:[%s8722_s28 + $0x114] sm:$0xf0]  ;;  %v3938_v7 = vperm.slane %v9603_v6, 1 }
 0x9e5   : > { %4429 = vmatpush.bf16.msrb.mxu1 %v6774_v61  ;;  %v7464_v61 = vld [vmem:[%s8731_s25 + $0x74] sm:$0xf0] }
 0x9e6   : > { %v3942_v11 = vperm.slane %v3938_v7, 1  ;;  %v6957_v7 = vld [vmem:[%s8731_s25 + $0xc0] sm:$0xf] }
 0x9e7   : > { %4443 = vmatpush.bf16.msrb.mxu2 %v6650_v31 }
 0x9e8   : > { %4455 = vmatpush.bf16.msrb.mxu3 %v6810_v62  ;;  %4415 = vmatpush.bf16.msrb.mxu0 %v6646_v21  ;;  %v6618_v62 = vor.u32 %v7386_v51, %v6615_v36  ;;  %v6917_v21 = vld [vmem:[%s8731_s25 + $0x70] sm:$0xf] }
 0x9e9   : > { %v6918_v34 = vor.u32 %v7464_v61, %v6917_v21  ;;  %v6901_v51 = vld [vmem:[%s8731_s25 + $0x50] sm:$0xf]  ;;  %v7450_v21 = vld [vmem:[%s8731_s25 + $0x4] sm:$0xf0]  ;;  %v7021_v61 = vld [vmem:[%s8731_s25 + $0x140] sm:$0xf] }
 0x9eb   : > { %4444 = vmatpush.bf16.msrb.mxu2 %v6634_v45  ;;  %v7494_v45 = vld [vmem:[%s8731_s25 + $0x164] sm:$0xf0] }
 0x9ec   : > { %4456 = vmatpush.bf16.msrb.mxu3 %v6794_v1  ;;  %4416 = vmatpush.bf16.msrb.mxu0 %v6630_v39  ;;  %v6973_v39 = vld [vmem:[%s8731_s25 + $0xe0] sm:$0xf] }
 0x9ef   : > { %4445 = vmatpush.bf16.msrb.mxu2 %v6618_v62  ;;  %v6893_v62 = vld [vmem:[%s8731_s25 + $0x40] sm:$0xf] }
 0x9f0   : > { %4457 = vmatpush.bf16.msrb.mxu3 %v6778_v29  ;;  %4417 = vmatpush.bf16.msrb.mxu0 %v6614_v60 }
 0x9f4   : > { %4458 = vmatpush.bf16.msrb.mxu3 %v6762_v50 }
 0x9f8   : > { %4459 = vmatpush.bf16.msrb.mxu3 %v6746_v5  ;;  %v6966_v5 = vor.u32 %v7476_v57, %v6965_v56  ;;  %v6983_v57 = vld [vmem:[%s8731_s25 + $0xf8] sm:$0xf0] }
 0xa36   : > { %v3906_v40 = vpop.xlane.xlu1 %3905 }
 0xa37   : > { %v3910_v46 = vmul.f32 %v3906_v40, %v9092_v19  ;;  %v6758_v40 = vor.u32 %v7424_v30, %v6757_v27  ;;  %v7109_v27 = vld [vmem:[%s8731_s25 + $0x1f0] sm:$0xf]  ;;  %v7512_v30 = vld [vmem:[%s8731_s25 + $0x1f4] sm:$0xf0] }
 0xa39   : > { %v9555_v52 = vadd.f32 1e-05, %v3910_v46  ;;  %v6741_v46 = vld [vmem:[%s8722_s28 + $0x108] sm:$0xf]  ;;  %4430 = vmatpush.bf16.msrb.mxu1 %v6758_v40  ;;  %v7478_v40 = vld [vmem:[%s8731_s25 + $0xe4] sm:$0xf0] }
 0xa3a   : > { %v6742_v33 = vor.u32 %v7420_v47, %v6741_v46  ;;  %v7101_v46 = vld [vmem:[%s8731_s25 + $0x1e0] sm:$0xf]  ;;  %v7510_v47 = vld [vmem:[%s8731_s25 + $0x1e4] sm:$0xf0]  ;;  %v6974_v36 = vor.u32 %v7478_v40, %v6973_v39  ;;  %v7013_v39 = vld [vmem:[%s8731_s25 + $0x130] sm:$0xf] }
 0xa3b   : > { %7660 = vrsqrt.f32 %v9555_v52  ;;  %vm3920_vm11 = vweird.f32 %v9555_v52  ;;  %v7102_v60 = vor.u32 %v7510_v47, %v7101_v46  ;;  %v7488_v40 = vld [vmem:[%s8731_s25 + $0x134] sm:$0xf0]  ;;  %v6925_v46 = vld [vmem:[%s8731_s25 + $0x80] sm:$0xf]  ;;  %v7466_v47 = vld [vmem:[%s8731_s25 + $0x84] sm:$0xf0] }
 0xa3d   : > { %4431 = vmatpush.bf16.msrb.mxu1 %v6742_v33  ;;  %v7029_v33 = vld [vmem:[%s8731_s25 + $0x150] sm:$0xf] }
 0xa3e   : > { %v3909_v10 = vpop.xlane.xlu2 %3908 }
 0xa3f   : > { %v3911_v14 = vmul.f32 %v3909_v10, %v9092_v19  ;;  %v9608_v10 = vld [vmem:[%s8757_s20] sm:$0x77]  ;;  %s9926_s20 = sld [smem:[#allocation38_spill]] }
 0xa40   : > { %v3948_v42 = vperm.slane %v9608_v10, 1 }
 0xa41   : > { %v7661_v18 = vpop.eup %7660  ;;  %v9579_v20 = vadd.f32 1e-05, %v3911_v14 }
 0xa42   : > { %v3915_v26 = vmul.f32 %v7661_v18, %v9555_v52  ;;  %vm3921_vm10 = vweird.f32 %v7661_v18  ;;  %v3949_v52 = vperm.slane %v9608_v10, 5  ;;  %v3952_v15 = vperm.slane %v3948_v42, 1  ;;  %v6885_v42 = vld [vmem:[%s8731_s25 + $0x30] sm:$0xf] }
 0xa43   : > { %7662 = vrsqrt.f32 %v9579_v20  ;;  %vm3922_vm12 = vmor %vm3920_vm11, %vm3921_vm10  ;;  %vm3930_vm14 = vweird.f32 %v9579_v20 }
 0xa44   : > { %v3916_v35 = vmul.f32 %v7661_v18, %v3915_v26  ;;  %v3953_v63 = vperm.slane %v3949_v52, 1  ;;  %v6958_v52 = vor.u32 %v7474_v8, %v6957_v7  ;;  %v7504_v7 = vld [vmem:[%s8731_s25 + $0x1b4] sm:$0xf0] }
 0xa45   : > { %p7115_p5 = scmp.ge.s32.totalorder %s9926_s20, 1 }
 0xa46   : > { %v3917_v44 = vmul.f32 0.5, %v3916_v35  ;;  %v6909_v35 = vld [vmem:[%s8731_s25 + $0x60] sm:$0xf] }
 0xa47   : > { %v6910_v50 = vor.u32 %v7462_v37, %v6909_v35  ;;  %v7508_v37 = vld [vmem:[%s8731_s25 + $0x1d4] sm:$0xf0] }
 0xa48   : > { %v3918_v53 = vsub.f32 1.5, %v3917_v44  ;;  %v7110_v44 = vor.u32 %v7512_v30, %v7109_v27 }
 0xa49   : > { %v7663_v59 = vpop.eup %7662 }
 0xa4a   : > { %v3919_v2 = vmul.f32 %v7661_v18, %v3918_v53  ;;  %v3925_v3 = vmul.f32 %v7663_v59, %v9579_v20  ;;  %vm3931_vm13 = vweird.f32 %v7663_v59  ;;  %v6981_v20 = vld [vmem:[%s8731_s25 + $0xf0] sm:$0xf]  ;;  %v7460_v53 = vld [vmem:[%s8731_s25 + $0x54] sm:$0xf0] }
 0xa4b   : > { %vm3932_vm15 = vmor %vm3930_vm14, %vm3931_vm13  ;;  %v6982_v38 = vor.u32 %v7480_v24, %v6981_v20  ;;  %v7490_v24 = vld [vmem:[%s8731_s25 + $0x144] sm:$0xf0] }
 0xa4c   : > { %v3926_v22 = vmul.f32 %v7663_v59, %v3925_v3  ;;  %v3923_v9 = vsel %vm3922_vm12, %v7661_v18, %v3919_v2  ;;  %v7492_v2 = vld [vmem:[%s8731_s25 + $0x154] sm:$0xf0]  ;;  %v6902_v3 = vor.u32 %v7460_v53, %v6901_v51  ;;  %v7022_v27 = vor.u32 %v7490_v24, %v7021_v61  ;;  %v7085_v51 = vld [vmem:[%s8731_s25 + $0x1c0] sm:$0xf]  ;;  %v7479_v53 = vld [vmem:[%s8731_s25 + $0xf4] sm:$0xf] }
 0xa4d   : > { %v3934_v13 = vmul.f32 %v3923_v9, %v9462_v48  ;;  %v3935_v14 = vmul.f32 %v3923_v9, %v9464_v49  ;;  %v7030_v9 = vor.u32 %v7492_v2, %v7029_v33  ;;  %v6986_v33 = vor.u32 %v7479_v53, %v6983_v57  ;;  %v7047_v24 = vld [vmem:[%s8731_s25 + $0x178] sm:$0xf0] }
 0xa4e   : > { %v3927_v41 = vmul.f32 0.5, %v3926_v22  ;;  %v7458_v22 = vld [vmem:[%s8731_s25 + $0x44] sm:$0xf0]  ;;  %v6871_v57 = vld [vmem:[%s8731_s25 + $0x18] sm:$0xf0] }
 0xa4f   : > { %v3944_v16 = vmul.f32 %v3942_v11, %v3934_v13  ;;  %v3945_v23 = vmul.f32 %v3943_v12, %v3935_v14  ;;  %v6877_v14 = vld [vmem:[%s8731_s25 + $0x20] sm:$0xf] }
 0xa50   : > { %v3928_v4 = vsub.f32 1.5, %v3927_v41  ;;  %v6894_v41 = vor.u32 %v7458_v22, %v6893_v62  ;;  %v6903_v62 = vld [vmem:[%s8731_s25 + $0x58] sm:$0xf0]  ;;  %v7077_v22 = vld [vmem:[%s8731_s25 + $0x1b0] sm:$0xf] }
 0xa51   : > { %v9622_v26 = vadd.f32 %v3952_v15, %v3944_v16  ;;  %v9624_v31 = vadd.f32 %v3953_v63, %v3945_v23  ;;  %v7078_v8 = vor.u32 %v7504_v7, %v7077_v22  ;;  %v7103_v7 = vld [vmem:[%s8731_s25 + $0x1e8] sm:$0xf0] }
 0xa52   : > { %v3929_v1 = vmul.f32 %v7663_v59, %v3928_v4  ;;  %v7456_v4 = vld [vmem:[%s8731_s25 + $0x34] sm:$0xf0] }
 0xa53   : > { %v6886_v13 = vor.u32 %v7456_v4, %v6885_v42  ;;  %v7484_v4 = vld [vmem:[%s8731_s25 + $0x114] sm:$0xf0] }
 0xa54   : > { %v3933_v58 = vsel %vm3932_vm15, %v7663_v59, %v3929_v1  ;;  %v7038_v59 = vor.u32 %v7494_v45, %v7037_v43  ;;  %v7461_v43 = vld [vmem:[%s8731_s25 + $0x64] sm:$0xf] }
 0xa55   : > { %v3936_v17 = vmul.f32 %v3933_v58, %v9471_v54  ;;  %v3937_v48 = vmul.f32 %v3933_v58, %v9473_v55  ;;  %v7496_v55 = vld [vmem:[%s8731_s25 + $0x174] sm:$0xf0]  ;;  %v7470_v58 = vld [vmem:[%s8731_s25 + $0xa4] sm:$0xf0] }
 0xa56   : > { %v7046_v28 = vor.u32 %v7496_v55, %v7045_v25  ;;  %v7463_v25 = vld [vmem:[%s8731_s25 + $0x74] sm:$0xf]  ;;  %v6919_v55 = vld [vmem:[%s8731_s25 + $0x78] sm:$0xf0] }
 0xa57   : > { %v3946_v18 = vmul.f32 %v3942_v11, %v3936_v17  ;;  %v3947_v49 = vmul.f32 %v3943_v12, %v3937_v48  ;;  %v6949_v11 = vld [vmem:[%s8731_s25 + $0xb0] sm:$0xf]  ;;  %v7472_v12 = vld [vmem:[%s8731_s25 + $0xb4] sm:$0xf0]  ;;  %v6922_v30 = vor.u32 %v7463_v25, %v6919_v55 }
 0xa58   : > { %v6950_v1 = vor.u32 %v7472_v12, %v6949_v11  ;;  %v6869_v17 = vld [vmem:[%s8731_s25 + $0x10] sm:$0xf]  ;;  %v7452_v48 = vld [vmem:[%s8731_s25 + $0x14] sm:$0xf0]  ;;  %v7457_v12 = vld [vmem:[%s8731_s25 + $0x44] sm:$0xf] }
 0xa59   : > { %v9626_v0 = vadd.f32 %v3952_v15, %v3946_v18  ;;  %v9628_v54 = vadd.f32 %v3953_v63, %v3947_v49  ;;  %v7454_v15 = vld [vmem:[%s8731_s25 + $0x24] sm:$0xf0]  ;;  %v6941_v63 = vld [vmem:[%s8731_s25 + $0xa0] sm:$0xf]  ;;  %v6870_v18 = vor.u32 %v7452_v48, %v6869_v17  ;;  %v7061_v25 = vld [vmem:[%s8731_s25 + $0x190] sm:$0xf] }
 0xa5a   : > { %v6878_v16 = vor.u32 %v7454_v15, %v6877_v14  ;;  %v6942_v23 = vor.u32 %v7470_v58, %v6941_v63  ;;  %v6861_v49 = vld [vmem:[%s8731_s25] sm:$0xf]  ;;  %v7502_v15 = vld [vmem:[%s8731_s25 + $0x1a4] sm:$0xf0]  ;;  %v7475_v58 = vld [vmem:[%s8731_s25 + $0xd4] sm:$0xf] }
 0xa5b   : > { %v4022_v29 = vpack.c.bf16 %v9626_v0, %v9622_v26  ;;  %v4023_v32 = vpack.c.bf16 %v9628_v54, %v9624_v31  ;;  %v6862_v20 = vor.u32 %v7450_v21, %v6861_v49  ;;  %v6989_v17 = vld [vmem:[%s8731_s25 + $0x100] sm:$0xf]  ;;  %v7482_v48 = vld [vmem:[%s8731_s25 + $0x104] sm:$0xf0]  ;;  %v7455_v49 = vld [vmem:[%s8731_s25 + $0x34] sm:$0xf] }
 0xa5c   : > { %v6887_v21 = vld [vmem:[%s8731_s25 + $0x38] sm:$0xf0] }
 0xa5d   : > { %4362 = vmatmul.bf16.vlgmr.msra.gmra.mxu0 %v4022_v29  ;;  %4376 = vmatmul.bf16.vlgmr.msra.gmra.mxu1 %v4023_v32  ;;  %v6890_v61 = vor.u32 %v7455_v49, %v6887_v21  ;;  %v7465_v21 = vld [vmem:[%s8731_s25 + $0x84] sm:$0xf] }
 0xa5e   : > { %4390 = vmatmul.bf16.vlgmr.msra.gmra.mxu2 %v4022_v29  ;;  %4404 = vmatmul.bf16.vlgmr.msra.gmra.mxu3 %v4023_v32 }
 0xa5f   : > { %4868 = vmatpush.bf16.msra.mxu0 %v6918_v34  ;;  %4882 = vmatpush.bf16.msra.mxu1 %v6982_v38  ;;  %v7093_v34 = vld [vmem:[%s8731_s25 + $0x1d0] sm:$0xf] }
 0xa60   : > { %4896 = vmatpush.bf16.msra.mxu2 %v7046_v28  ;;  %4910 = vmatpush.bf16.msra.mxu3 %v7110_v44  ;;  %v7094_v38 = vor.u32 %v7508_v37, %v7093_v34  ;;  %v7014_v28 = vor.u32 %v7488_v40, %v7013_v39  ;;  %v6911_v44 = vld [vmem:[%s8731_s25 + $0x68] sm:$0xf0] }
 0xa61   : > { %v6914_v45 = vor.u32 %v7461_v43, %v6911_v44  ;;  %v6879_v37 = vld [vmem:[%s8731_s25 + $0x28] sm:$0xf0]  ;;  %v7498_v43 = vld [vmem:[%s8731_s25 + $0x184] sm:$0xf0] }
 0xa62   : > { %v7039_v40 = vld [vmem:[%s8731_s25 + $0x168] sm:$0xf0] }
 0xa63   : > { %4869 = vmatpush.bf16.msra.mxu0 %v6910_v50  ;;  %4883 = vmatpush.bf16.msra.mxu1 %v6974_v36  ;;  %v6926_v50 = vor.u32 %v7466_v47, %v6925_v46  ;;  %v7506_v36 = vld [vmem:[%s8731_s25 + $0x1c4] sm:$0xf0]  ;;  %v7471_v46 = vld [vmem:[%s8731_s25 + $0xb4] sm:$0xf]  ;;  %v6951_v47 = vld [vmem:[%s8731_s25 + $0xb8] sm:$0xf0] }
 0xa64   : > { %4897 = vmatpush.bf16.msra.mxu2 %v7038_v59  ;;  %4911 = vmatpush.bf16.msra.mxu3 %v7102_v60  ;;  %v7086_v56 = vor.u32 %v7506_v36, %v7085_v51  ;;  %v7005_v59 = vld [vmem:[%s8731_s25 + $0x120] sm:$0xf]  ;;  %v7486_v60 = vld [vmem:[%s8731_s25 + $0x124] sm:$0xf0]  ;;  %v7511_v51 = vld [vmem:[%s8731_s25 + $0x1f4] sm:$0xf] }
 0xa65   : > { %v7006_v2 = vor.u32 %v7486_v60, %v7005_v59  ;;  %v7111_v36 = vld [vmem:[%s8731_s25 + $0x1f8] sm:$0xf0]  ;;  %v7491_v59 = vld [vmem:[%s8731_s25 + $0x154] sm:$0xf] }
 0xa66   : > { %v7114_v53 = vor.u32 %v7511_v51, %v7111_v36  ;;  %v7071_v36 = vld [vmem:[%s8731_s25 + $0x1a8] sm:$0xf0] }
 0xa67   : > { %4870 = vmatpush.bf16.msra.mxu0 %v6902_v3  ;;  %4884 = vmatpush.bf16.msra.mxu1 %v6966_v5  ;;  %v7459_v3 = vld [vmem:[%s8731_s25 + $0x54] sm:$0xf] }
 0xa68   : > { %4898 = vmatpush.bf16.msra.mxu2 %v7030_v9  ;;  %4912 = vmatpush.bf16.msra.mxu3 %v7094_v38  ;;  %v6906_v5 = vor.u32 %v7459_v3, %v6903_v62  ;;  %v7477_v9 = vld [vmem:[%s8731_s25 + $0xe4] sm:$0xf]  ;;  %v6943_v62 = vld [vmem:[%s8731_s25 + $0xa8] sm:$0xf0] }
 0xa69   : > { %v7493_v38 = vld [vmem:[%s8731_s25 + $0x164] sm:$0xf] }
 0xa6a   : > { %v7042_v44 = vor.u32 %v7493_v38, %v7039_v40  ;;  %v7469_v3 = vld [vmem:[%s8731_s25 + $0xa4] sm:$0xf] }
 0xa6b   : > { %4871 = vmatpush.bf16.msra.mxu0 %v6894_v41  ;;  %4885 = vmatpush.bf16.msra.mxu1 %v6958_v52  ;;  %v6975_v41 = vld [vmem:[%s8731_s25 + $0xe8] sm:$0xf0]  ;;  %v6997_v52 = vld [vmem:[%s8731_s25 + $0x110] sm:$0xf]  ;;  %v6946_v22 = vor.u32 %v7469_v3, %v6943_v62 }
 0xa6c   : > { %4899 = vmatpush.bf16.msra.mxu2 %v7022_v27  ;;  %4913 = vmatpush.bf16.msra.mxu3 %v7086_v56  ;;  %v6978_v42 = vor.u32 %v7477_v9, %v6975_v41  ;;  %v6998_v11 = vor.u32 %v7484_v4, %v6997_v52  ;;  %v7500_v27 = vld [vmem:[%s8731_s25 + $0x194] sm:$0xf0]  ;;  %v7451_v56 = vld [vmem:[%s8731_s25 + $0x14] sm:$0xf]  ;;  %v7449_v9 = vld [vmem:[%s8731_s25 + $0x4] sm:$0xf] }
 0xa6d   : > { %4418 = vmatmul.bf16.vlgmr.msrb.gmra.mxu0 %v4022_v29  ;;  %4432 = vmatmul.bf16.vlgmr.msrb.gmra.mxu1 %v4023_v32  ;;  %v6874_v60 = vor.u32 %v7451_v56, %v6871_v57  ;;  %v6863_v41 = vld [vmem:[%s8731_s25 + $0x8] sm:$0xf0]  ;;  %v9733_v52 = vld [vmem:[%s9925_s13] sm:$0xf] }
 0xa6e   : > { %4446 = vmatmul.bf16.vlgmr.msrb.gmra.mxu2 %v4022_v29  ;;  %4460 = vmatmul.bf16.vlgmr.msrb.gmra.mxu3 %v4023_v32  ;;  %v6933_v29 = vld [vmem:[%s8731_s25 + $0x90] sm:$0xf]  ;;  %v7468_v32 = vld [vmem:[%s8731_s25 + $0x94] sm:$0xf0]  ;;  %v6866_v4 = vor.u32 %v7449_v9, %v6863_v41  ;;  %v6991_v56 = vld [vmem:[%s8731_s25 + $0x108] sm:$0xf0] }
 0xa6f   : > { %4872 = vmatpush.bf16.msra.mxu0 %v6886_v13  ;;  %4886 = vmatpush.bf16.msra.mxu1 %v6950_v1  ;;  %v6934_v35 = vor.u32 %v7468_v32, %v6933_v29  ;;  %v6895_v13 = vld [vmem:[%s8731_s25 + $0x48] sm:$0xf0]  ;;  %v7069_v1 = vld [vmem:[%s8731_s25 + $0x1a0] sm:$0xf]  ;;  %v7062_v32 = vor.u32 %v7500_v27, %v7061_v25  ;;  %v7485_v27 = vld [vmem:[%s8731_s25 + $0x124] sm:$0xf] }
 0xa70   : > { %4900 = vmatpush.bf16.msra.mxu2 %v7014_v28  ;;  %4914 = vmatpush.bf16.msra.mxu3 %v7078_v8  ;;  %v6898_v14 = vor.u32 %v7457_v12, %v6895_v13  ;;  %v7070_v63 = vor.u32 %v7502_v15, %v7069_v1  ;;  %v6959_v29 = vld [vmem:[%s8731_s25 + $0xc8] sm:$0xf0]  ;;  %v7053_v28 = vld [vmem:[%s8731_s25 + $0x180] sm:$0xf]  ;;  %v7467_v13 = vld [vmem:[%s8731_s25 + $0x94] sm:$0xf] }
 0xa71   : > { %v7507_v1 = vld [vmem:[%s8731_s25 + $0x1d4] sm:$0xf]  ;;  %v7087_v25 = vld [vmem:[%s8731_s25 + $0x1c8] sm:$0xf0] }
 0xa73   : > { %4873 = vmatpush.bf16.msra.mxu0 %v6878_v16  ;;  %4887 = vmatpush.bf16.msra.mxu1 %v6942_v23  ;;  %v6967_v16 = vld [vmem:[%s8731_s25 + $0xd8] sm:$0xf0] }
 0xa74   : > { %4901 = vmatpush.bf16.msra.mxu2 %v7006_v2  ;;  %v6970_v23 = vor.u32 %v7475_v58, %v6967_v16  ;;  %4915 = vmatpush.bf16.msra.mxu3 %v7070_v63  ;;  %v7095_v63 = vld [vmem:[%s8731_s25 + $0x1d8] sm:$0xf0] }
 0xa77   : > { %4874 = vmatpush.bf16.msra.mxu0 %v6870_v18  ;;  %4888 = vmatpush.bf16.msra.mxu1 %v6934_v35  ;;  %v6990_v18 = vor.u32 %v7482_v48, %v6989_v17  ;;  %v7453_v35 = vld [vmem:[%s8731_s25 + $0x24] sm:$0xf]  ;;  %v7487_v17 = vld [vmem:[%s8731_s25 + $0x134] sm:$0xf]  ;;  %v7015_v48 = vld [vmem:[%s8731_s25 + $0x138] sm:$0xf0] }
 0xa78   : > { %4902 = vmatpush.bf16.msra.mxu2 %v6998_v11  ;;  %4916 = vmatpush.bf16.msra.mxu3 %v7062_v32  ;;  %v6882_v39 = vor.u32 %v7453_v35, %v6879_v37  ;;  %v7023_v11 = vld [vmem:[%s8731_s25 + $0x148] sm:$0xf0]  ;;  %v7018_v49 = vor.u32 %v7487_v17, %v7015_v48  ;;  %v7079_v35 = vld [vmem:[%s8731_s25 + $0x1b8] sm:$0xf0]  ;;  %v4027_v37 = vperm.slane %v9733_v52, 1 }
 0xa7b   : > { %4875 = vmatpush.bf16.msra.mxu0 %v6862_v20  ;;  %4889 = vmatpush.bf16.msra.mxu1 %v6926_v50  ;;  %v7495_v20 = vld [vmem:[%s8731_s25 + $0x174] sm:$0xf]  ;;  %v6954_v50 = vor.u32 %v7471_v46, %v6951_v47  ;;  %v7501_v46 = vld [vmem:[%s8731_s25 + $0x1a4] sm:$0xf] }
 0xa7c   : > { %v7050_v55 = vor.u32 %v7495_v20, %v7047_v24  ;;  %4903 = vmatpush.bf16.msra.mxu2 %v6990_v18  ;;  %v4026_v18 = vperm.slane %v9733_v52, 0  ;;  %v7505_v20 = vld [vmem:[%s8731_s25 + $0x1c4] sm:$0xf]  ;;  %v7074_v57 = vor.u32 %v7501_v46, %v7071_v36 }
 0xa7f   : > { %4924 = vmatpush.bf16.msrb.mxu0 %v6922_v30  ;;  %4938 = vmatpush.bf16.msrb.mxu1 %v6986_v33  ;;  %v7473_v30 = vld [vmem:[%s8731_s25 + $0xc4] sm:$0xf]  ;;  %v7031_v33 = vld [vmem:[%s8731_s25 + $0x158] sm:$0xf0] }
 0xa80   : > { %v6962_v34 = vor.u32 %v7473_v30, %v6959_v29  ;;  %4952 = vmatpush.bf16.msrb.mxu2 %v7050_v55  ;;  %v7034_v2 = vor.u32 %v7491_v59, %v7031_v33  ;;  %v7090_v55 = vor.u32 %v7505_v20, %v7087_v25  ;;  %v7007_v30 = vld [vmem:[%s8731_s25 + $0x128] sm:$0xf0]  ;;  %v7063_v33 = vld [vmem:[%s8731_s25 + $0x198] sm:$0xf0] }
 0xa81   : > { %v7010_v32 = vor.u32 %v7485_v27, %v7007_v30 }
 0xa83   : > { %4925 = vmatpush.bf16.msrb.mxu0 %v6914_v45  ;;  %4939 = vmatpush.bf16.msrb.mxu1 %v6978_v42  ;;  %v7054_v45 = vor.u32 %v7498_v43, %v7053_v28  ;;  %v7489_v42 = vld [vmem:[%s8731_s25 + $0x144] sm:$0xf] }
 0xa84   : > { %4953 = vmatpush.bf16.msrb.mxu2 %v7042_v44  ;;  %v7026_v12 = vor.u32 %v7489_v42, %v7023_v11  ;;  %v7483_v44 = vld [vmem:[%s8731_s25 + $0x114] sm:$0xf] }
 0xa85   : > { %4917 = vmatpush.bf16.msra.mxu3 %v7054_v45  ;;  %v6999_v45 = vld [vmem:[%s8731_s25 + $0x118] sm:$0xf0] }
 0xa86   : > { %v7002_v51 = vor.u32 %v7483_v44, %v6999_v45 }
 0xa87   : > { %4926 = vmatpush.bf16.msrb.mxu0 %v6906_v5  ;;  %4940 = vmatpush.bf16.msrb.mxu1 %v6970_v23  ;;  %v7509_v5 = vld [vmem:[%s8731_s25 + $0x1e4] sm:$0xf]  ;;  %v7098_v23 = vor.u32 %v7507_v1, %v7095_v63 }
 0xa88   : > { %4954 = vmatpush.bf16.msrb.mxu2 %v7034_v2  ;;  %v7106_v8 = vor.u32 %v7509_v5, %v7103_v7 }
 0xa89   : > { %4966 = vmatpush.bf16.msrb.mxu3 %v7114_v53  ;;  %v7481_v53 = vld [vmem:[%s8731_s25 + $0x104] sm:$0xf] }
 0xa8a   : > { %v6994_v3 = vor.u32 %v7481_v53, %v6991_v56 }
 0xa8b   : > { %4927 = vmatpush.bf16.msrb.mxu0 %v6898_v14  ;;  %4941 = vmatpush.bf16.msrb.mxu1 %v6962_v34  ;;  %v6935_v14 = vld [vmem:[%s8731_s25 + $0x98] sm:$0xf0]  ;;  %v7503_v34 = vld [vmem:[%s8731_s25 + $0x1b4] sm:$0xf] }
 0xa8c   : > { %v6938_v15 = vor.u32 %v7467_v13, %v6935_v14  ;;  %4955 = vmatpush.bf16.msrb.mxu2 %v7026_v12  ;;  %v7082_v40 = vor.u32 %v7503_v34, %v7079_v35  ;;  %v4028_v12 = vperm.slane %v9733_v52, 2  ;;  %v7497_v13 = vld [vmem:[%s8731_s25 + $0x184] sm:$0xf]  ;;  %v7055_v14 = vld [vmem:[%s8731_s25 + $0x188] sm:$0xf0] }
 0xa8d   : > { %4967 = vmatpush.bf16.msrb.mxu3 %v7106_v8 }
 0xa8f   : > { %4928 = vmatpush.bf16.msrb.mxu0 %v6890_v61  ;;  %4942 = vmatpush.bf16.msrb.mxu1 %v6954_v50  ;;  %v6927_v61 = vld [vmem:[%s8731_s25 + $0x88] sm:$0xf0] }
 0xa90   : > { %v6930_v24 = vor.u32 %v7465_v21, %v6927_v61  ;;  %4956 = vmatpush.bf16.msrb.mxu2 %v7018_v49 }
 0xa91   : > { %4968 = vmatpush.bf16.msrb.mxu3 %v7098_v23 }
 0xa93   : > { %4929 = vmatpush.bf16.msrb.mxu0 %v6882_v39  ;;  %4943 = vmatpush.bf16.msrb.mxu1 %v6946_v22 }
 0xa94   : > { %4957 = vmatpush.bf16.msrb.mxu2 %v7010_v32 }
 0xa95   : > { %4969 = vmatpush.bf16.msrb.mxu3 %v7090_v55 }
 0xa97   : > { %4930 = vmatpush.bf16.msrb.mxu0 %v6874_v60  ;;  %4944 = vmatpush.bf16.msrb.mxu1 %v6938_v15  ;;  %v7499_v60 = vld [vmem:[%s8731_s25 + $0x194] sm:$0xf]  ;;  %v7058_v15 = vor.u32 %v7497_v13, %v7055_v14 }
 0xa98   : > { %4958 = vmatpush.bf16.msrb.mxu2 %v7002_v51  ;;  %v7066_v22 = vor.u32 %v7499_v60, %v7063_v33 }
 0xa99   : > { %4970 = vmatpush.bf16.msrb.mxu3 %v7082_v40 }
 0xa9b   : > { %4931 = vmatpush.bf16.msrb.mxu0 %v6866_v4  ;;  %4945 = vmatpush.bf16.msrb.mxu1 %v6930_v24 }
 0xa9c   : > { %4959 = vmatpush.bf16.msrb.mxu2 %v6994_v3 }
 0xa9d   : > { %4971 = vmatpush.bf16.msrb.mxu3 %v7074_v57 }
 0xaa1   : > { %4972 = vmatpush.bf16.msrb.mxu3 %v7066_v22 }
 0xaa5   : > { %4973 = vmatpush.bf16.msrb.mxu3 %v7058_v15 }
 0xada   : > { %v4363_v58 = vpop.f32.mrf.mxu0  ;;  %v4377_v16 = vpop.f32.mrf.mxu1 }
 0xadb   : > { %v4364_v29 = vadd.f32 %v4363_v58, %v4026_v18 }
 0xadd   : > { %v4378_v47 = vadd.f32 %v4377_v16, %v4364_v29 }
 0xadf   : > { %v4466_v62 = vmax.f32 %v4378_v47, 0.0 }
 0xae1   : > { %v4391_v38 = vpop.f32.mrf.mxu2  ;;  %v4405_v39 = vpop.f32.mrf.mxu3 }
 0xae2   : > { %v4365_v28 = vpop.f32.mrf.mxu0  ;;  %v4379_v43 = vpop.f32.mrf.mxu1  ;;  %v4392_v2 = vadd.f32 %v4391_v38, %v4027_v37 }
 0xae3   : > { %v4366_v50 = vadd.f32 %v4365_v28, %v4026_v18  ;;  %v4029_v18 = vperm.slane %v9733_v52, 3 }
 0xae4   : > { %v4406_v41 = vadd.f32 %v4405_v39, %v4392_v2 }
 0xae5   : > { %v4380_v59 = vadd.f32 %v4379_v43, %v4366_v50  ;;  %v4542_v50 = vld [vmem:[%s1093_s24] sm:$0x3] }
 0xae6   : > { %v4467_v63 = vmax.f32 %v4406_v41, 0.0  ;;  %v4544_v51 = vperm.slane %v4542_v50, 0  ;;  %v4545_v53 = vperm.slane %v4542_v50, 1 }
 0xae7   : > { %v4470_v5 = vmax.f32 %v4380_v59, 0.0 }
 0xae9   : > { %v4538_v7 = vpack.c.bf16 %v4470_v5, %v4466_v62  ;;  %v4393_v8 = vpop.f32.mrf.mxu2  ;;  %v4407_v9 = vpop.f32.mrf.mxu3 }
 0xaea   : > { %v4394_v42 = vadd.f32 %v4393_v8, %v4027_v37  ;;  %v4419_v4 = vpop.f32.mrf.mxu0  ;;  %v4433_v11 = vpop.f32.mrf.mxu1 }
 0xaeb   : > { %4876 = vmatmul.bf16.vlgmr.msra.gmra.mxu0 %v4538_v7  ;;  %v4420_v16 = vadd.f32 %v4419_v4, %v4028_v12 }
 0xaec   : > { %v4408_v1 = vadd.f32 %v4407_v9, %v4394_v42 }
 0xaed   : > { %v4434_v21 = vadd.f32 %v4433_v11, %v4420_v16 }
 0xaee   : > { %v4471_v58 = vmax.f32 %v4408_v1, 0.0 }
 0xaef   : > { %v4468_v55 = vmax.f32 %v4434_v21, 0.0 }
 0xaf0   : > { %v4539_v23 = vpack.c.bf16 %v4471_v58, %v4467_v63 }
 0xaf1   : > { %v4447_v17 = vpop.f32.mrf.mxu2  ;;  %v4461_v48 = vpop.f32.mrf.mxu3 }
 0xaf2   : > { %4890 = vmatmul.bf16.vlgmr.msra.gmra.mxu1 %v4539_v23  ;;  %v4421_v49 = vpop.f32.mrf.mxu0  ;;  %v4435_v20 = vpop.f32.mrf.mxu1  ;;  %v4448_v25 = vadd.f32 %v4447_v17, %v4029_v18 }
 0xaf3   : > { %v4422_v61 = vadd.f32 %v4421_v49, %v4028_v12 }
 0xaf4   : > { %v4462_v32 = vadd.f32 %v4461_v48, %v4448_v25 }
 0xaf5   : > { %v4436_v24 = vadd.f32 %v4435_v20, %v4422_v61 }
 0xaf6   : > { %v4469_v38 = vmax.f32 %v4462_v32, 0.0 }
 0xaf7   : > { %v4472_v27 = vmax.f32 %v4436_v24, 0.0 }
 0xaf9   : > { %v4540_v30 = vpack.c.bf16 %v4472_v27, %v4468_v55  ;;  %v4449_v29 = vpop.f32.mrf.mxu2  ;;  %v4463_v35 = vpop.f32.mrf.mxu3 }
 0xafa   : > { %v4450_v34 = vadd.f32 %v4449_v29, %v4029_v18 }
 0xafb   : > { %4904 = vmatmul.bf16.vlgmr.msra.gmra.mxu2 %v4540_v30  ;;  %4932 = vmatmul.bf16.vlgmr.msrb.gmra.mxu0 %v4538_v7 }
 0xafc   : > { %v4464_v37 = vadd.f32 %v4463_v35, %v4450_v34 }
 0xafe   : > { %v4473_v52 = vmax.f32 %v4464_v37, 0.0 }
 0xb00   : > { %v4541_v39 = vpack.c.bf16 %v4473_v52, %v4469_v38 }
 0xb02   : > { %4918 = vmatmul.bf16.vlgmr.msra.gmra.mxu3 %v4541_v39  ;;  %4946 = vmatmul.bf16.vlgmr.msrb.gmra.mxu1 %v4539_v23 }
 0xb0b   : > { %4960 = vmatmul.bf16.vlgmr.msrb.gmra.mxu2 %v4540_v30 }
 0xb12   : > { %4974 = vmatmul.bf16.vlgmr.msrb.gmra.mxu3 %v4541_v39 }
 0xb68   : > { %v4877_v40 = vpop.f32.mrf.mxu0 }
 0xb69   : > { %v4878_v59 = vadd.f32 %v4877_v40, %v4544_v51 }
 0xb6f   : > { %v4891_v28 = vpop.f32.mrf.mxu1 }
 0xb70   : > { %v4879_v44 = vpop.f32.mrf.mxu0  ;;  %v4892_v33 = vadd.f32 %v4891_v28, %v4878_v59 }
 0xb71   : > { %v4880_v9 = vadd.f32 %v4879_v44, %v4544_v51  ;;  %v5044_v51 = vperm.slane %v9608_v10, 2 }
 0xb77   : > { %v4893_v45 = vpop.f32.mrf.mxu1 }
 0xb78   : > { %v4933_v36 = vpop.f32.mrf.mxu0  ;;  %v4894_v4 = vadd.f32 %v4893_v45, %v4880_v9  ;;  %v5034_v45 = vperm.slane %v9603_v6, 2 }
 0xb79   : > { %v4934_v2 = vadd.f32 %v4933_v36, %v4545_v53  ;;  %v5045_v36 = vperm.slane %v9608_v10, 6 }
 0xb7e   : > { %v4905_v43 = vpop.f32.mrf.mxu2 }
 0xb7f   : > { %v4947_v56 = vpop.f32.mrf.mxu1  ;;  %v4906_v3 = vadd.f32 %v4905_v43, %v4892_v33 }
 0xb80   : > { %v4948_v62 = vadd.f32 %v4947_v56, %v4934_v2  ;;  %v4935_v7 = vpop.f32.mrf.mxu0  ;;  %v5048_v2 = vperm.slane %v5044_v51, 2 }
 0xb81   : > { %v4936_v11 = vadd.f32 %v4935_v7, %v4545_v53 }
 0xb85   : > { %v4919_v46 = vpop.f32.mrf.mxu3 }
 0xb86   : > { %v4907_v47 = vpop.f32.mrf.mxu2  ;;  %v4920_v5 = vadd.f32 %v4919_v46, %v4906_v3  ;;  %v5035_v46 = vperm.slane %v9603_v6, 6  ;;  %v5049_v3 = vperm.slane %v5045_v36, 2 }
 0xb87   : > { %v4949_v42 = vpop.f32.mrf.mxu1  ;;  %v4908_v1 = vadd.f32 %v4907_v47, %v4894_v4 }
 0xb88   : > { %v4980_v12 = vadd.f32 %v4920_v5, %v9622_v26  ;;  %v4950_v15 = vadd.f32 %v4949_v42, %v4936_v11  ;;  %v5039_v59 = vperm.slane %v5035_v46, 2 }
 0xb8d   : > { %v4921_v57 = vpop.f32.mrf.mxu3 }
 0xb8e   : > { %v4961_v60 = vpop.f32.mrf.mxu2  ;;  %v4922_v58 = vadd.f32 %v4921_v57, %v4908_v1  ;;  %v5038_v57 = vperm.slane %v5034_v45, 2 }
 0xb8f   : > { %v4962_v22 = vadd.f32 %v4961_v60, %v4948_v62 }
 0xb90   : > { %v4982_v48 = vadd.f32 %v4922_v58, %v9626_v0 }
 0xb95   : > { %v4975_v8 = vpop.f32.mrf.mxu3 }
 0xb96   : > { %v4976_v41 = vadd.f32 %v4975_v8, %v4962_v22  ;;  %v4963_v14 = vpop.f32.mrf.mxu2 }
 0xb97   : > { %v4964_v16 = vadd.f32 %v4963_v14, %v4950_v15 }
 0xb98   : > { %v4981_v13 = vadd.f32 %v4976_v41, %v9624_v31 }
 0xb9a   : > { %v4984_v63 = vadd.f32 %v4981_v13, %v4980_v12 }
 0xb9c   : > { %4985 = vadd.xlane.f32.xlu0 %v4984_v63 }
 0xb9d   : > { %v4977_v23 = vpop.f32.mrf.mxu3 }
 0xb9e   : > { %v4978_v17 = vadd.f32 %v4977_v23, %v4964_v16 }
 0xba0   : > { %v4983_v18 = vadd.f32 %v4978_v17, %v9628_v54 }
 0xba2   : > { %v4987_v49 = vadd.f32 %v4983_v18, %v4982_v48 }
 0xba4   : > { %4988 = vadd.xlane.f32.xlu1 %v4987_v49 }
 0xc0f   : > { %v4986_v21 = vpop.xlane.xlu0 %4985 }
 0xc10   : > { %v4990_v26 = vmul.f32 %v4986_v21, %v9092_v19 }
 0xc12   : > { %v4992_v61 = vsub.f32 %v4980_v12, %v4990_v26  ;;  %v4993_v31 = vsub.f32 %v4981_v13, %v4990_v26 }
 0xc14   : > { %v4996_v20 = vmul.f32 %v4992_v61, %v4992_v61  ;;  %v4997_v24 = vmul.f32 %v4993_v31, %v4993_v31 }
 0xc16   : > { %v5000_v25 = vadd.f32 %v4997_v24, %v4996_v20 }
 0xc17   : > { %v4989_v55 = vpop.xlane.xlu1 %4988 }
 0xc18   : > { %v4991_v27 = vmul.f32 %v4989_v55, %v9092_v19  ;;  %5001 = vadd.xlane.f32.xlu2 %v5000_v25 }
 0xc1a   : > { %v4994_v30 = vsub.f32 %v4982_v48, %v4991_v27  ;;  %v4995_v29 = vsub.f32 %v4983_v18, %v4991_v27 }
 0xc1c   : > { %v4998_v32 = vmul.f32 %v4994_v30, %v4994_v30  ;;  %v4999_v0 = vmul.f32 %v4995_v29, %v4995_v29 }
 0xc1e   : > { %v5003_v34 = vadd.f32 %v4999_v0, %v4998_v32 }
 0xc20   : > { %5004 = vadd.xlane.f32.xlu0 %v5003_v34 }
 0xc8b   : > { %v5002_v54 = vpop.xlane.xlu2 %5001 }
 0xc8c   : > { %v5006_v35 = vmul.f32 %v5002_v54, %v9092_v19 }
 0xc8e   : > { %v5008_v37 = vadd.f32 1e-05, %v5006_v35 }
 0xc90   : > { %7664 = vrsqrt.f32 %v5008_v37  ;;  %vm5016_vm1 = vweird.f32 %v5008_v37 }
 0xc93   : > { %v5005_v38 = vpop.xlane.xlu0 %5004 }
 0xc94   : > { %v5007_v52 = vmul.f32 %v5005_v38, %v9092_v19 }
 0xc96   : > { %v7665_v39 = vpop.eup %7664  ;;  %v5009_v40 = vadd.f32 1e-05, %v5007_v52 }
 0xc97   : > { %v5011_v28 = vmul.f32 %v7665_v39, %v5008_v37  ;;  %vm5017_vm0 = vweird.f32 %v7665_v39 }
 0xc98   : > { %7666 = vrsqrt.f32 %v5009_v40  ;;  %vm5018_vm2 = vmor %vm5016_vm1, %vm5017_vm0  ;;  %vm5026_vm4 = vweird.f32 %v5009_v40 }
 0xc99   : > { %v5012_v43 = vmul.f32 %v7665_v39, %v5011_v28 }
 0xc9b   : > { %v5013_v44 = vmul.f32 0.5, %v5012_v43 }
 0xc9d   : > { %v5014_v47 = vsub.f32 1.5, %v5013_v44 }
 0xc9e   : > { %v7667_v50 = vpop.eup %7666 }
 0xc9f   : > { %v5015_v53 = vmul.f32 %v7665_v39, %v5014_v47  ;;  %v5021_v56 = vmul.f32 %v7667_v50, %v5009_v40  ;;  %vm5027_vm3 = vweird.f32 %v7667_v50 }
 0xca0   : > { %vm5028_vm5 = vmor %vm5026_vm4, %vm5027_vm3 }
 0xca1   : > { %v5019_v60 = vsel %vm5018_vm2, %v7665_v39, %v5015_v53  ;;  %v5022_v33 = vmul.f32 %v7667_v50, %v5021_v56 }
 0xca2   : > { %v5030_v62 = vmul.f32 %v5019_v60, %v4992_v61  ;;  %v5031_v5 = vmul.f32 %v5019_v60, %v4993_v31 }
 0xca3   : > { %v5023_v6 = vmul.f32 0.5, %v5022_v33 }
 0xca4   : > { %v5040_v22 = vmul.f32 %v5038_v57, %v5030_v62  ;;  %v5041_v7 = vmul.f32 %v5039_v59, %v5031_v5 }
 0xca5   : > { %v5024_v8 = vsub.f32 1.5, %v5023_v6 }
 0xca6   : > { %v5050_v9 = vadd.f32 %v5048_v2, %v5040_v22  ;;  %v5051_v41 = vadd.f32 %v5049_v3, %v5041_v7 }
 0xca7   : > { %v5025_v10 = vmul.f32 %v7667_v50, %v5024_v8 }
 0xca9   : > { %v5029_v42 = vsel %vm5028_vm5, %v7667_v50, %v5025_v10 }
 0xcaa   : > { %v5032_v4 = vmul.f32 %v5029_v42, %v4994_v30  ;;  %v5033_v11 = vmul.f32 %v5029_v42, %v4995_v29  ;;  %5057 = sbr.rel (%p7115_p5) target bundleno = 3251 (0xcb3), region = 176 }
 0xcac   : > { %v5042_v12 = vmul.f32 %v5038_v57, %v5032_v4  ;;  %v5043_v13 = vmul.f32 %v5039_v59, %v5033_v11 }
 0xcae   : > { %v5052_v14 = vadd.f32 %v5048_v2, %v5042_v12  ;;  %v5053_v1 = vadd.f32 %v5049_v3, %v5043_v13 }
 0xcaf   : > { %5058 = vst [vmem:[#allocation26] sm:$0xff] %v5050_v9 }
 0xcb0   : > { %5059 = vst [vmem:[#allocation26 + $0x8] sm:$0xff] %v5051_v41 }
 0xcb1   : > { %5060 = vst [vmem:[#allocation26 + $0x10] sm:$0xff] %v5052_v14 }
 0xcb2   : > { %5061 = vst [vmem:[#allocation26 + $0x18] sm:$0xff] %v5053_v1 }
 0xcb3 PF: > { %s9927_s7 = sld [smem:[#allocation38_spill]] }
 0xcb9   : > { %p7116_p8 = scmp.ne.s32.totalorder %s9927_s7, 1 }
 0xcba   : > { %s9928_s1 = sld [smem:[#allocation64_spill]] (!%p7116_p8) }
 0xcbb   : > { %5065 = sbr.rel (%p7116_p8) target bundleno = 3544 (0xdd8), region = 180  ;;  %s9929_s26 = sld [smem:[#allocation65_spill]] (!%p7116_p8) }
 0xcc0   : > { %v5068_v15 = vadd.f32 %v5051_v41, %v5050_v9  ;;  %v5071_v63 = vadd.f32 %v5053_v1, %v5052_v14  ;;  %v5066_v38 = vld [vmem:[%s9928_s1] sm:$0x3] }
 0xcc1   : > { %v5067_v40 = vld [vmem:[%s9929_s26] sm:$0x3]  ;;  %v5119_v43 = vperm.slane %v5066_v38, 0  ;;  %v5120_v44 = vperm.slane %v5066_v38, 1 }
 0xcc2   : > { %5069 = vadd.xlane.f32.xlu0 %v5068_v15  ;;  %v5128_v51 = vperm.slane %v5067_v40, 0  ;;  %v5129_v36 = vperm.slane %v5067_v40, 1 }
 0xcca   : > { %5072 = vadd.xlane.f32.xlu0 %v5071_v63 }
 0xd35   : > { %v5070_v58 = vpop.xlane.xlu0 %5069 }
 0xd36   : > { %v5074_v16 = vmul.f32 %v5070_v58, %v9092_v19 }
 0xd38   : > { %v5076_v23 = vsub.f32 %v5050_v9, %v5074_v16  ;;  %v5077_v17 = vsub.f32 %v5051_v41, %v5074_v16 }
 0xd3a   : > { %v5080_v48 = vmul.f32 %v5076_v23, %v5076_v23  ;;  %v5081_v18 = vmul.f32 %v5077_v17, %v5077_v17 }
 0xd3c   : > { %v5084_v49 = vadd.f32 %v5081_v18, %v5080_v48 }
 0xd3d   : > { %v5073_v21 = vpop.xlane.xlu0 %5072 }
 0xd3e   : > { %v5075_v26 = vmul.f32 %v5073_v21, %v9092_v19  ;;  %5085 = vadd.xlane.f32.xlu1 %v5084_v49 }
 0xd40   : > { %v5078_v61 = vsub.f32 %v5052_v14, %v5075_v26  ;;  %v5079_v31 = vsub.f32 %v5053_v1, %v5075_v26 }
 0xd42   : > { %v5082_v20 = vmul.f32 %v5078_v61, %v5078_v61  ;;  %v5083_v24 = vmul.f32 %v5079_v31, %v5079_v31 }
 0xd44   : > { %v5087_v25 = vadd.f32 %v5083_v24, %v5082_v20 }
 0xd46   : > { %5088 = vadd.xlane.f32.xlu1 %v5087_v25 }
 0xdb1   : > { %v5086_v55 = vpop.xlane.xlu1 %5085 }
 0xdb2   : > { %v5090_v27 = vmul.f32 %v5086_v55, %v9092_v19 }
 0xdb4   : > { %v5092_v30 = vadd.f32 1e-05, %v5090_v27 }
 0xdb6   : > { %7674 = vrsqrt.f32 %v5092_v30  ;;  %vm5100_vm7 = vweird.f32 %v5092_v30 }
 0xdb9   : > { %v5089_v29 = vpop.xlane.xlu1 %5088 }
 0xdba   : > { %v5091_v32 = vmul.f32 %v5089_v29, %v9092_v19 }
 0xdbc   : > { %v7675_v0 = vpop.eup %7674  ;;  %v5093_v34 = vadd.f32 1e-05, %v5091_v32 }
 0xdbd   : > { %v5095_v54 = vmul.f32 %v7675_v0, %v5092_v30  ;;  %vm5101_vm6 = vweird.f32 %v7675_v0 }
 0xdbe   : > { %7676 = vrsqrt.f32 %v5093_v34  ;;  %vm5102_vm8 = vmor %vm5100_vm7, %vm5101_vm6  ;;  %vm5110_vm10 = vweird.f32 %v5093_v34 }
 0xdbf   : > { %v5096_v35 = vmul.f32 %v7675_v0, %v5095_v54 }
 0xdc1   : > { %v5097_v37 = vmul.f32 0.5, %v5096_v35 }
 0xdc3   : > { %v5098_v52 = vsub.f32 1.5, %v5097_v37 }
 0xdc4   : > { %v7677_v39 = vpop.eup %7676 }
 0xdc5   : > { %v5099_v28 = vmul.f32 %v7675_v0, %v5098_v52  ;;  %v5105_v19 = vmul.f32 %v7677_v39, %v5093_v34  ;;  %vm5111_vm9 = vweird.f32 %v7677_v39 }
 0xdc6   : > { %vm5112_vm11 = vmor %vm5110_vm10, %vm5111_vm9 }
 0xdc7   : > { %v5103_v45 = vsel %vm5102_vm8, %v7675_v0, %v5099_v28  ;;  %v5106_v46 = vmul.f32 %v7677_v39, %v5105_v19 }
 0xdc8   : > { %v5114_v47 = vmul.f32 %v5103_v45, %v5076_v23  ;;  %v5115_v50 = vmul.f32 %v5103_v45, %v5077_v17 }
 0xdc9   : > { %v5107_v53 = vmul.f32 0.5, %v5106_v46 }
 0xdca   : > { %v5123_v56 = vmul.f32 %v5119_v43, %v5114_v47  ;;  %v5124_v57 = vmul.f32 %v5120_v44, %v5115_v50 }
 0xdcb   : > { %v5108_v59 = vsub.f32 1.5, %v5107_v53 }
 0xdcc   : > { %v5132_v60 = vadd.f32 %v5128_v51, %v5123_v56  ;;  %v5133_v33 = vadd.f32 %v5129_v36, %v5124_v57 }
 0xdcd   : > { %v5109_v2 = vmul.f32 %v7677_v39, %v5108_v59 }
 0xdce   : > { %5136 = vst [vmem:[#allocation26] sm:$0xff] %v5132_v60 }
 0xdcf   : > { %5137 = vst [vmem:[#allocation26 + $0x8] sm:$0xff] %v5133_v33  ;;  %v5113_v3 = vsel %vm5112_vm11, %v7677_v39, %v5109_v2 }
 0xdd0   : > { %v5116_v62 = vmul.f32 %v5113_v3, %v5078_v61  ;;  %v5117_v5 = vmul.f32 %v5113_v3, %v5079_v31 }
 0xdd2   : > { %v5125_v6 = vmul.f32 %v5119_v43, %v5116_v62  ;;  %v5126_v22 = vmul.f32 %v5120_v44, %v5117_v5 }
 0xdd4   : > { %v5134_v7 = vadd.f32 %v5128_v51, %v5125_v6  ;;  %v5135_v8 = vadd.f32 %v5129_v36, %v5126_v22 }
 0xdd6   : > { %5138 = vst [vmem:[#allocation26 + $0x10] sm:$0xff] %v5134_v7 }
 0xdd7   : > { %5139 = vst [vmem:[#allocation26 + $0x18] sm:$0xff] %v5135_v8 }
 0xdd8 PF: > { %s9930_s6 = sld [smem:[#allocation38_spill]]  ;;  %s8212_s28 = smov [#allocation26]  }
 0xdd9   : > { %s5145_s24 = sshll.u32 %s8212_s28, 4  ;;  %s9931_s19 = sld [smem:[#allocation66_spill]]  ;;  %s5146_s24 = int_to_ptr.vmem [resolvable:$true] %s5145_s24 }
 0xdda   : > { %s8213_s5 = smov 256   ;;  %s8214_s2 = smov 16  }
 0xdde   : > { %p7573_p9 = scmp.eq.s32.totalorder %s9930_s6, 1 }
 0xddf   : > { %s5147_s0 = sshll.u32 %s9931_s19, 4  ;;  %s5148_s0 = int_to_ptr.hbm [resolvable:$true] %s5147_s0 }
 0xde0   : > { %7554 = dma.vmem_to_hbm [thread:$0]  (%p7573_p9), %s5146_s24, 512, %s5148_s0, [#allocation4], %s8213_s5, %s8213_s5, %s8214_s2  }
 0xde1   : > { %8181 = dma.done.wait (%p7573_p9), [#allocation4], 512  }
 0xde2   : > { %8183 = vsyncadd (%p7573_p9), [#allocation4], 4294966784 }
 0xde3 PF: > { %s9932_s30 = sld [smem:[#allocation39_spill]] }
 0xde4   : > { %s9933_s3 = sld [smem:[#allocation36_spill]] }
 0xde5   : > { %s9934_s28 = sld [smem:[#allocation37_spill]] }
 0xde6   : > { %s9935_s29 = sld [smem:[#allocation40_spill]] }
 0xde9   : > { %p50_p10 = scmp.ge.s32.totalorder %s9932_s30, 4  }
 0xdeb   :  { %52 = sbr.rel (!%p50_p10) target bundleno = 40 (0x28), region = 313 }
 0xdf0   :  { %5164 = vsyncpa [#allocation3], 1 }
 0xdf1   :  { %5166 = vsyncpa [#allocation3 + $0x1], 1 }
 0xdf2   :  { %5167 = vsyncpa [#allocation6], 1 }
 0xdf3   :  { %5168 = vsyncpa [#allocation9], 1 }
 0xdf4   :  { %5170 = vsyncpa [#allocation9 + $0x1], 1 }
 0xdf5   :  { %5171 = vsyncpa [#allocation12], 1 }
 0xdf6   :  { %5173 = vsyncpa [#allocation12 + $0x1], 1 }
 0xdf7   :  { %5174 = vsyncpa [#allocation15], 1 }
 0xdf8   :  { %5176 = vsyncpa [#allocation15 + $0x1], 1 }
 0xdf9   :  { %5177 = vsyncpa [#allocation18], 1 }
 0xdfa   :  { %5179 = vsyncpa [#allocation18 + $0x1], 1 }
 0xdfb   :  { %5180 = vsyncpa [#allocation21], 1 }
 0xdfc   :  { %5182 = vsyncpa [#allocation21 + $0x1], 1 }
 0xdfd   :  { %5183 = vsyncpa [#allocation24], 1 }
 0xdfe   :  { %5185 = vsyncpa [#allocation24 + $0x1], 1 }
 0xdff   :  { %5186 = vsyncpa [#allocation4], 1 }
 0xe00   :  { %5188 = vsyncpa [#allocation4 + $0x1], 1 }

</bundles_post_ra>
